<compile_context>
chip_gen: v7x
topology: tpu7x:2x2x1
jax: 0.10.0
libtpu: 0.0.40
codegen_flags: <defaults>
</compile_context>

<pallas_src>
import functools

import numpy as np

import jax
import jax.numpy as jnp
from jax.experimental import pallas as pl
from jax.experimental.pallas import tpu as pltpu

BN_EPS = 1e-5


# ----------------------------------------------------------------------------
# Shared helpers (plain JAX / numpy glue)
# ----------------------------------------------------------------------------
def _fold_bn(gamma, beta, mean, var):
    """Eval-mode BatchNorm folded into per-channel scale/shift, f32 [1, C]."""
    inv_std = jax.lax.rsqrt(var.astype(jnp.float32) + BN_EPS)
    scale = (gamma * inv_std).reshape(1, -1).astype(jnp.float32)
    shift = (beta - mean * gamma * inv_std).reshape(1, -1).astype(jnp.float32)
    return scale, shift


def _im2col_s2(x, hout, wout):
    """3x3 / stride-2 / pad-1 im2col: [N,H,W,C] -> [N*hout*wout, 9*C].

    K ordering is (kh, kw, C), matching w_hwio.reshape(9*C, Cout)."""
    n, _, _, c = x.shape
    xp = jnp.pad(x, ((0, 0), (1, 1), (1, 1), (0, 0)))
    cols = []
    for kh in range(3):
        for kw in range(3):
            cols.append(jax.lax.slice(
                xp,
                (0, kh, kw, 0),
                (n, kh + 2 * (hout - 1) + 1, kw + 2 * (wout - 1) + 1, c),
                (1, 2, 2, 1)))
    return jnp.concatenate(cols, axis=-1).reshape(n * hout * wout, 9 * c)


def _conv3_selection_matrices(n, h_in, w_in, h_out, w_out):
    """0/1 gather matrices S_t [9, N*Hout*Wout, N*Hin*Win] for a 3x3/s2/p1 conv.

    Row (n,h,w) of S_t picks input row (n, 2h-1+kh, 2w-1+kw) (zero if padded)."""
    m_out = n * h_out * w_out
    m_in = n * h_in * w_in
    sel = np.zeros((9, m_out, m_in), np.float32)
    for kh in range(3):
        for kw in range(3):
            t = kh * 3 + kw
            for b in range(n):
                for h in range(h_out):
                    r = 2 * h - 1 + kh
                    if not 0 <= r < h_in:
                        continue
                    for w in range(w_out):
                        c = 2 * w - 1 + kw
                        if not 0 <= c < w_in:
                            continue
                        sel[t, (b * h_out + h) * w_out + w,
                            (b * h_in + r) * w_in + c] = 1.0
    return jnp.asarray(sel, jnp.bfloat16)   # 0/1 values are exact in bf16


# ----------------------------------------------------------------------------
# Kernel 1: conv1 as bf16 im2col matmul + folded-BN scale/shift + ReLU
#   grid = (Cout tiles ["parallel" -> both TCs on v7x], 3 K-steps ["arbitrary"])
#   Accumulates directly into the resident f32 output block.
# ----------------------------------------------------------------------------
def _conv_bn_relu_kernel(p_ref, w_ref, scale_ref, shift_ref, o_ref):
    k = pl.program_id(1)

    @pl.when(k == 0)
    def _init():
        o_ref[...] = jnp.zeros_like(o_ref)

    o_ref[...] += jnp.dot(p_ref[...], w_ref[...],
                          preferred_element_type=jnp.float32)

    @pl.when(k == pl.num_programs(1) - 1)
    def _finalize():
        y = o_ref[...] * scale_ref[...] + shift_ref[...]
        o_ref[...] = jnp.maximum(y, 0.0)


def conv3x3_s2_bn_relu(x, w_hwio, gamma, beta, mean, var):
    """x: [N,H,W,Cin] NHWC, w_hwio: [3,3,Cin,Cout] -> [N,Hout,Wout,Cout] f32."""
    N, H, W, Cin = x.shape
    Cout = w_hwio.shape[-1]
    Hout = (H - 1) // 2 + 1
    Wout = (W - 1) // 2 + 1

    patches = _im2col_s2(x.astype(jnp.bfloat16), Hout, Wout)     # [M, 9*Cin] bf16
    wmat = w_hwio.reshape(9 * Cin, Cout).astype(jnp.bfloat16)    # [9*Cin, Cout] bf16
    scale, shift = _fold_bn(gamma, beta, mean, var)

    M, K = patches.shape
    tk = 3 * Cin                       # 3 K-steps (one per kernel row)
    assert K % tk == 0
    tn = 256 if Cout % 256 == 0 else Cout
    grid = (Cout // tn, K // tk)

    out = pl.pallas_call(
        _conv_bn_relu_kernel,
        out_shape=jax.ShapeDtypeStruct((M, Cout), jnp.float32),
        grid_spec=pltpu.PrefetchScalarGridSpec(
            num_scalar_prefetch=0,
            grid=grid,
            in_specs=[
                pl.BlockSpec((M, tk), lambda j, k: (0, k)),
                pl.BlockSpec((tk, tn), lambda j, k: (k, j)),
                pl.BlockSpec((1, tn), lambda j, k: (0, j)),
                pl.BlockSpec((1, tn), lambda j, k: (0, j)),
            ],
            out_specs=pl.BlockSpec((M, tn), lambda j, k: (0, j)),
        ),
        compiler_params=pltpu.CompilerParams(
            dimension_semantics=("parallel", "arbitrary")),
    )(patches, wmat, scale, shift)

    return out.reshape(N, Hout, Wout, Cout)


# ----------------------------------------------------------------------------
# Kernel 2: fused conv2(+BN+ReLU) -> conv3(+BN+ReLU) -> global avg pool -> fc
#   Everything after layer 1 is tiny (<= 32x4608 bf16), so it all lives in
#   VMEM and runs in a single gridless pallas_call.  conv3's spatial gather is
#   done with constant 0/1 selection-matrix matmuls (pure MXU work).
# ----------------------------------------------------------------------------
def _tail_kernel(p2_ref, w2_ref, s2_ref, b2_ref, sel_ref, w3_ref, s3_ref,
                 b3_ref, fcw_ref, fcb_ref, logits_ref, feat_ref):
    C2 = w2_ref.shape[1]
    C3 = w3_ref.shape[1]
    M3 = sel_ref.shape[1]
    N = feat_ref.shape[0]
    rows_per_img = M3 // N

    # conv2 + bn2 + relu   (dropout = identity in eval mode)
    y2 = jnp.dot(p2_ref[...], w2_ref[...], preferred_element_type=jnp.float32)
    y2 = jnp.maximum(y2 * s2_ref[...] + b2_ref[...], 0.0)        # [M2, C2]
    y2b = y2.astype(jnp.bfloat16)

    # conv3 (3x3, stride 2, pad 1): per-tap gather-matmul + weight-matmul.
    acc = jnp.zeros((M3, C3), jnp.float32)
    for t in range(9):
        g = jnp.dot(sel_ref[t], y2b,
                    preferred_element_type=jnp.float32)          # [M3, C2]
        acc = acc + jnp.dot(g.astype(jnp.bfloat16),
                            w3_ref[t * C2:(t + 1) * C2, :],
                            preferred_element_type=jnp.float32)  # [M3, C3]

    # bn3 + relu
    y3 = jnp.maximum(acc * s3_ref[...] + b3_ref[...], 0.0)       # [M3, C3]

    # global average pool (per-image static sublane means)
    pooled = jnp.concatenate(
        [jnp.mean(y3[n * rows_per_img:(n + 1) * rows_per_img],
                  axis=0, keepdims=True) for n in range(N)],
        axis=0)                                                  # [N, C3]
    feat_ref[...] = pooled.astype(feat_ref.dtype)

    # fc
    logits = jnp.dot(pooled, fcw_ref[...],
                     preferred_element_type=jnp.float32) + fcb_ref[...]
    logits_ref[...] = logits.astype(logits_ref.dtype)


def conv_tail_pool_fc(y1, conv2_p, conv3_p, fc_w, fc_b):
    """y1: [N,H1,W1,C1] f32 (conv1 output) -> (logits [N,2], feat [N,128])."""
    N, H1, W1, C1 = y1.shape
    H2 = (H1 - 1) // 2 + 1
    W2 = (W1 - 1) // 2 + 1
    H3 = (H2 - 1) // 2 + 1
    W3 = (W2 - 1) // 2 + 1
    (w2, g2, b2, m2, v2) = conv2_p
    (w3, g3, b3, m3, v3) = conv3_p
    C2 = w2.shape[-1]
    C3 = w3.shape[-1]

    patches2 = _im2col_s2(y1.astype(jnp.bfloat16), H2, W2)       # [N*H2*W2, 9*C1]
    w2m = w2.reshape(9 * C1, C2).astype(jnp.bfloat16)
    w3m = w3.reshape(9 * C2, C3).astype(jnp.bfloat16)
    s2, sh2 = _fold_bn(g2, b2, m2, v2)
    s3, sh3 = _fold_bn(g3, b3, m3, v3)
    sel = _conv3_selection_matrices(N, H2, W2, H3, W3)           # [9, M3, M2] bf16

    vmem = lambda: pl.BlockSpec(memory_space=pltpu.MemorySpace.VMEM)
    logits, feat = pl.pallas_call(
        _tail_kernel,
        out_shape=(jax.ShapeDtypeStruct((N, fc_w.shape[1]), jnp.float32),
                   jax.ShapeDtypeStruct((N, C3), jnp.float32)),
        in_specs=[vmem() for _ in range(10)],
        out_specs=(vmem(), vmem()),
    )(patches2, w2m, s2, sh2, sel, w3m, s3, sh3,
      fc_w.astype(jnp.float32), fc_b.reshape(1, -1).astype(jnp.float32))
    return logits, feat


# ----------------------------------------------------------------------------
# netD3 forward (inference)
# ----------------------------------------------------------------------------
def netd3_forward(x_nchw, params, context=False):
    x = jnp.transpose(x_nchw, (0, 2, 3, 1))                      # NCHW -> NHWC
    (w1, g1, b1, m1, v1) = params["convs"][0]
    y1 = conv3x3_s2_bn_relu(x, w1, g1, b1, m1, v1)               # conv1+bn1+relu
    logits, feat = conv_tail_pool_fc(
        y1, params["convs"][1], params["convs"][2],
        params["fc_w"], params["fc_b"])                          # conv2/conv3/pool/fc
    if context:
        return logits, feat
    return logits


# ----------------------------------------------------------------------------
# Pure-JAX reference (for correctness check)
# ----------------------------------------------------------------------------
def netd3_reference(x_nchw, params):
    x = jnp.transpose(x_nchw, (0, 2, 3, 1))
    for (w, g, b, m, v) in params["convs"]:
        x = jax.lax.conv_general_dilated(
            x, w, window_strides=(2, 2), padding=((1, 1), (1, 1)),
            dimension_numbers=("NHWC", "HWIO", "NHWC"))
        x = (x - m) * g * jax.lax.rsqrt(v + BN_EPS) + b
        x = jnp.maximum(x, 0.0)
    x = jnp.mean(x, axis=(1, 2))
    return x @ params["fc_w"] + params["fc_b"]


# ----------------------------------------------------------------------------
# Deterministic parameter construction (shapes from netD3.__init__)
# ----------------------------------------------------------------------------
def make_params(key):
    def conv_block(key, cin, cout):
        kw_, kg, kb, km, kv = jax.random.split(key, 5)
        w = 0.02 * jax.random.normal(kw_, (3, 3, cin, cout), jnp.float32)
        g = 1.0 + 0.1 * jax.random.normal(kg, (cout,), jnp.float32)
        b = 0.1 * jax.random.normal(kb, (cout,), jnp.float32)
        m = 0.1 * jax.random.normal(km, (cout,), jnp.float32)
        v = jax.random.uniform(kv, (cout,), jnp.float32, 0.5, 1.5)
        return (w, g, b, m, v)

    k1, k2, k3, kfw, kfb = jax.random.split(key, 5)
    convs = [conv_block(k1, 512, 512),   # conv1 + bn1
             conv_block(k2, 512, 128),   # conv2 + bn2
             conv_block(k3, 128, 128)]   # conv3 + bn3
    fc_w = 0.05 * jax.random.normal(kfw, (128, 2), jnp.float32)  # Linear(128,2).T
    fc_b = 0.05 * jax.random.normal(kfb, (2,), jnp.float32)
    return {"convs": convs, "fc_w": fc_w, "fc_b": fc_b}


if __name__ == "__main__":
    key = jax.random.PRNGKey(0)
    kx, kp = jax.random.split(key)

    # Input: batch=2, channels fixed at 512 by the module, small spatial 16x16.
    x = jax.random.normal(kx, (2, 512, 16, 16), jnp.float32)
    params = make_params(kp)

    fwd = jax.jit(functools.partial(netd3_forward, context=False))
    out = jax.block_until_ready(fwd(x, params))                  # [2, 2]

    ref = jax.block_until_ready(jax.jit(netd3_reference)(x, params))
    max_err = float(jnp.max(jnp.abs(out - ref)))
    assert out.shape == (2, 2), out.shape
    # bf16 MXU inputs (f32 accumulation) over K up to 4608 -> a few 1e-3 abs err.
    assert max_err < 2e-2, f"mismatch vs reference: {max_err}"

    print("KERNEL_OK")
</pallas_src>

<mosaic_0001>
module attributes {stable_mosaic.version = 11 : i64} {
  func.func @_conv_bn_relu_kernel(%arg0: i32, %arg1: i32, %arg2: memref<128x1536xbf16, #tpu.memory_space<vmem>>, %arg3: memref<1536x256xbf16, #tpu.memory_space<vmem>>, %arg4: memref<1x256xf32, #tpu.memory_space<vmem>>, %arg5: memref<1x256xf32, #tpu.memory_space<vmem>>, %arg6: memref<128x256xf32, #tpu.memory_space<vmem>>) attributes {dimension_semantics = [#tpu.dimension_semantics<parallel>, #tpu.dimension_semantics<arbitrary>], iteration_bounds = array<i64: 2, 3>, scalar_prefetch = 0 : i64, scratch_operands = 0 : i64, tpu.core_type = #tpu.core_type<tc>, window_params = [{transform_indices = @transform_0, window_bounds = array<i64: 128, 1536>}, {transform_indices = @transform_1, window_bounds = array<i64: 1536, 256>}, {transform_indices = @transform_2, window_bounds = array<i64: 1, 256>}, {transform_indices = @transform_3, window_bounds = array<i64: 1, 256>}, {transform_indices = @transform_4, window_bounds = array<i64: 128, 256>}]} {
    %c0_i32 = arith.constant 0 : i32
    %0 = arith.cmpi eq, %arg1, %c0_i32 : i32
    %1 = arith.extui %0 : i1 to i32
    %c0_i32_0 = arith.constant 0 : i32
    %2 = arith.cmpi ne, %1, %c0_i32_0 : i32
    scf.if %2 {
      %cst_9 = arith.constant 0.000000e+00 : f32
      %12 = vector.broadcast %cst_9 : f32 to vector<128x256xf32>
      %c0_10 = arith.constant 0 : index
      %c0_11 = arith.constant 0 : index
      %13 = vector.load %arg6[%c0_10, %c0_11] : memref<128x256xf32, #tpu.memory_space<vmem>>, vector<128x256xf32>
      tpu.vector_store %arg6[%c0_10, %c0_11], %12 {strides = array<i32>} : memref<128x256xf32, #tpu.memory_space<vmem>>, vector<128x256xf32>,
    } else {
    }
    %c0 = arith.constant 0 : index
    %c0_1 = arith.constant 0 : index
    %3 = vector.load %arg6[%c0, %c0_1] : memref<128x256xf32, #tpu.memory_space<vmem>>, vector<128x256xf32>
    %c0_2 = arith.constant 0 : index
    %c0_3 = arith.constant 0 : index
    %4 = vector.load %arg2[%c0_2, %c0_3] : memref<128x1536xbf16, #tpu.memory_space<vmem>>, vector<128x1536xbf16>
    %c0_4 = arith.constant 0 : index
    %c0_5 = arith.constant 0 : index
    %5 = vector.load %arg3[%c0_4, %c0_5] : memref<1536x256xbf16, #tpu.memory_space<vmem>>, vector<1536x256xbf16>
    %cst = arith.constant dense<0.000000e+00> : vector<128x256xf32>
    %6 = tpu.matmul %4, %5, %cst {dimension_numbers = #tpu.dot_dimension_numbers<[1], [0], [0], [1], [0, 0, 1, 1], [], []>} : vector<128x1536xbf16>, vector<1536x256xbf16>, vector<128x256xf32> -> vector<128x256xf32>
    %7 = arith.addf %3, %6 : vector<128x256xf32>
    %c0_6 = arith.constant 0 : index
    %c0_7 = arith.constant 0 : index
    %8 = vector.load %arg6[%c0_6, %c0_7] : memref<128x256xf32, #tpu.memory_space<vmem>>, vector<128x256xf32>
    tpu.vector_store %arg6[%c0_6, %c0_7], %7 {strides = array<i32>} : memref<128x256xf32, #tpu.memory_space<vmem>>, vector<128x256xf32>,
    %c2_i32 = arith.constant 2 : i32
    %9 = arith.cmpi eq, %arg1, %c2_i32 : i32
    %10 = arith.extui %9 : i1 to i32
    %c0_i32_8 = arith.constant 0 : i32
    %11 = arith.cmpi ne, %10, %c0_i32_8 : i32
    scf.if %11 {
      %c0_9 = arith.constant 0 : index
      %c0_10 = arith.constant 0 : index
      %12 = vector.load %arg6[%c0_9, %c0_10] : memref<128x256xf32, #tpu.memory_space<vmem>>, vector<128x256xf32>
      %c0_11 = arith.constant 0 : index
      %c0_12 = arith.constant 0 : index
      %13 = vector.load %arg4[%c0_11, %c0_12] : memref<1x256xf32, #tpu.memory_space<vmem>>, vector<1x256xf32>
      %14 = vector.broadcast %13 : vector<1x256xf32> to vector<128x256xf32>
      %15 = arith.mulf %12, %14 : vector<128x256xf32>
      %c0_13 = arith.constant 0 : index
      %c0_14 = arith.constant 0 : index
      %16 = vector.load %arg5[%c0_13, %c0_14] : memref<1x256xf32, #tpu.memory_space<vmem>>, vector<1x256xf32>
      %17 = vector.broadcast %16 : vector<1x256xf32> to vector<128x256xf32>
      %18 = arith.addf %15, %17 : vector<128x256xf32>
      %cst_15 = arith.constant 0.000000e+00 : f32
      %19 = vector.broadcast %cst_15 : f32 to vector<128x256xf32>
      %20 = arith.maximumf %18, %19 : vector<128x256xf32>
      %c0_16 = arith.constant 0 : index
      %c0_17 = arith.constant 0 : index
      %21 = vector.load %arg6[%c0_16, %c0_17] : memref<128x256xf32, #tpu.memory_space<vmem>>, vector<128x256xf32>
      tpu.vector_store %arg6[%c0_16, %c0_17], %20 {strides = array<i32>} : memref<128x256xf32, #tpu.memory_space<vmem>>, vector<128x256xf32>,
    } else {
    }
    return
  }
  func.func @transform_0(%arg0: i32, %arg1: i32) -> (i32, i32) {
    %c0_i32 = arith.constant 0 : i32
    %c0_i32_0 = arith.constant 0 : i32
    return %c0_i32, %arg1 : i32, i32
  }
  func.func @transform_1(%arg0: i32, %arg1: i32) -> (i32, i32) {
    %c0_i32 = arith.constant 0 : i32
    return %arg1, %arg0 : i32, i32
  }
  func.func @transform_2(%arg0: i32, %arg1: i32) -> (i32, i32) {
    %c0_i32 = arith.constant 0 : i32
    %c0_i32_0 = arith.constant 0 : i32
    return %c0_i32, %arg0 : i32, i32
  }
  func.func @transform_3(%arg0: i32, %arg1: i32) -> (i32, i32) {
    %c0_i32 = arith.constant 0 : i32
    %c0_i32_0 = arith.constant 0 : i32
    return %c0_i32, %arg0 : i32, i32
  }
  func.func @transform_4(%arg0: i32, %arg1: i32) -> (i32, i32) {
    %c0_i32 = arith.constant 0 : i32
    %c0_i32_0 = arith.constant 0 : i32
    return %c0_i32, %arg0 : i32, i32
  }
}

module attributes {stable_mosaic.version = 11 : i64} {
  func.func @_tail_kernel(%arg0: memref<32x4608xbf16, #tpu.memory_space<vmem>>, %arg1: memref<4608x128xbf16, #tpu.memory_space<vmem>>, %arg2: memref<1x128xf32, #tpu.memory_space<vmem>>, %arg3: memref<1x128xf32, #tpu.memory_space<vmem>>, %arg4: memref<9x8x32xbf16, #tpu.memory_space<vmem>>, %arg5: memref<1152x128xbf16, #tpu.memory_space<vmem>>, %arg6: memref<1x128xf32, #tpu.memory_space<vmem>>, %arg7: memref<1x128xf32, #tpu.memory_space<vmem>>, %arg8: memref<128x2xf32, #tpu.memory_space<vmem>>, %arg9: memref<1x2xf32, #tpu.memory_space<vmem>>, %arg10: memref<2x2xf32, #tpu.memory_space<vmem>>, %arg11: memref<2x128xf32, #tpu.memory_space<vmem>>) attributes {dimension_semantics = [], scalar_prefetch = 0 : i64, scratch_operands = 0 : i64, tpu.core_type = #tpu.core_type<tc>} {
    %c0 = arith.constant 0 : index
    %c0_0 = arith.constant 0 : index
    %0 = vector.load %arg0[%c0, %c0_0] : memref<32x4608xbf16, #tpu.memory_space<vmem>>, vector<32x4608xbf16>
    %c0_1 = arith.constant 0 : index
    %c0_2 = arith.constant 0 : index
    %1 = vector.load %arg1[%c0_1, %c0_2] : memref<4608x128xbf16, #tpu.memory_space<vmem>>, vector<4608x128xbf16>
    %cst = arith.constant dense<0.000000e+00> : vector<32x128xf32>
    %2 = tpu.matmul %0, %1, %cst {dimension_numbers = #tpu.dot_dimension_numbers<[1], [0], [0], [1], [0, 0, 1, 1], [], []>} : vector<32x4608xbf16>, vector<4608x128xbf16>, vector<32x128xf32> -> vector<32x128xf32>
    %c0_3 = arith.constant 0 : index
    %c0_4 = arith.constant 0 : index
    %3 = vector.load %arg2[%c0_3, %c0_4] : memref<1x128xf32, #tpu.memory_space<vmem>>, vector<1x128xf32>
    %4 = vector.broadcast %3 : vector<1x128xf32> to vector<32x128xf32>
    %5 = arith.mulf %2, %4 : vector<32x128xf32>
    %c0_5 = arith.constant 0 : index
    %c0_6 = arith.constant 0 : index
    %6 = vector.load %arg3[%c0_5, %c0_6] : memref<1x128xf32, #tpu.memory_space<vmem>>, vector<1x128xf32>
    %7 = vector.broadcast %6 : vector<1x128xf32> to vector<32x128xf32>
    %8 = arith.addf %5, %7 : vector<32x128xf32>
    %cst_7 = arith.constant 0.000000e+00 : f32
    %9 = vector.broadcast %cst_7 : f32 to vector<32x128xf32>
    %10 = arith.maximumf %8, %9 : vector<32x128xf32>
    %11 = arith.truncf %10 : vector<32x128xf32> to vector<32x128xbf16>
    %cst_8 = arith.constant 0.000000e+00 : f32
    %12 = vector.broadcast %cst_8 : f32 to vector<8x128xf32>
    %c0_9 = arith.constant 0 : index
    %c0_10 = arith.constant 0 : index
    %c0_11 = arith.constant 0 : index
    %13 = vector.load %arg4[%c0_9, %c0_10, %c0_11] : memref<9x8x32xbf16, #tpu.memory_space<vmem>>, vector<1x8x32xbf16>
    %14 = vector.shape_cast %13 : vector<1x8x32xbf16> to vector<8x32xbf16>
    %cst_12 = arith.constant dense<0.000000e+00> : vector<8x128xf32>
    %15 = tpu.matmul %14, %11, %cst_12 {dimension_numbers = #tpu.dot_dimension_numbers<[1], [0], [0], [1], [0, 0, 1, 1], [], []>} : vector<8x32xbf16>, vector<32x128xbf16>, vector<8x128xf32> -> vector<8x128xf32>
    %16 = arith.truncf %15 : vector<8x128xf32> to vector<8x128xbf16>
    %c0_13 = arith.constant 0 : index
    %c0_14 = arith.constant 0 : index
    %17 = vector.load %arg5[%c0_13, %c0_14] : memref<1152x128xbf16, #tpu.memory_space<vmem>>, vector<128x128xbf16>
    %cst_15 = arith.constant dense<0.000000e+00> : vector<8x128xf32>
    %18 = tpu.matmul %16, %17, %cst_15 {dimension_numbers = #tpu.dot_dimension_numbers<[1], [0], [0], [1], [0, 0, 1, 1], [], []>} : vector<8x128xbf16>, vector<128x128xbf16>, vector<8x128xf32> -> vector<8x128xf32>
    %19 = arith.addf %12, %18 : vector<8x128xf32>
    %c1 = arith.constant 1 : index
    %c0_16 = arith.constant 0 : index
    %c0_17 = arith.constant 0 : index
    %20 = vector.load %arg4[%c1, %c0_16, %c0_17] : memref<9x8x32xbf16, #tpu.memory_space<vmem>>, vector<1x8x32xbf16>
    %21 = vector.shape_cast %20 : vector<1x8x32xbf16> to vector<8x32xbf16>
    %cst_18 = arith.constant dense<0.000000e+00> : vector<8x128xf32>
    %22 = tpu.matmul %21, %11, %cst_18 {dimension_numbers = #tpu.dot_dimension_numbers<[1], [0], [0], [1], [0, 0, 1, 1], [], []>} : vector<8x32xbf16>, vector<32x128xbf16>, vector<8x128xf32> -> vector<8x128xf32>
    %23 = arith.truncf %22 : vector<8x128xf32> to vector<8x128xbf16>
    %c128 = arith.constant 128 : index
    %c0_19 = arith.constant 0 : index
    %24 = vector.load %arg5[%c128, %c0_19] : memref<1152x128xbf16, #tpu.memory_space<vmem>>, vector<128x128xbf16>
    %cst_20 = arith.constant dense<0.000000e+00> : vector<8x128xf32>
    %25 = tpu.matmul %23, %24, %cst_20 {dimension_numbers = #tpu.dot_dimension_numbers<[1], [0], [0], [1], [0, 0, 1, 1], [], []>} : vector<8x128xbf16>, vector<128x128xbf16>, vector<8x128xf32> -> vector<8x128xf32>
    %26 = arith.addf %19, %25 : vector<8x128xf32>
    %c2 = arith.constant 2 : index
    %c0_21 = arith.constant 0 : index
    %c0_22 = arith.constant 0 : index
    %27 = vector.load %arg4[%c2, %c0_21, %c0_22] : memref<9x8x32xbf16, #tpu.memory_space<vmem>>, vector<1x8x32xbf16>
    %28 = vector.shape_cast %27 : vector<1x8x32xbf16> to vector<8x32xbf16>
    %cst_23 = arith.constant dense<0.000000e+00> : vector<8x128xf32>
    %29 = tpu.matmul %28, %11, %cst_23 {dimension_numbers = #tpu.dot_dimension_numbers<[1], [0], [0], [1], [0, 0, 1, 1], [], []>} : vector<8x32xbf16>, vector<32x128xbf16>, vector<8x128xf32> -> vector<8x128xf32>
    %30 = arith.truncf %29 : vector<8x128xf32> to vector<8x128xbf16>
    %c256 = arith.constant 256 : index
    %c0_24 = arith.constant 0 : index
    %31 = vector.load %arg5[%c256, %c0_24] : memref<1152x128xbf16, #tpu.memory_space<vmem>>, vector<128x128xbf16>
    %cst_25 = arith.constant dense<0.000000e+00> : vector<8x128xf32>
    %32 = tpu.matmul %30, %31, %cst_25 {dimension_numbers = #tpu.dot_dimension_numbers<[1], [0], [0], [1], [0, 0, 1, 1], [], []>} : vector<8x128xbf16>, vector<128x128xbf16>, vector<8x128xf32> -> vector<8x128xf32>
    %33 = arith.addf %26, %32 : vector<8x128xf32>
    %c3 = arith.constant 3 : index
    %c0_26 = arith.constant 0 : index
    %c0_27 = arith.constant 0 : index
    %34 = vector.load %arg4[%c3, %c0_26, %c0_27] : memref<9x8x32xbf16, #tpu.memory_space<vmem>>, vector<1x8x32xbf16>
    %35 = vector.shape_cast %34 : vector<1x8x32xbf16> to vector<8x32xbf16>
    %cst_28 = arith.constant dense<0.000000e+00> : vector<8x128xf32>
    %36 = tpu.matmul %35, %11, %cst_28 {dimension_numbers = #tpu.dot_dimension_numbers<[1], [0], [0], [1], [0, 0, 1, 1], [], []>} : vector<8x32xbf16>, vector<32x128xbf16>, vector<8x128xf32> -> vector<8x128xf32>
    %37 = arith.truncf %36 : vector<8x128xf32> to vector<8x128xbf16>
    %c384 = arith.constant 384 : index
    %c0_29 = arith.constant 0 : index
    %38 = vector.load %arg5[%c384, %c0_29] : memref<1152x128xbf16, #tpu.memory_space<vmem>>, vector<128x128xbf16>
    %cst_30 = arith.constant dense<0.000000e+00> : vector<8x128xf32>
    %39 = tpu.matmul %37, %38, %cst_30 {dimension_numbers = #tpu.dot_dimension_numbers<[1], [0], [0], [1], [0, 0, 1, 1], [], []>} : vector<8x128xbf16>, vector<128x128xbf16>, vector<8x128xf32> -> vector<8x128xf32>
    %40 = arith.addf %33, %39 : vector<8x128xf32>
    %c4 = arith.constant 4 : index
    %c0_31 = arith.constant 0 : index
    %c0_32 = arith.constant 0 : index
    %41 = vector.load %arg4[%c4, %c0_31, %c0_32] : memref<9x8x32xbf16, #tpu.memory_space<vmem>>, vector<1x8x32xbf16>
    %42 = vector.shape_cast %41 : vector<1x8x32xbf16> to vector<8x32xbf16>
    %cst_33 = arith.constant dense<0.000000e+00> : vector<8x128xf32>
    %43 = tpu.matmul %42, %11, %cst_33 {dimension_numbers = #tpu.dot_dimension_numbers<[1], [0], [0], [1], [0, 0, 1, 1], [], []>} : vector<8x32xbf16>, vector<32x128xbf16>, vector<8x128xf32> -> vector<8x128xf32>
    %44 = arith.truncf %43 : vector<8x128xf32> to vector<8x128xbf16>
    %c512 = arith.constant 512 : index
    %c0_34 = arith.constant 0 : index
    %45 = vector.load %arg5[%c512, %c0_34] : memref<1152x128xbf16, #tpu.memory_space<vmem>>, vector<128x128xbf16>
    %cst_35 = arith.constant dense<0.000000e+00> : vector<8x128xf32>
    %46 = tpu.matmul %44, %45, %cst_35 {dimension_numbers = #tpu.dot_dimension_numbers<[1], [0], [0], [1], [0, 0, 1, 1], [], []>} : vector<8x128xbf16>, vector<128x128xbf16>, vector<8x128xf32> -> vector<8x128xf32>
    %47 = arith.addf %40, %46 : vector<8x128xf32>
    %c5 = arith.constant 5 : index
    %c0_36 = arith.constant 0 : index
    %c0_37 = arith.constant 0 : index
    %48 = vector.load %arg4[%c5, %c0_36, %c0_37] : memref<9x8x32xbf16, #tpu.memory_space<vmem>>, vector<1x8x32xbf16>
    %49 = vector.shape_cast %48 : vector<1x8x32xbf16> to vector<8x32xbf16>
    %cst_38 = arith.constant dense<0.000000e+00> : vector<8x128xf32>
    %50 = tpu.matmul %49, %11, %cst_38 {dimension_numbers = #tpu.dot_dimension_numbers<[1], [0], [0], [1], [0, 0, 1, 1], [], []>} : vector<8x32xbf16>, vector<32x128xbf16>, vector<8x128xf32> -> vector<8x128xf32>
    %51 = arith.truncf %50 : vector<8x128xf32> to vector<8x128xbf16>
    %c640 = arith.constant 640 : index
    %c0_39 = arith.constant 0 : index
    %52 = vector.load %arg5[%c640, %c0_39] : memref<1152x128xbf16, #tpu.memory_space<vmem>>, vector<128x128xbf16>
    %cst_40 = arith.constant dense<0.000000e+00> : vector<8x128xf32>
    %53 = tpu.matmul %51, %52, %cst_40 {dimension_numbers = #tpu.dot_dimension_numbers<[1], [0], [0], [1], [0, 0, 1, 1], [], []>} : vector<8x128xbf16>, vector<128x128xbf16>, vector<8x128xf32> -> vector<8x128xf32>
    %54 = arith.addf %47, %53 : vector<8x128xf32>
    %c6 = arith.constant 6 : index
    %c0_41 = arith.constant 0 : index
    %c0_42 = arith.constant 0 : index
    %55 = vector.load %arg4[%c6, %c0_41, %c0_42] : memref<9x8x32xbf16, #tpu.memory_space<vmem>>, vector<1x8x32xbf16>
    %56 = vector.shape_cast %55 : vector<1x8x32xbf16> to vector<8x32xbf16>
    %cst_43 = arith.constant dense<0.000000e+00> : vector<8x128xf32>
    %57 = tpu.matmul %56, %11, %cst_43 {dimension_numbers = #tpu.dot_dimension_numbers<[1], [0], [0], [1], [0, 0, 1, 1], [], []>} : vector<8x32xbf16>, vector<32x128xbf16>, vector<8x128xf32> -> vector<8x128xf32>
    %58 = arith.truncf %57 : vector<8x128xf32> to vector<8x128xbf16>
    %c768 = arith.constant 768 : index
    %c0_44 = arith.constant 0 : index
    %59 = vector.load %arg5[%c768, %c0_44] : memref<1152x128xbf16, #tpu.memory_space<vmem>>, vector<128x128xbf16>
    %cst_45 = arith.constant dense<0.000000e+00> : vector<8x128xf32>
    %60 = tpu.matmul %58, %59, %cst_45 {dimension_numbers = #tpu.dot_dimension_numbers<[1], [0], [0], [1], [0, 0, 1, 1], [], []>} : vector<8x128xbf16>, vector<128x128xbf16>, vector<8x128xf32> -> vector<8x128xf32>
    %61 = arith.addf %54, %60 : vector<8x128xf32>
    %c7 = arith.constant 7 : index
    %c0_46 = arith.constant 0 : index
    %c0_47 = arith.constant 0 : index
    %62 = vector.load %arg4[%c7, %c0_46, %c0_47] : memref<9x8x32xbf16, #tpu.memory_space<vmem>>, vector<1x8x32xbf16>
    %63 = vector.shape_cast %62 : vector<1x8x32xbf16> to vector<8x32xbf16>
    %cst_48 = arith.constant dense<0.000000e+00> : vector<8x128xf32>
    %64 = tpu.matmul %63, %11, %cst_48 {dimension_numbers = #tpu.dot_dimension_numbers<[1], [0], [0], [1], [0, 0, 1, 1], [], []>} : vector<8x32xbf16>, vector<32x128xbf16>, vector<8x128xf32> -> vector<8x128xf32>
    %65 = arith.truncf %64 : vector<8x128xf32> to vector<8x128xbf16>
    %c896 = arith.constant 896 : index
    %c0_49 = arith.constant 0 : index
    %66 = vector.load %arg5[%c896, %c0_49] : memref<1152x128xbf16, #tpu.memory_space<vmem>>, vector<128x128xbf16>
    %cst_50 = arith.constant dense<0.000000e+00> : vector<8x128xf32>
    %67 = tpu.matmul %65, %66, %cst_50 {dimension_numbers = #tpu.dot_dimension_numbers<[1], [0], [0], [1], [0, 0, 1, 1], [], []>} : vector<8x128xbf16>, vector<128x128xbf16>, vector<8x128xf32> -> vector<8x128xf32>
    %68 = arith.addf %61, %67 : vector<8x128xf32>
    %c8 = arith.constant 8 : index
    %c0_51 = arith.constant 0 : index
    %c0_52 = arith.constant 0 : index
    %69 = vector.load %arg4[%c8, %c0_51, %c0_52] : memref<9x8x32xbf16, #tpu.memory_space<vmem>>, vector<1x8x32xbf16>
    %70 = vector.shape_cast %69 : vector<1x8x32xbf16> to vector<8x32xbf16>
    %cst_53 = arith.constant dense<0.000000e+00> : vector<8x128xf32>
    %71 = tpu.matmul %70, %11, %cst_53 {dimension_numbers = #tpu.dot_dimension_numbers<[1], [0], [0], [1], [0, 0, 1, 1], [], []>} : vector<8x32xbf16>, vector<32x128xbf16>, vector<8x128xf32> -> vector<8x128xf32>
    %72 = arith.truncf %71 : vector<8x128xf32> to vector<8x128xbf16>
    %c1024 = arith.constant 1024 : index
    %c0_54 = arith.constant 0 : index
    %73 = vector.load %arg5[%c1024, %c0_54] : memref<1152x128xbf16, #tpu.memory_space<vmem>>, vector<128x128xbf16>
    %cst_55 = arith.constant dense<0.000000e+00> : vector<8x128xf32>
    %74 = tpu.matmul %72, %73, %cst_55 {dimension_numbers = #tpu.dot_dimension_numbers<[1], [0], [0], [1], [0, 0, 1, 1], [], []>} : vector<8x128xbf16>, vector<128x128xbf16>, vector<8x128xf32> -> vector<8x128xf32>
    %75 = arith.addf %68, %74 : vector<8x128xf32>
    %c0_56 = arith.constant 0 : index
    %c0_57 = arith.constant 0 : index
    %76 = vector.load %arg6[%c0_56, %c0_57] : memref<1x128xf32, #tpu.memory_space<vmem>>, vector<1x128xf32>
    %77 = vector.broadcast %76 : vector<1x128xf32> to vector<8x128xf32>
    %78 = arith.mulf %75, %77 : vector<8x128xf32>
    %c0_58 = arith.constant 0 : index
    %c0_59 = arith.constant 0 : index
    %79 = vector.load %arg7[%c0_58, %c0_59] : memref<1x128xf32, #tpu.memory_space<vmem>>, vector<1x128xf32>
    %80 = vector.broadcast %79 : vector<1x128xf32> to vector<8x128xf32>
    %81 = arith.addf %78, %80 : vector<8x128xf32>
    %cst_60 = arith.constant 0.000000e+00 : f32
    %82 = vector.broadcast %cst_60 : f32 to vector<8x128xf32>
    %83 = arith.maximumf %81, %82 : vector<8x128xf32>
    %84 = vector.extract_strided_slice %83 {offsets = [0, 0], sizes = [4, 128], strides = [1, 1]} : vector<8x128xf32> to vector<4x128xf32>
    %cst_61 = arith.constant dense<0.000000e+00> : vector<128xf32>
    %85 = vector.multi_reduction <add>, %84, %cst_61 [0] : vector<4x128xf32> to vector<128xf32>
    %86 = vector.shape_cast %85 : vector<128xf32> to vector<1x128xf32>
    %cst_62 = arith.constant 4.000000e+00 : f32
    %87 = vector.broadcast %cst_62 : f32 to vector<1x128xf32>
    %88 = arith.divf %86, %87 : vector<1x128xf32>
    %89 = vector.extract_strided_slice %83 {offsets = [4, 0], sizes = [4, 128], strides = [1, 1]} : vector<8x128xf32> to vector<4x128xf32>
    %cst_63 = arith.constant dense<0.000000e+00> : vector<128xf32>
    %90 = vector.multi_reduction <add>, %89, %cst_63 [0] : vector<4x128xf32> to vector<128xf32>
    %91 = vector.shape_cast %90 : vector<128xf32> to vector<1x128xf32>
    %cst_64 = arith.constant 4.000000e+00 : f32
    %92 = vector.broadcast %cst_64 : f32 to vector<1x128xf32>
    %93 = arith.divf %91, %92 : vector<1x128xf32>
    %94 = tpu.concatenate %88, %93 in 0 : vector<1x128xf32>, vector<1x128xf32> -> vector<2x128xf32>
    %c0_65 = arith.constant 0 : index
    %c0_66 = arith.constant 0 : index
    %95 = vector.load %arg11[%c0_65, %c0_66] : memref<2x128xf32, #tpu.memory_space<vmem>>, vector<2x128xf32>
    tpu.vector_store %arg11[%c0_65, %c0_66], %94 {strides = array<i32>} : memref<2x128xf32, #tpu.memory_space<vmem>>, vector<2x128xf32>,
    %c0_67 = arith.constant 0 : index
    %c0_68 = arith.constant 0 : index
    %96 = vector.load %arg8[%c0_67, %c0_68] : memref<128x2xf32, #tpu.memory_space<vmem>>, vector<128x2xf32>
    %cst_69 = arith.constant dense<0.000000e+00> : vector<2x2xf32>
    %97 = tpu.matmul %94, %96, %cst_69 {dimension_numbers = #tpu.dot_dimension_numbers<[1], [0], [0], [1], [0, 0, 1, 1], [], []>} : vector<2x128xf32>, vector<128x2xf32>, vector<2x2xf32> -> vector<2x2xf32>
    %c0_70 = arith.constant 0 : index
    %c0_71 = arith.constant 0 : index
    %98 = vector.load %arg9[%c0_70, %c0_71] : memref<1x2xf32, #tpu.memory_space<vmem>>, vector<1x2xf32>
    %99 = vector.broadcast %98 : vector<1x2xf32> to vector<2x2xf32>
    %100 = arith.addf %97, %99 : vector<2x2xf32>
    %c0_72 = arith.constant 0 : index
    %c0_73 = arith.constant 0 : index
    %101 = vector.load %arg10[%c0_72, %c0_73] : memref<2x2xf32, #tpu.memory_space<vmem>>, vector<2x2xf32>
    tpu.vector_store %arg10[%c0_72, %c0_73], %100 {strides = array<i32>} : memref<2x2xf32, #tpu.memory_space<vmem>>, vector<2x2xf32>,
    return
  }
}

</mosaic_0001>

<bundles_post_ra>
// kernel: netd3_forward.2
= control target key start
LH: loop header
LB: loop body
LE: loop exit
PB: predicated region body
PF: predicated region fallthrough
CT: control target
= control target key end

     0   :  { %s6668_s0 = inlined_call_operand.vmem [shape: bf16[128,4608], index: 0, kind: input, shape index: {}]   ;;  %s6669_s1 = inlined_call_operand.vmem [shape: bf16[4608,512], index: 1, kind: input, shape index: {}]   ;;  %s6670_s2 = inlined_call_operand.vmem [shape: f32[1,512], index: 2, kind: input, shape index: {}]   ;;  %s6671_s3 = inlined_call_operand.vmem [shape: f32[1,512], index: 3, kind: input, shape index: {}]   ;;  %s6672_s4 = inlined_call_operand.vmem [shape: f32[128,512], index: 4, kind: output, shape index: {}]  }
   0x1   :  { %6675 = sst [smem:[#allocation7_spill]] %s6668_s0 }
   0x2   :  { %6676 = sst [smem:[#allocation8_spill]] %s6669_s1 }
   0x3   :  { %s5311_s15 = smov 0   ;;  %s5313_s16 = smov 0  }
   0x4   :  { %s5315_s17 = smov 0   ;;  %s5317_s18 = smov 0  }
   0x5   :  { %s5319_s19 = smov 0   ;;  %s5321_s20 = smov 0  }
   0x6   :  { %s5323_s21 = smov 0   ;;  %s5325_s22 = smov 0  }
   0x7   :  { %s5327_s23 = smov 0   ;;  %s5329_s24 = smov 0  }
   0x8   :  { %s5331_s25 = smov 0  }
   0x9 LB: > { %s4202_s26 = sadd.s32 4294967295, %s5283_s25   ;;  %s23_s27 = sadd.s32 1, %s5275_s23  ;;  %s5283_s25 = sphi %s5331_s25, %s14_s25   ;;  %s5279_s24 = sphi %s5329_s24, %s6695_s24   ;;  %s5275_s23 = sphi %s5327_s23, %s6694_s23   ;;  %s5271_s22 = sphi %s5325_s22, %s6693_s22   ;;  %s5267_s21 = sphi %s5323_s21, %s6692_s21   ;;  %s5263_s20 = sphi %s5321_s20, %s6691_s20   ;;  %s5259_s19 = sphi %s5319_s19, %s6690_s19   ;;  %s5255_s18 = sphi %s5317_s18, %s6689_s18   ;;  %s5251_s17 = sphi %s5315_s17, %s6688_s17   ;;  %s5247_s16 = sphi %s5313_s16, %s6687_s16   ;;  %s5243_s15 = sphi %s5311_s15, %s6686_s15  }
   0xa   : > { %p24_p0 = scmp.ge.s32.totalorder %s23_s27, 3  ;;  %s26_s28 = sadd.s32 1, %s5279_s24 }
   0xb   : > { %s33_s29 = sadd.s32 1, %s5263_s20  ;;  %p40_p1 = scmp.ne.s32.totalorder %s5263_s20, %s5259_s19 }
   0xc   : > { %s6697_s27 = smov (%p24_p0, %s23_s27), 0  ;;  %s6699_s28 = smov (!%p24_p0, %s26_s28), %s5279_s24 }
   0xd   : > { %6677 = sst [smem:[#allocation5_spill]] %s6697_s27  ;;  %s30_s30 = ssub.s32 %s5275_s23, %s6697_s27 }
   0xe   : > { %p41_p2 = scmp.eq.s32.totalorder %s5283_s25, 0  ;;  %p28_p3 = scmp.ge.s32.totalorder %s6699_s28, 2 }
   0xf   : > { %p31_p4 = scmp.eq.s32.totalorder %s30_s30, 0  ;;  %s61_s6 = sadd.s32 1, %s5255_s18 }
  0x10   : > { %p5378_p5 = por %p41_p2, %p40_p1  ;;  %s6701_s28 = smov (%p28_p3, %s6699_s28), 0 }
  0x11   : > { %6679 = sst [smem:[#allocation6_spill]] %s6701_s28  ;;  %s57_s8 = ssub.s32 %s5279_s24, %s6701_s28 }
  0x12   : > { %s5386_s7 = scalar_select %p31_p4, %s5263_s20, %s33_s29  }
  0x13   : > { %p68_p6 = scmp.ne.s32.totalorder %s5255_s18, %s5251_s17  ;;  %s58_s9 = sor.u32 %s57_s8, %s30_s30 }
  0x14   : > { %p137_p7 = scmp.eq.s32.totalorder %s57_s8, 0  ;;  %p59_p8 = scmp.eq.s32.totalorder %s58_s9, 0 }
  0x15   : > { %p5392_p9 = por %p68_p6, %p41_p2  ;;  %s139_s11 = sadd.s32 1, %s5247_s16 }
  0x16   : > { %p149_p10 = scmp.ne.s32.totalorder %s5247_s16, %s5243_s15  ;;  %p150_p11 = scmp.eq.s32.totalorder %s4202_s26, 5 }
  0x17   : > { %s5400_s12 = scalar_select %p59_p8, %s5255_s18, %s61_s6  }
  0x18   : > { %s5403_s13 = scalar_select %p137_p7, %s5247_s16, %s139_s11  }
  0x19   : > { %p5405_p12 = por %p150_p11, %p149_p10  ;;  %p4205_p13 = scmp.ge.s32.totalorder %s5283_s25, 6 }
  0x1b   : > { %172 = sbr.rel (%p4205_p13) target bundleno = 197 (0xc5), region = 16 }
  0x22   : > { %175 = sbr.rel (!%p5378_p5) target bundleno = 91 (0x5b), region = 20  ;;  %s177_s29 = sand.u32 (%p5378_p5), 1, %s5263_s20  }
  0x23   : > { %s4509_s30 = smul.u32 (%p5378_p5), 48, %s5275_s23  ;;  %s6682_s0 = sld [smem:[#allocation7_spill]] (%p5378_p5) }
  0x24   : > { %s4672_s8 = smul.u32 (%p5378_p5), 768, %s177_s29 }
  0x26   : > { %s5422_s26 = scalar_lea.vmem (%p5378_p5), [#allocation2], %s4672_s8 }
  0x29   : > { %s5417_s11 = scalar_lea.vmem %s6682_s0, %s4509_s30 }
  0x2a   : > { %v195_v0 = vld [vmem:[%s5417_s11] sm:$0xff]  ;;  %v197_v1 = vld [vmem:[%s5417_s11 + $0x8] sm:$0xff]  ;;  %v199_v2 = vld [vmem:[%s5417_s11 + $0x10] sm:$0xff] }
  0x2b   : > { %196 = vst [vmem:[%s5422_s26] sm:$0xff] %v195_v0  ;;  %198 = vst [vmem:[%s5422_s26 + $0x8] sm:$0xff] %v197_v1  ;;  %v201_v3 = vld [vmem:[%s5417_s11 + $0x18] sm:$0xff]  ;;  %v203_v4 = vld [vmem:[%s5417_s11 + $0x20] sm:$0xff] }
  0x2c   : > { %200 = vst [vmem:[%s5422_s26 + $0x10] sm:$0xff] %v199_v2  ;;  %v205_v5 = vld [vmem:[%s5417_s11 + $0x28] sm:$0xff]  ;;  %202 = vst [vmem:[%s5422_s26 + $0x18] sm:$0xff] %v201_v3  ;;  %v207_v6 = vld [vmem:[%s5417_s11 + $0x90] sm:$0xff] }
  0x2d   : > { %204 = vst [vmem:[%s5422_s26 + $0x20] sm:$0xff] %v203_v4  ;;  %206 = vst [vmem:[%s5422_s26 + $0x28] sm:$0xff] %v205_v5  ;;  %v209_v7 = vld [vmem:[%s5417_s11 + $0x98] sm:$0xff]  ;;  %v211_v8 = vld [vmem:[%s5417_s11 + $0xa0] sm:$0xff] }
  0x2e   : > { %208 = vst [vmem:[%s5422_s26 + $0x30] sm:$0xff] %v207_v6  ;;  %210 = vst [vmem:[%s5422_s26 + $0x38] sm:$0xff] %v209_v7  ;;  %v213_v9 = vld [vmem:[%s5417_s11 + $0xa8] sm:$0xff]  ;;  %v215_v10 = vld [vmem:[%s5417_s11 + $0xb0] sm:$0xff] }
  0x2f   : > { %212 = vst [vmem:[%s5422_s26 + $0x40] sm:$0xff] %v211_v8  ;;  %v217_v11 = vld [vmem:[%s5417_s11 + $0xb8] sm:$0xff]  ;;  %214 = vst [vmem:[%s5422_s26 + $0x48] sm:$0xff] %v213_v9  ;;  %v219_v12 = vld [vmem:[%s5417_s11 + $0x120] sm:$0xff] }
  0x30   : > { %216 = vst [vmem:[%s5422_s26 + $0x50] sm:$0xff] %v215_v10  ;;  %218 = vst [vmem:[%s5422_s26 + $0x58] sm:$0xff] %v217_v11  ;;  %v221_v13 = vld [vmem:[%s5417_s11 + $0x128] sm:$0xff]  ;;  %v223_v14 = vld [vmem:[%s5417_s11 + $0x130] sm:$0xff] }
  0x31   : > { %220 = vst [vmem:[%s5422_s26 + $0x60] sm:$0xff] %v219_v12  ;;  %222 = vst [vmem:[%s5422_s26 + $0x68] sm:$0xff] %v221_v13  ;;  %v225_v15 = vld [vmem:[%s5417_s11 + $0x138] sm:$0xff]  ;;  %v227_v16 = vld [vmem:[%s5417_s11 + $0x140] sm:$0xff] }
  0x32   : > { %224 = vst [vmem:[%s5422_s26 + $0x70] sm:$0xff] %v223_v14  ;;  %v229_v17 = vld [vmem:[%s5417_s11 + $0x148] sm:$0xff]  ;;  %226 = vst [vmem:[%s5422_s26 + $0x78] sm:$0xff] %v225_v15  ;;  %v231_v18 = vld [vmem:[%s5417_s11 + $0x1b0] sm:$0xff] }
  0x33   : > { %228 = vst [vmem:[%s5422_s26 + $0x80] sm:$0xff] %v227_v16  ;;  %230 = vst [vmem:[%s5422_s26 + $0x88] sm:$0xff] %v229_v17  ;;  %v233_v19 = vld [vmem:[%s5417_s11 + $0x1b8] sm:$0xff]  ;;  %v235_v20 = vld [vmem:[%s5417_s11 + $0x1c0] sm:$0xff] }
  0x34   : > { %232 = vst [vmem:[%s5422_s26 + $0x90] sm:$0xff] %v231_v18  ;;  %234 = vst [vmem:[%s5422_s26 + $0x98] sm:$0xff] %v233_v19  ;;  %v237_v21 = vld [vmem:[%s5417_s11 + $0x1c8] sm:$0xff]  ;;  %v239_v22 = vld [vmem:[%s5417_s11 + $0x1d0] sm:$0xff] }
  0x35   : > { %236 = vst [vmem:[%s5422_s26 + $0xa0] sm:$0xff] %v235_v20  ;;  %v241_v23 = vld [vmem:[%s5417_s11 + $0x1d8] sm:$0xff]  ;;  %238 = vst [vmem:[%s5422_s26 + $0xa8] sm:$0xff] %v237_v21  ;;  %v243_v24 = vld [vmem:[%s5417_s11 + $0x240] sm:$0xff] }
  0x36   : > { %240 = vst [vmem:[%s5422_s26 + $0xb0] sm:$0xff] %v239_v22  ;;  %242 = vst [vmem:[%s5422_s26 + $0xb8] sm:$0xff] %v241_v23  ;;  %v245_v25 = vld [vmem:[%s5417_s11 + $0x248] sm:$0xff]  ;;  %v247_v26 = vld [vmem:[%s5417_s11 + $0x250] sm:$0xff] }
  0x37   : > { %244 = vst [vmem:[%s5422_s26 + $0xc0] sm:$0xff] %v243_v24  ;;  %246 = vst [vmem:[%s5422_s26 + $0xc8] sm:$0xff] %v245_v25  ;;  %v249_v27 = vld [vmem:[%s5417_s11 + $0x258] sm:$0xff]  ;;  %v251_v28 = vld [vmem:[%s5417_s11 + $0x260] sm:$0xff] }
  0x38   : > { %248 = vst [vmem:[%s5422_s26 + $0xd0] sm:$0xff] %v247_v26  ;;  %v253_v29 = vld [vmem:[%s5417_s11 + $0x268] sm:$0xff]  ;;  %250 = vst [vmem:[%s5422_s26 + $0xd8] sm:$0xff] %v249_v27  ;;  %v255_v30 = vld [vmem:[%s5417_s11 + $0x2d0] sm:$0xff] }
  0x39   : > { %252 = vst [vmem:[%s5422_s26 + $0xe0] sm:$0xff] %v251_v28  ;;  %254 = vst [vmem:[%s5422_s26 + $0xe8] sm:$0xff] %v253_v29  ;;  %v257_v31 = vld [vmem:[%s5417_s11 + $0x2d8] sm:$0xff]  ;;  %v259_v32 = vld [vmem:[%s5417_s11 + $0x2e0] sm:$0xff] }
  0x3a   : > { %256 = vst [vmem:[%s5422_s26 + $0xf0] sm:$0xff] %v255_v30  ;;  %258 = vst [vmem:[%s5422_s26 + $0xf8] sm:$0xff] %v257_v31  ;;  %v261_v33 = vld [vmem:[%s5417_s11 + $0x2e8] sm:$0xff]  ;;  %v263_v34 = vld [vmem:[%s5417_s11 + $0x2f0] sm:$0xff] }
  0x3b   : > { %260 = vst [vmem:[%s5422_s26 + $0x100] sm:$0xff] %v259_v32  ;;  %v265_v35 = vld [vmem:[%s5417_s11 + $0x2f8] sm:$0xff]  ;;  %262 = vst [vmem:[%s5422_s26 + $0x108] sm:$0xff] %v261_v33  ;;  %v267_v36 = vld [vmem:[%s5417_s11 + $0x360] sm:$0xff] }
  0x3c   : > { %264 = vst [vmem:[%s5422_s26 + $0x110] sm:$0xff] %v263_v34  ;;  %266 = vst [vmem:[%s5422_s26 + $0x118] sm:$0xff] %v265_v35  ;;  %v269_v37 = vld [vmem:[%s5417_s11 + $0x368] sm:$0xff]  ;;  %v271_v38 = vld [vmem:[%s5417_s11 + $0x370] sm:$0xff] }
  0x3d   : > { %268 = vst [vmem:[%s5422_s26 + $0x120] sm:$0xff] %v267_v36  ;;  %270 = vst [vmem:[%s5422_s26 + $0x128] sm:$0xff] %v269_v37  ;;  %v273_v39 = vld [vmem:[%s5417_s11 + $0x378] sm:$0xff]  ;;  %v275_v40 = vld [vmem:[%s5417_s11 + $0x380] sm:$0xff] }
  0x3e   : > { %272 = vst [vmem:[%s5422_s26 + $0x130] sm:$0xff] %v271_v38  ;;  %v277_v41 = vld [vmem:[%s5417_s11 + $0x388] sm:$0xff]  ;;  %274 = vst [vmem:[%s5422_s26 + $0x138] sm:$0xff] %v273_v39  ;;  %v279_v42 = vld [vmem:[%s5417_s11 + $0x3f0] sm:$0xff] }
  0x3f   : > { %276 = vst [vmem:[%s5422_s26 + $0x140] sm:$0xff] %v275_v40  ;;  %278 = vst [vmem:[%s5422_s26 + $0x148] sm:$0xff] %v277_v41  ;;  %v281_v43 = vld [vmem:[%s5417_s11 + $0x3f8] sm:$0xff]  ;;  %v283_v44 = vld [vmem:[%s5417_s11 + $0x400] sm:$0xff] }
  0x40   : > { %280 = vst [vmem:[%s5422_s26 + $0x150] sm:$0xff] %v279_v42  ;;  %282 = vst [vmem:[%s5422_s26 + $0x158] sm:$0xff] %v281_v43  ;;  %v285_v45 = vld [vmem:[%s5417_s11 + $0x408] sm:$0xff]  ;;  %v287_v46 = vld [vmem:[%s5417_s11 + $0x410] sm:$0xff] }
  0x41   : > { %284 = vst [vmem:[%s5422_s26 + $0x160] sm:$0xff] %v283_v44  ;;  %v289_v47 = vld [vmem:[%s5417_s11 + $0x418] sm:$0xff]  ;;  %286 = vst [vmem:[%s5422_s26 + $0x168] sm:$0xff] %v285_v45  ;;  %v291_v48 = vld [vmem:[%s5417_s11 + $0x480] sm:$0xff] }
  0x42   : > { %288 = vst [vmem:[%s5422_s26 + $0x170] sm:$0xff] %v287_v46  ;;  %290 = vst [vmem:[%s5422_s26 + $0x178] sm:$0xff] %v289_v47  ;;  %v293_v49 = vld [vmem:[%s5417_s11 + $0x488] sm:$0xff]  ;;  %v295_v50 = vld [vmem:[%s5417_s11 + $0x490] sm:$0xff] }
  0x43   : > { %292 = vst [vmem:[%s5422_s26 + $0x180] sm:$0xff] %v291_v48  ;;  %294 = vst [vmem:[%s5422_s26 + $0x188] sm:$0xff] %v293_v49  ;;  %v297_v51 = vld [vmem:[%s5417_s11 + $0x498] sm:$0xff]  ;;  %v299_v52 = vld [vmem:[%s5417_s11 + $0x4a0] sm:$0xff] }
  0x44   : > { %296 = vst [vmem:[%s5422_s26 + $0x190] sm:$0xff] %v295_v50  ;;  %v301_v53 = vld [vmem:[%s5417_s11 + $0x4a8] sm:$0xff]  ;;  %298 = vst [vmem:[%s5422_s26 + $0x198] sm:$0xff] %v297_v51  ;;  %v303_v54 = vld [vmem:[%s5417_s11 + $0x510] sm:$0xff] }
  0x45   : > { %300 = vst [vmem:[%s5422_s26 + $0x1a0] sm:$0xff] %v299_v52  ;;  %302 = vst [vmem:[%s5422_s26 + $0x1a8] sm:$0xff] %v301_v53  ;;  %v305_v55 = vld [vmem:[%s5417_s11 + $0x518] sm:$0xff]  ;;  %v307_v56 = vld [vmem:[%s5417_s11 + $0x520] sm:$0xff] }
  0x46   : > { %304 = vst [vmem:[%s5422_s26 + $0x1b0] sm:$0xff] %v303_v54  ;;  %306 = vst [vmem:[%s5422_s26 + $0x1b8] sm:$0xff] %v305_v55  ;;  %v309_v57 = vld [vmem:[%s5417_s11 + $0x528] sm:$0xff]  ;;  %v311_v58 = vld [vmem:[%s5417_s11 + $0x530] sm:$0xff] }
  0x47   : > { %308 = vst [vmem:[%s5422_s26 + $0x1c0] sm:$0xff] %v307_v56  ;;  %v313_v59 = vld [vmem:[%s5417_s11 + $0x538] sm:$0xff]  ;;  %310 = vst [vmem:[%s5422_s26 + $0x1c8] sm:$0xff] %v309_v57  ;;  %v315_v60 = vld [vmem:[%s5417_s11 + $0x5a0] sm:$0xff] }
  0x48   : > { %312 = vst [vmem:[%s5422_s26 + $0x1d0] sm:$0xff] %v311_v58  ;;  %314 = vst [vmem:[%s5422_s26 + $0x1d8] sm:$0xff] %v313_v59  ;;  %v317_v61 = vld [vmem:[%s5417_s11 + $0x5a8] sm:$0xff]  ;;  %v319_v62 = vld [vmem:[%s5417_s11 + $0x5b0] sm:$0xff] }
  0x49   : > { %316 = vst [vmem:[%s5422_s26 + $0x1e0] sm:$0xff] %v315_v60  ;;  %318 = vst [vmem:[%s5422_s26 + $0x1e8] sm:$0xff] %v317_v61  ;;  %v321_v63 = vld [vmem:[%s5417_s11 + $0x5b8] sm:$0xff]  ;;  %v323_v0 = vld [vmem:[%s5417_s11 + $0x5c0] sm:$0xff] }
  0x4a   : > { %320 = vst [vmem:[%s5422_s26 + $0x1f0] sm:$0xff] %v319_v62  ;;  %v325_v1 = vld [vmem:[%s5417_s11 + $0x5c8] sm:$0xff]  ;;  %322 = vst [vmem:[%s5422_s26 + $0x1f8] sm:$0xff] %v321_v63  ;;  %v327_v2 = vld [vmem:[%s5417_s11 + $0x630] sm:$0xff] }
  0x4b   : > { %324 = vst [vmem:[%s5422_s26 + $0x200] sm:$0xff] %v323_v0  ;;  %326 = vst [vmem:[%s5422_s26 + $0x208] sm:$0xff] %v325_v1  ;;  %v329_v3 = vld [vmem:[%s5417_s11 + $0x638] sm:$0xff]  ;;  %v331_v4 = vld [vmem:[%s5417_s11 + $0x640] sm:$0xff] }
  0x4c   : > { %328 = vst [vmem:[%s5422_s26 + $0x210] sm:$0xff] %v327_v2  ;;  %330 = vst [vmem:[%s5422_s26 + $0x218] sm:$0xff] %v329_v3  ;;  %v333_v5 = vld [vmem:[%s5417_s11 + $0x648] sm:$0xff]  ;;  %v335_v6 = vld [vmem:[%s5417_s11 + $0x650] sm:$0xff] }
  0x4d   : > { %332 = vst [vmem:[%s5422_s26 + $0x220] sm:$0xff] %v331_v4  ;;  %v337_v7 = vld [vmem:[%s5417_s11 + $0x658] sm:$0xff]  ;;  %334 = vst [vmem:[%s5422_s26 + $0x228] sm:$0xff] %v333_v5  ;;  %v339_v8 = vld [vmem:[%s5417_s11 + $0x6c0] sm:$0xff] }
  0x4e   : > { %336 = vst [vmem:[%s5422_s26 + $0x230] sm:$0xff] %v335_v6  ;;  %338 = vst [vmem:[%s5422_s26 + $0x238] sm:$0xff] %v337_v7  ;;  %v341_v9 = vld [vmem:[%s5417_s11 + $0x6c8] sm:$0xff]  ;;  %v343_v10 = vld [vmem:[%s5417_s11 + $0x6d0] sm:$0xff] }
  0x4f   : > { %340 = vst [vmem:[%s5422_s26 + $0x240] sm:$0xff] %v339_v8  ;;  %342 = vst [vmem:[%s5422_s26 + $0x248] sm:$0xff] %v341_v9  ;;  %v345_v11 = vld [vmem:[%s5417_s11 + $0x6d8] sm:$0xff]  ;;  %v347_v12 = vld [vmem:[%s5417_s11 + $0x6e0] sm:$0xff] }
  0x50   : > { %344 = vst [vmem:[%s5422_s26 + $0x250] sm:$0xff] %v343_v10  ;;  %v349_v13 = vld [vmem:[%s5417_s11 + $0x6e8] sm:$0xff]  ;;  %346 = vst [vmem:[%s5422_s26 + $0x258] sm:$0xff] %v345_v11  ;;  %v351_v14 = vld [vmem:[%s5417_s11 + $0x750] sm:$0xff] }
  0x51   : > { %348 = vst [vmem:[%s5422_s26 + $0x260] sm:$0xff] %v347_v12  ;;  %350 = vst [vmem:[%s5422_s26 + $0x268] sm:$0xff] %v349_v13  ;;  %v353_v15 = vld [vmem:[%s5417_s11 + $0x758] sm:$0xff]  ;;  %v355_v16 = vld [vmem:[%s5417_s11 + $0x760] sm:$0xff] }
  0x52   : > { %352 = vst [vmem:[%s5422_s26 + $0x270] sm:$0xff] %v351_v14  ;;  %354 = vst [vmem:[%s5422_s26 + $0x278] sm:$0xff] %v353_v15  ;;  %v357_v17 = vld [vmem:[%s5417_s11 + $0x768] sm:$0xff]  ;;  %v359_v18 = vld [vmem:[%s5417_s11 + $0x770] sm:$0xff] }
  0x53   : > { %356 = vst [vmem:[%s5422_s26 + $0x280] sm:$0xff] %v355_v16  ;;  %v361_v19 = vld [vmem:[%s5417_s11 + $0x778] sm:$0xff]  ;;  %358 = vst [vmem:[%s5422_s26 + $0x288] sm:$0xff] %v357_v17  ;;  %v363_v20 = vld [vmem:[%s5417_s11 + $0x7e0] sm:$0xff] }
  0x54   : > { %360 = vst [vmem:[%s5422_s26 + $0x290] sm:$0xff] %v359_v18  ;;  %362 = vst [vmem:[%s5422_s26 + $0x298] sm:$0xff] %v361_v19  ;;  %v365_v21 = vld [vmem:[%s5417_s11 + $0x7e8] sm:$0xff]  ;;  %v367_v22 = vld [vmem:[%s5417_s11 + $0x7f0] sm:$0xff] }
  0x55   : > { %364 = vst [vmem:[%s5422_s26 + $0x2a0] sm:$0xff] %v363_v20  ;;  %366 = vst [vmem:[%s5422_s26 + $0x2a8] sm:$0xff] %v365_v21  ;;  %v369_v23 = vld [vmem:[%s5417_s11 + $0x7f8] sm:$0xff]  ;;  %v371_v24 = vld [vmem:[%s5417_s11 + $0x800] sm:$0xff] }
  0x56   : > { %368 = vst [vmem:[%s5422_s26 + $0x2b0] sm:$0xff] %v367_v22  ;;  %v373_v25 = vld [vmem:[%s5417_s11 + $0x808] sm:$0xff]  ;;  %370 = vst [vmem:[%s5422_s26 + $0x2b8] sm:$0xff] %v369_v23  ;;  %v375_v26 = vld [vmem:[%s5417_s11 + $0x870] sm:$0xff] }
  0x57   : > { %372 = vst [vmem:[%s5422_s26 + $0x2c0] sm:$0xff] %v371_v24  ;;  %374 = vst [vmem:[%s5422_s26 + $0x2c8] sm:$0xff] %v373_v25  ;;  %v377_v27 = vld [vmem:[%s5417_s11 + $0x878] sm:$0xff]  ;;  %v379_v28 = vld [vmem:[%s5417_s11 + $0x880] sm:$0xff] }
  0x58   : > { %376 = vst [vmem:[%s5422_s26 + $0x2d0] sm:$0xff] %v375_v26  ;;  %378 = vst [vmem:[%s5422_s26 + $0x2d8] sm:$0xff] %v377_v27  ;;  %v381_v29 = vld [vmem:[%s5417_s11 + $0x888] sm:$0xff]  ;;  %v383_v30 = vld [vmem:[%s5417_s11 + $0x890] sm:$0xff] }
  0x59   : > { %380 = vst [vmem:[%s5422_s26 + $0x2e0] sm:$0xff] %v379_v28  ;;  %v385_v31 = vld [vmem:[%s5417_s11 + $0x898] sm:$0xff]  ;;  %382 = vst [vmem:[%s5422_s26 + $0x2e8] sm:$0xff] %v381_v29 }
  0x5a   : > { %384 = vst [vmem:[%s5422_s26 + $0x2f0] sm:$0xff] %v383_v30  ;;  %386 = vst [vmem:[%s5422_s26 + $0x2f8] sm:$0xff] %v385_v31 }
  0x5b PF: > { %392 = sbr.rel (!%p5392_p9) target bundleno = 197 (0xc5), region = 43  ;;  %s394_s5 = sand.u32 (%p5392_p9), 1, %s5255_s18  }
  0x5c   : > { %s4673_s29 = smul.u32 (%p5392_p9), 1536, %s394_s5  ;;  %s4207_s30 = sshll.u32 (%p5392_p9), %s5279_s24, 1 }
  0x5d   : > { %s4510_s8 = smul.u32 (%p5392_p9), 768, %s5275_s23  ;;  %s6683_s1 = sld [smem:[#allocation8_spill]] (%p5392_p9) }
  0x5e   : > { %s5626_s10 = scalar_lea.vmem (%p5392_p9), [#allocation3], %s4673_s29 }
  0x5f   : > { %s400_s6 = sadd.s32 (%p5392_p9), %s4510_s8, %s4207_s30 }
  0x60   : > { %s4209_s9 = sshll.u32 (%p5392_p9), %s400_s6, 2 }
  0x63   : > { %s5621_s11 = scalar_lea.vmem %s6683_s1, %s4209_s9 }
  0x64   : > { %v812_v32 = vld [vmem:[%s5621_s11] sm:$0xff]  ;;  %v814_v33 = vld [vmem:[%s5621_s11 + $0x10] sm:$0xff] }
  0x65   : > { %v816_v34 = vld [vmem:[%s5621_s11 + $0x20] sm:$0xff]  ;;  %813 = vst [vmem:[%s5626_s10] sm:$0xff] %v812_v32  ;;  %815 = vst [vmem:[%s5626_s10 + $0x8] sm:$0xff] %v814_v33  ;;  %v818_v35 = vld [vmem:[%s5621_s11 + $0x30] sm:$0xff] }
  0x66   : > { %817 = vst [vmem:[%s5626_s10 + $0x10] sm:$0xff] %v816_v34  ;;  %v820_v36 = vld [vmem:[%s5621_s11 + $0x40] sm:$0xff]  ;;  %v822_v37 = vld [vmem:[%s5621_s11 + $0x50] sm:$0xff]  ;;  %819 = vst [vmem:[%s5626_s10 + $0x18] sm:$0xff] %v818_v35 }
  0x67   : > { %821 = vst [vmem:[%s5626_s10 + $0x20] sm:$0xff] %v820_v36  ;;  %823 = vst [vmem:[%s5626_s10 + $0x28] sm:$0xff] %v822_v37  ;;  %v824_v38 = vld [vmem:[%s5621_s11 + $0x60] sm:$0xff]  ;;  %v826_v39 = vld [vmem:[%s5621_s11 + $0x70] sm:$0xff] }
  0x68   : > { %v828_v40 = vld [vmem:[%s5621_s11 + $0x80] sm:$0xff]  ;;  %825 = vst [vmem:[%s5626_s10 + $0x30] sm:$0xff] %v824_v38  ;;  %827 = vst [vmem:[%s5626_s10 + $0x38] sm:$0xff] %v826_v39  ;;  %v830_v41 = vld [vmem:[%s5621_s11 + $0x90] sm:$0xff] }
  0x69   : > { %829 = vst [vmem:[%s5626_s10 + $0x40] sm:$0xff] %v828_v40  ;;  %v832_v42 = vld [vmem:[%s5621_s11 + $0xa0] sm:$0xff]  ;;  %v834_v43 = vld [vmem:[%s5621_s11 + $0xb0] sm:$0xff]  ;;  %831 = vst [vmem:[%s5626_s10 + $0x48] sm:$0xff] %v830_v41 }
  0x6a   : > { %833 = vst [vmem:[%s5626_s10 + $0x50] sm:$0xff] %v832_v42  ;;  %835 = vst [vmem:[%s5626_s10 + $0x58] sm:$0xff] %v834_v43  ;;  %v836_v44 = vld [vmem:[%s5621_s11 + $0xc0] sm:$0xff]  ;;  %v838_v45 = vld [vmem:[%s5621_s11 + $0xd0] sm:$0xff] }
  0x6b   : > { %v840_v46 = vld [vmem:[%s5621_s11 + $0xe0] sm:$0xff]  ;;  %837 = vst [vmem:[%s5626_s10 + $0x60] sm:$0xff] %v836_v44  ;;  %839 = vst [vmem:[%s5626_s10 + $0x68] sm:$0xff] %v838_v45  ;;  %v842_v47 = vld [vmem:[%s5621_s11 + $0xf0] sm:$0xff] }
  0x6c   : > { %841 = vst [vmem:[%s5626_s10 + $0x70] sm:$0xff] %v840_v46  ;;  %v844_v48 = vld [vmem:[%s5621_s11 + $0x100] sm:$0xff]  ;;  %v846_v49 = vld [vmem:[%s5621_s11 + $0x110] sm:$0xff]  ;;  %843 = vst [vmem:[%s5626_s10 + $0x78] sm:$0xff] %v842_v47 }
  0x6d   : > { %845 = vst [vmem:[%s5626_s10 + $0x80] sm:$0xff] %v844_v48  ;;  %847 = vst [vmem:[%s5626_s10 + $0x88] sm:$0xff] %v846_v49  ;;  %v848_v50 = vld [vmem:[%s5621_s11 + $0x120] sm:$0xff]  ;;  %v850_v51 = vld [vmem:[%s5621_s11 + $0x130] sm:$0xff] }
  0x6e   : > { %v852_v52 = vld [vmem:[%s5621_s11 + $0x140] sm:$0xff]  ;;  %849 = vst [vmem:[%s5626_s10 + $0x90] sm:$0xff] %v848_v50  ;;  %851 = vst [vmem:[%s5626_s10 + $0x98] sm:$0xff] %v850_v51  ;;  %v854_v53 = vld [vmem:[%s5621_s11 + $0x150] sm:$0xff] }
  0x6f   : > { %853 = vst [vmem:[%s5626_s10 + $0xa0] sm:$0xff] %v852_v52  ;;  %v856_v54 = vld [vmem:[%s5621_s11 + $0x160] sm:$0xff]  ;;  %v858_v55 = vld [vmem:[%s5621_s11 + $0x170] sm:$0xff]  ;;  %855 = vst [vmem:[%s5626_s10 + $0xa8] sm:$0xff] %v854_v53 }
  0x70   : > { %857 = vst [vmem:[%s5626_s10 + $0xb0] sm:$0xff] %v856_v54  ;;  %859 = vst [vmem:[%s5626_s10 + $0xb8] sm:$0xff] %v858_v55  ;;  %v860_v56 = vld [vmem:[%s5621_s11 + $0x180] sm:$0xff]  ;;  %v862_v57 = vld [vmem:[%s5621_s11 + $0x190] sm:$0xff] }
  0x71   : > { %v864_v58 = vld [vmem:[%s5621_s11 + $0x1a0] sm:$0xff]  ;;  %861 = vst [vmem:[%s5626_s10 + $0xc0] sm:$0xff] %v860_v56  ;;  %863 = vst [vmem:[%s5626_s10 + $0xc8] sm:$0xff] %v862_v57  ;;  %v866_v59 = vld [vmem:[%s5621_s11 + $0x1b0] sm:$0xff] }
  0x72   : > { %865 = vst [vmem:[%s5626_s10 + $0xd0] sm:$0xff] %v864_v58  ;;  %v868_v60 = vld [vmem:[%s5621_s11 + $0x1c0] sm:$0xff]  ;;  %v870_v61 = vld [vmem:[%s5621_s11 + $0x1d0] sm:$0xff]  ;;  %867 = vst [vmem:[%s5626_s10 + $0xd8] sm:$0xff] %v866_v59 }
  0x73   : > { %869 = vst [vmem:[%s5626_s10 + $0xe0] sm:$0xff] %v868_v60  ;;  %871 = vst [vmem:[%s5626_s10 + $0xe8] sm:$0xff] %v870_v61  ;;  %v872_v62 = vld [vmem:[%s5621_s11 + $0x1e0] sm:$0xff]  ;;  %v874_v63 = vld [vmem:[%s5621_s11 + $0x1f0] sm:$0xff] }
  0x74   : > { %v876_v0 = vld [vmem:[%s5621_s11 + $0x200] sm:$0xff]  ;;  %873 = vst [vmem:[%s5626_s10 + $0xf0] sm:$0xff] %v872_v62  ;;  %875 = vst [vmem:[%s5626_s10 + $0xf8] sm:$0xff] %v874_v63  ;;  %v878_v1 = vld [vmem:[%s5621_s11 + $0x210] sm:$0xff] }
  0x75   : > { %877 = vst [vmem:[%s5626_s10 + $0x100] sm:$0xff] %v876_v0  ;;  %v880_v2 = vld [vmem:[%s5621_s11 + $0x220] sm:$0xff]  ;;  %v882_v3 = vld [vmem:[%s5621_s11 + $0x230] sm:$0xff]  ;;  %879 = vst [vmem:[%s5626_s10 + $0x108] sm:$0xff] %v878_v1 }
  0x76   : > { %881 = vst [vmem:[%s5626_s10 + $0x110] sm:$0xff] %v880_v2  ;;  %883 = vst [vmem:[%s5626_s10 + $0x118] sm:$0xff] %v882_v3  ;;  %v884_v4 = vld [vmem:[%s5621_s11 + $0x240] sm:$0xff]  ;;  %v886_v5 = vld [vmem:[%s5621_s11 + $0x250] sm:$0xff] }
  0x77   : > { %v888_v6 = vld [vmem:[%s5621_s11 + $0x260] sm:$0xff]  ;;  %885 = vst [vmem:[%s5626_s10 + $0x120] sm:$0xff] %v884_v4  ;;  %887 = vst [vmem:[%s5626_s10 + $0x128] sm:$0xff] %v886_v5  ;;  %v890_v7 = vld [vmem:[%s5621_s11 + $0x270] sm:$0xff] }
  0x78   : > { %889 = vst [vmem:[%s5626_s10 + $0x130] sm:$0xff] %v888_v6  ;;  %v892_v8 = vld [vmem:[%s5621_s11 + $0x280] sm:$0xff]  ;;  %v894_v9 = vld [vmem:[%s5621_s11 + $0x290] sm:$0xff]  ;;  %891 = vst [vmem:[%s5626_s10 + $0x138] sm:$0xff] %v890_v7 }
  0x79   : > { %893 = vst [vmem:[%s5626_s10 + $0x140] sm:$0xff] %v892_v8  ;;  %895 = vst [vmem:[%s5626_s10 + $0x148] sm:$0xff] %v894_v9  ;;  %v896_v10 = vld [vmem:[%s5621_s11 + $0x2a0] sm:$0xff]  ;;  %v898_v11 = vld [vmem:[%s5621_s11 + $0x2b0] sm:$0xff] }
  0x7a   : > { %v900_v12 = vld [vmem:[%s5621_s11 + $0x2c0] sm:$0xff]  ;;  %897 = vst [vmem:[%s5626_s10 + $0x150] sm:$0xff] %v896_v10  ;;  %899 = vst [vmem:[%s5626_s10 + $0x158] sm:$0xff] %v898_v11  ;;  %v902_v13 = vld [vmem:[%s5621_s11 + $0x2d0] sm:$0xff] }
  0x7b   : > { %901 = vst [vmem:[%s5626_s10 + $0x160] sm:$0xff] %v900_v12  ;;  %v904_v14 = vld [vmem:[%s5621_s11 + $0x2e0] sm:$0xff]  ;;  %v906_v15 = vld [vmem:[%s5621_s11 + $0x2f0] sm:$0xff]  ;;  %903 = vst [vmem:[%s5626_s10 + $0x168] sm:$0xff] %v902_v13 }
  0x7c   : > { %905 = vst [vmem:[%s5626_s10 + $0x170] sm:$0xff] %v904_v14  ;;  %907 = vst [vmem:[%s5626_s10 + $0x178] sm:$0xff] %v906_v15  ;;  %v908_v16 = vld [vmem:[%s5621_s11 + $0x300] sm:$0xff]  ;;  %v910_v17 = vld [vmem:[%s5621_s11 + $0x310] sm:$0xff] }
  0x7d   : > { %v912_v18 = vld [vmem:[%s5621_s11 + $0x320] sm:$0xff]  ;;  %909 = vst [vmem:[%s5626_s10 + $0x180] sm:$0xff] %v908_v16  ;;  %911 = vst [vmem:[%s5626_s10 + $0x188] sm:$0xff] %v910_v17  ;;  %v914_v19 = vld [vmem:[%s5621_s11 + $0x330] sm:$0xff] }
  0x7e   : > { %913 = vst [vmem:[%s5626_s10 + $0x190] sm:$0xff] %v912_v18  ;;  %v916_v20 = vld [vmem:[%s5621_s11 + $0x340] sm:$0xff]  ;;  %v918_v21 = vld [vmem:[%s5621_s11 + $0x350] sm:$0xff]  ;;  %915 = vst [vmem:[%s5626_s10 + $0x198] sm:$0xff] %v914_v19 }
  0x7f   : > { %917 = vst [vmem:[%s5626_s10 + $0x1a0] sm:$0xff] %v916_v20  ;;  %919 = vst [vmem:[%s5626_s10 + $0x1a8] sm:$0xff] %v918_v21  ;;  %v920_v22 = vld [vmem:[%s5621_s11 + $0x360] sm:$0xff]  ;;  %v922_v23 = vld [vmem:[%s5621_s11 + $0x370] sm:$0xff] }
  0x80   : > { %v924_v24 = vld [vmem:[%s5621_s11 + $0x380] sm:$0xff]  ;;  %921 = vst [vmem:[%s5626_s10 + $0x1b0] sm:$0xff] %v920_v22  ;;  %923 = vst [vmem:[%s5626_s10 + $0x1b8] sm:$0xff] %v922_v23  ;;  %v926_v25 = vld [vmem:[%s5621_s11 + $0x390] sm:$0xff] }
  0x81   : > { %925 = vst [vmem:[%s5626_s10 + $0x1c0] sm:$0xff] %v924_v24  ;;  %v928_v26 = vld [vmem:[%s5621_s11 + $0x3a0] sm:$0xff]  ;;  %v930_v27 = vld [vmem:[%s5621_s11 + $0x3b0] sm:$0xff]  ;;  %927 = vst [vmem:[%s5626_s10 + $0x1c8] sm:$0xff] %v926_v25 }
  0x82   : > { %929 = vst [vmem:[%s5626_s10 + $0x1d0] sm:$0xff] %v928_v26  ;;  %931 = vst [vmem:[%s5626_s10 + $0x1d8] sm:$0xff] %v930_v27  ;;  %v932_v28 = vld [vmem:[%s5621_s11 + $0x3c0] sm:$0xff]  ;;  %v934_v29 = vld [vmem:[%s5621_s11 + $0x3d0] sm:$0xff] }
  0x83   : > { %v936_v30 = vld [vmem:[%s5621_s11 + $0x3e0] sm:$0xff]  ;;  %933 = vst [vmem:[%s5626_s10 + $0x1e0] sm:$0xff] %v932_v28  ;;  %935 = vst [vmem:[%s5626_s10 + $0x1e8] sm:$0xff] %v934_v29  ;;  %v938_v31 = vld [vmem:[%s5621_s11 + $0x3f0] sm:$0xff] }
  0x84   : > { %937 = vst [vmem:[%s5626_s10 + $0x1f0] sm:$0xff] %v936_v30  ;;  %v940_v32 = vld [vmem:[%s5621_s11 + $0x400] sm:$0xff]  ;;  %v942_v33 = vld [vmem:[%s5621_s11 + $0x410] sm:$0xff]  ;;  %939 = vst [vmem:[%s5626_s10 + $0x1f8] sm:$0xff] %v938_v31 }
  0x85   : > { %941 = vst [vmem:[%s5626_s10 + $0x200] sm:$0xff] %v940_v32  ;;  %943 = vst [vmem:[%s5626_s10 + $0x208] sm:$0xff] %v942_v33  ;;  %v944_v34 = vld [vmem:[%s5621_s11 + $0x420] sm:$0xff]  ;;  %v946_v35 = vld [vmem:[%s5621_s11 + $0x430] sm:$0xff] }
  0x86   : > { %v948_v36 = vld [vmem:[%s5621_s11 + $0x440] sm:$0xff]  ;;  %945 = vst [vmem:[%s5626_s10 + $0x210] sm:$0xff] %v944_v34  ;;  %947 = vst [vmem:[%s5626_s10 + $0x218] sm:$0xff] %v946_v35  ;;  %v950_v37 = vld [vmem:[%s5621_s11 + $0x450] sm:$0xff] }
  0x87   : > { %949 = vst [vmem:[%s5626_s10 + $0x220] sm:$0xff] %v948_v36  ;;  %v952_v38 = vld [vmem:[%s5621_s11 + $0x460] sm:$0xff]  ;;  %v954_v39 = vld [vmem:[%s5621_s11 + $0x470] sm:$0xff]  ;;  %951 = vst [vmem:[%s5626_s10 + $0x228] sm:$0xff] %v950_v37 }
  0x88   : > { %953 = vst [vmem:[%s5626_s10 + $0x230] sm:$0xff] %v952_v38  ;;  %955 = vst [vmem:[%s5626_s10 + $0x238] sm:$0xff] %v954_v39  ;;  %v956_v40 = vld [vmem:[%s5621_s11 + $0x480] sm:$0xff]  ;;  %v958_v41 = vld [vmem:[%s5621_s11 + $0x490] sm:$0xff] }
  0x89   : > { %v960_v42 = vld [vmem:[%s5621_s11 + $0x4a0] sm:$0xff]  ;;  %957 = vst [vmem:[%s5626_s10 + $0x240] sm:$0xff] %v956_v40  ;;  %959 = vst [vmem:[%s5626_s10 + $0x248] sm:$0xff] %v958_v41  ;;  %v962_v43 = vld [vmem:[%s5621_s11 + $0x4b0] sm:$0xff] }
  0x8a   : > { %961 = vst [vmem:[%s5626_s10 + $0x250] sm:$0xff] %v960_v42  ;;  %v964_v44 = vld [vmem:[%s5621_s11 + $0x4c0] sm:$0xff]  ;;  %v966_v45 = vld [vmem:[%s5621_s11 + $0x4d0] sm:$0xff]  ;;  %963 = vst [vmem:[%s5626_s10 + $0x258] sm:$0xff] %v962_v43 }
  0x8b   : > { %965 = vst [vmem:[%s5626_s10 + $0x260] sm:$0xff] %v964_v44  ;;  %967 = vst [vmem:[%s5626_s10 + $0x268] sm:$0xff] %v966_v45  ;;  %v968_v46 = vld [vmem:[%s5621_s11 + $0x4e0] sm:$0xff]  ;;  %v970_v47 = vld [vmem:[%s5621_s11 + $0x4f0] sm:$0xff] }
  0x8c   : > { %v972_v48 = vld [vmem:[%s5621_s11 + $0x500] sm:$0xff]  ;;  %969 = vst [vmem:[%s5626_s10 + $0x270] sm:$0xff] %v968_v46  ;;  %971 = vst [vmem:[%s5626_s10 + $0x278] sm:$0xff] %v970_v47  ;;  %v974_v49 = vld [vmem:[%s5621_s11 + $0x510] sm:$0xff] }
  0x8d   : > { %973 = vst [vmem:[%s5626_s10 + $0x280] sm:$0xff] %v972_v48  ;;  %v976_v50 = vld [vmem:[%s5621_s11 + $0x520] sm:$0xff]  ;;  %v978_v51 = vld [vmem:[%s5621_s11 + $0x530] sm:$0xff]  ;;  %975 = vst [vmem:[%s5626_s10 + $0x288] sm:$0xff] %v974_v49 }
  0x8e   : > { %977 = vst [vmem:[%s5626_s10 + $0x290] sm:$0xff] %v976_v50  ;;  %979 = vst [vmem:[%s5626_s10 + $0x298] sm:$0xff] %v978_v51  ;;  %v980_v52 = vld [vmem:[%s5621_s11 + $0x540] sm:$0xff]  ;;  %v982_v53 = vld [vmem:[%s5621_s11 + $0x550] sm:$0xff] }
  0x8f   : > { %v984_v54 = vld [vmem:[%s5621_s11 + $0x560] sm:$0xff]  ;;  %981 = vst [vmem:[%s5626_s10 + $0x2a0] sm:$0xff] %v980_v52  ;;  %983 = vst [vmem:[%s5626_s10 + $0x2a8] sm:$0xff] %v982_v53  ;;  %v986_v55 = vld [vmem:[%s5621_s11 + $0x570] sm:$0xff] }
  0x90   : > { %985 = vst [vmem:[%s5626_s10 + $0x2b0] sm:$0xff] %v984_v54  ;;  %v988_v56 = vld [vmem:[%s5621_s11 + $0x580] sm:$0xff]  ;;  %v990_v57 = vld [vmem:[%s5621_s11 + $0x590] sm:$0xff]  ;;  %987 = vst [vmem:[%s5626_s10 + $0x2b8] sm:$0xff] %v986_v55 }
  0x91   : > { %989 = vst [vmem:[%s5626_s10 + $0x2c0] sm:$0xff] %v988_v56  ;;  %991 = vst [vmem:[%s5626_s10 + $0x2c8] sm:$0xff] %v990_v57  ;;  %v992_v58 = vld [vmem:[%s5621_s11 + $0x5a0] sm:$0xff]  ;;  %v994_v59 = vld [vmem:[%s5621_s11 + $0x5b0] sm:$0xff] }
  0x92   : > { %v996_v60 = vld [vmem:[%s5621_s11 + $0x5c0] sm:$0xff]  ;;  %993 = vst [vmem:[%s5626_s10 + $0x2d0] sm:$0xff] %v992_v58  ;;  %995 = vst [vmem:[%s5626_s10 + $0x2d8] sm:$0xff] %v994_v59  ;;  %v998_v61 = vld [vmem:[%s5621_s11 + $0x5d0] sm:$0xff] }
  0x93   : > { %997 = vst [vmem:[%s5626_s10 + $0x2e0] sm:$0xff] %v996_v60  ;;  %v1000_v62 = vld [vmem:[%s5621_s11 + $0x5e0] sm:$0xff]  ;;  %v1002_v63 = vld [vmem:[%s5621_s11 + $0x5f0] sm:$0xff]  ;;  %999 = vst [vmem:[%s5626_s10 + $0x2e8] sm:$0xff] %v998_v61 }
  0x94   : > { %1001 = vst [vmem:[%s5626_s10 + $0x2f0] sm:$0xff] %v1000_v62  ;;  %1003 = vst [vmem:[%s5626_s10 + $0x2f8] sm:$0xff] %v1002_v63  ;;  %v1004_v0 = vld [vmem:[%s5621_s11 + $0x600] sm:$0xff]  ;;  %v1006_v1 = vld [vmem:[%s5621_s11 + $0x610] sm:$0xff] }
  0x95   : > { %v1008_v2 = vld [vmem:[%s5621_s11 + $0x620] sm:$0xff]  ;;  %1005 = vst [vmem:[%s5626_s10 + $0x300] sm:$0xff] %v1004_v0  ;;  %1007 = vst [vmem:[%s5626_s10 + $0x308] sm:$0xff] %v1006_v1  ;;  %v1010_v3 = vld [vmem:[%s5621_s11 + $0x630] sm:$0xff] }
  0x96   : > { %1009 = vst [vmem:[%s5626_s10 + $0x310] sm:$0xff] %v1008_v2  ;;  %v1012_v4 = vld [vmem:[%s5621_s11 + $0x640] sm:$0xff]  ;;  %v1014_v5 = vld [vmem:[%s5621_s11 + $0x650] sm:$0xff]  ;;  %1011 = vst [vmem:[%s5626_s10 + $0x318] sm:$0xff] %v1010_v3 }
  0x97   : > { %1013 = vst [vmem:[%s5626_s10 + $0x320] sm:$0xff] %v1012_v4  ;;  %1015 = vst [vmem:[%s5626_s10 + $0x328] sm:$0xff] %v1014_v5  ;;  %v1016_v6 = vld [vmem:[%s5621_s11 + $0x660] sm:$0xff]  ;;  %v1018_v7 = vld [vmem:[%s5621_s11 + $0x670] sm:$0xff] }
  0x98   : > { %v1020_v8 = vld [vmem:[%s5621_s11 + $0x680] sm:$0xff]  ;;  %1017 = vst [vmem:[%s5626_s10 + $0x330] sm:$0xff] %v1016_v6  ;;  %1019 = vst [vmem:[%s5626_s10 + $0x338] sm:$0xff] %v1018_v7  ;;  %v1022_v9 = vld [vmem:[%s5621_s11 + $0x690] sm:$0xff] }
  0x99   : > { %1021 = vst [vmem:[%s5626_s10 + $0x340] sm:$0xff] %v1020_v8  ;;  %v1024_v10 = vld [vmem:[%s5621_s11 + $0x6a0] sm:$0xff]  ;;  %v1026_v11 = vld [vmem:[%s5621_s11 + $0x6b0] sm:$0xff]  ;;  %1023 = vst [vmem:[%s5626_s10 + $0x348] sm:$0xff] %v1022_v9 }
  0x9a   : > { %1025 = vst [vmem:[%s5626_s10 + $0x350] sm:$0xff] %v1024_v10  ;;  %1027 = vst [vmem:[%s5626_s10 + $0x358] sm:$0xff] %v1026_v11  ;;  %v1028_v12 = vld [vmem:[%s5621_s11 + $0x6c0] sm:$0xff]  ;;  %v1030_v13 = vld [vmem:[%s5621_s11 + $0x6d0] sm:$0xff] }
  0x9b   : > { %v1032_v14 = vld [vmem:[%s5621_s11 + $0x6e0] sm:$0xff]  ;;  %1029 = vst [vmem:[%s5626_s10 + $0x360] sm:$0xff] %v1028_v12  ;;  %1031 = vst [vmem:[%s5626_s10 + $0x368] sm:$0xff] %v1030_v13  ;;  %v1034_v15 = vld [vmem:[%s5621_s11 + $0x6f0] sm:$0xff] }
  0x9c   : > { %1033 = vst [vmem:[%s5626_s10 + $0x370] sm:$0xff] %v1032_v14  ;;  %v1036_v16 = vld [vmem:[%s5621_s11 + $0x700] sm:$0xff]  ;;  %v1038_v17 = vld [vmem:[%s5621_s11 + $0x710] sm:$0xff]  ;;  %1035 = vst [vmem:[%s5626_s10 + $0x378] sm:$0xff] %v1034_v15 }
  0x9d   : > { %1037 = vst [vmem:[%s5626_s10 + $0x380] sm:$0xff] %v1036_v16  ;;  %1039 = vst [vmem:[%s5626_s10 + $0x388] sm:$0xff] %v1038_v17  ;;  %v1040_v18 = vld [vmem:[%s5621_s11 + $0x720] sm:$0xff]  ;;  %v1042_v19 = vld [vmem:[%s5621_s11 + $0x730] sm:$0xff] }
  0x9e   : > { %v1044_v20 = vld [vmem:[%s5621_s11 + $0x740] sm:$0xff]  ;;  %1041 = vst [vmem:[%s5626_s10 + $0x390] sm:$0xff] %v1040_v18  ;;  %1043 = vst [vmem:[%s5626_s10 + $0x398] sm:$0xff] %v1042_v19  ;;  %v1046_v21 = vld [vmem:[%s5621_s11 + $0x750] sm:$0xff] }
  0x9f   : > { %1045 = vst [vmem:[%s5626_s10 + $0x3a0] sm:$0xff] %v1044_v20  ;;  %v1048_v22 = vld [vmem:[%s5621_s11 + $0x760] sm:$0xff]  ;;  %v1050_v23 = vld [vmem:[%s5621_s11 + $0x770] sm:$0xff]  ;;  %1047 = vst [vmem:[%s5626_s10 + $0x3a8] sm:$0xff] %v1046_v21 }
  0xa0   : > { %1049 = vst [vmem:[%s5626_s10 + $0x3b0] sm:$0xff] %v1048_v22  ;;  %1051 = vst [vmem:[%s5626_s10 + $0x3b8] sm:$0xff] %v1050_v23  ;;  %v1052_v24 = vld [vmem:[%s5621_s11 + $0x780] sm:$0xff]  ;;  %v1054_v25 = vld [vmem:[%s5621_s11 + $0x790] sm:$0xff] }
  0xa1   : > { %v1056_v26 = vld [vmem:[%s5621_s11 + $0x7a0] sm:$0xff]  ;;  %1053 = vst [vmem:[%s5626_s10 + $0x3c0] sm:$0xff] %v1052_v24  ;;  %1055 = vst [vmem:[%s5626_s10 + $0x3c8] sm:$0xff] %v1054_v25  ;;  %v1058_v27 = vld [vmem:[%s5621_s11 + $0x7b0] sm:$0xff] }
  0xa2   : > { %1057 = vst [vmem:[%s5626_s10 + $0x3d0] sm:$0xff] %v1056_v26  ;;  %v1060_v28 = vld [vmem:[%s5621_s11 + $0x7c0] sm:$0xff]  ;;  %v1062_v29 = vld [vmem:[%s5621_s11 + $0x7d0] sm:$0xff]  ;;  %1059 = vst [vmem:[%s5626_s10 + $0x3d8] sm:$0xff] %v1058_v27 }
  0xa3   : > { %1061 = vst [vmem:[%s5626_s10 + $0x3e0] sm:$0xff] %v1060_v28  ;;  %1063 = vst [vmem:[%s5626_s10 + $0x3e8] sm:$0xff] %v1062_v29  ;;  %v1064_v30 = vld [vmem:[%s5621_s11 + $0x7e0] sm:$0xff]  ;;  %v1066_v31 = vld [vmem:[%s5621_s11 + $0x7f0] sm:$0xff] }
  0xa4   : > { %v1068_v32 = vld [vmem:[%s5621_s11 + $0x800] sm:$0xff]  ;;  %1065 = vst [vmem:[%s5626_s10 + $0x3f0] sm:$0xff] %v1064_v30  ;;  %1067 = vst [vmem:[%s5626_s10 + $0x3f8] sm:$0xff] %v1066_v31  ;;  %v1070_v33 = vld [vmem:[%s5621_s11 + $0x810] sm:$0xff] }
  0xa5   : > { %1069 = vst [vmem:[%s5626_s10 + $0x400] sm:$0xff] %v1068_v32  ;;  %v1072_v34 = vld [vmem:[%s5621_s11 + $0x820] sm:$0xff]  ;;  %v1074_v35 = vld [vmem:[%s5621_s11 + $0x830] sm:$0xff]  ;;  %1071 = vst [vmem:[%s5626_s10 + $0x408] sm:$0xff] %v1070_v33 }
  0xa6   : > { %1073 = vst [vmem:[%s5626_s10 + $0x410] sm:$0xff] %v1072_v34  ;;  %1075 = vst [vmem:[%s5626_s10 + $0x418] sm:$0xff] %v1074_v35  ;;  %v1076_v36 = vld [vmem:[%s5621_s11 + $0x840] sm:$0xff]  ;;  %v1078_v37 = vld [vmem:[%s5621_s11 + $0x850] sm:$0xff] }
  0xa7   : > { %v1080_v38 = vld [vmem:[%s5621_s11 + $0x860] sm:$0xff]  ;;  %1077 = vst [vmem:[%s5626_s10 + $0x420] sm:$0xff] %v1076_v36  ;;  %1079 = vst [vmem:[%s5626_s10 + $0x428] sm:$0xff] %v1078_v37  ;;  %v1082_v39 = vld [vmem:[%s5621_s11 + $0x870] sm:$0xff] }
  0xa8   : > { %1081 = vst [vmem:[%s5626_s10 + $0x430] sm:$0xff] %v1080_v38  ;;  %v1084_v40 = vld [vmem:[%s5621_s11 + $0x880] sm:$0xff]  ;;  %v1086_v41 = vld [vmem:[%s5621_s11 + $0x890] sm:$0xff]  ;;  %1083 = vst [vmem:[%s5626_s10 + $0x438] sm:$0xff] %v1082_v39 }
  0xa9   : > { %1085 = vst [vmem:[%s5626_s10 + $0x440] sm:$0xff] %v1084_v40  ;;  %1087 = vst [vmem:[%s5626_s10 + $0x448] sm:$0xff] %v1086_v41  ;;  %v1088_v42 = vld [vmem:[%s5621_s11 + $0x8a0] sm:$0xff]  ;;  %v1090_v43 = vld [vmem:[%s5621_s11 + $0x8b0] sm:$0xff] }
  0xaa   : > { %v1092_v44 = vld [vmem:[%s5621_s11 + $0x8c0] sm:$0xff]  ;;  %1089 = vst [vmem:[%s5626_s10 + $0x450] sm:$0xff] %v1088_v42  ;;  %1091 = vst [vmem:[%s5626_s10 + $0x458] sm:$0xff] %v1090_v43  ;;  %v1094_v45 = vld [vmem:[%s5621_s11 + $0x8d0] sm:$0xff] }
  0xab   : > { %1093 = vst [vmem:[%s5626_s10 + $0x460] sm:$0xff] %v1092_v44  ;;  %v1096_v46 = vld [vmem:[%s5621_s11 + $0x8e0] sm:$0xff]  ;;  %v1098_v47 = vld [vmem:[%s5621_s11 + $0x8f0] sm:$0xff]  ;;  %1095 = vst [vmem:[%s5626_s10 + $0x468] sm:$0xff] %v1094_v45 }
  0xac   : > { %1097 = vst [vmem:[%s5626_s10 + $0x470] sm:$0xff] %v1096_v46  ;;  %1099 = vst [vmem:[%s5626_s10 + $0x478] sm:$0xff] %v1098_v47  ;;  %v1100_v48 = vld [vmem:[%s5621_s11 + $0x900] sm:$0xff]  ;;  %v1102_v49 = vld [vmem:[%s5621_s11 + $0x910] sm:$0xff] }
  0xad   : > { %v1104_v50 = vld [vmem:[%s5621_s11 + $0x920] sm:$0xff]  ;;  %1101 = vst [vmem:[%s5626_s10 + $0x480] sm:$0xff] %v1100_v48  ;;  %1103 = vst [vmem:[%s5626_s10 + $0x488] sm:$0xff] %v1102_v49  ;;  %v1106_v51 = vld [vmem:[%s5621_s11 + $0x930] sm:$0xff] }
  0xae   : > { %1105 = vst [vmem:[%s5626_s10 + $0x490] sm:$0xff] %v1104_v50  ;;  %v1108_v52 = vld [vmem:[%s5621_s11 + $0x940] sm:$0xff]  ;;  %v1110_v53 = vld [vmem:[%s5621_s11 + $0x950] sm:$0xff]  ;;  %1107 = vst [vmem:[%s5626_s10 + $0x498] sm:$0xff] %v1106_v51 }
  0xaf   : > { %1109 = vst [vmem:[%s5626_s10 + $0x4a0] sm:$0xff] %v1108_v52  ;;  %1111 = vst [vmem:[%s5626_s10 + $0x4a8] sm:$0xff] %v1110_v53  ;;  %v1112_v54 = vld [vmem:[%s5621_s11 + $0x960] sm:$0xff]  ;;  %v1114_v55 = vld [vmem:[%s5621_s11 + $0x970] sm:$0xff] }
  0xb0   : > { %v1116_v56 = vld [vmem:[%s5621_s11 + $0x980] sm:$0xff]  ;;  %1113 = vst [vmem:[%s5626_s10 + $0x4b0] sm:$0xff] %v1112_v54  ;;  %1115 = vst [vmem:[%s5626_s10 + $0x4b8] sm:$0xff] %v1114_v55  ;;  %v1118_v57 = vld [vmem:[%s5621_s11 + $0x990] sm:$0xff] }
  0xb1   : > { %1117 = vst [vmem:[%s5626_s10 + $0x4c0] sm:$0xff] %v1116_v56  ;;  %v1120_v58 = vld [vmem:[%s5621_s11 + $0x9a0] sm:$0xff]  ;;  %v1122_v59 = vld [vmem:[%s5621_s11 + $0x9b0] sm:$0xff]  ;;  %1119 = vst [vmem:[%s5626_s10 + $0x4c8] sm:$0xff] %v1118_v57 }
  0xb2   : > { %1121 = vst [vmem:[%s5626_s10 + $0x4d0] sm:$0xff] %v1120_v58  ;;  %1123 = vst [vmem:[%s5626_s10 + $0x4d8] sm:$0xff] %v1122_v59  ;;  %v1124_v60 = vld [vmem:[%s5621_s11 + $0x9c0] sm:$0xff]  ;;  %v1126_v61 = vld [vmem:[%s5621_s11 + $0x9d0] sm:$0xff] }
  0xb3   : > { %v1128_v62 = vld [vmem:[%s5621_s11 + $0x9e0] sm:$0xff]  ;;  %1125 = vst [vmem:[%s5626_s10 + $0x4e0] sm:$0xff] %v1124_v60  ;;  %1127 = vst [vmem:[%s5626_s10 + $0x4e8] sm:$0xff] %v1126_v61  ;;  %v1130_v63 = vld [vmem:[%s5621_s11 + $0x9f0] sm:$0xff] }
  0xb4   : > { %1129 = vst [vmem:[%s5626_s10 + $0x4f0] sm:$0xff] %v1128_v62  ;;  %v1132_v0 = vld [vmem:[%s5621_s11 + $0xa00] sm:$0xff]  ;;  %v1134_v1 = vld [vmem:[%s5621_s11 + $0xa10] sm:$0xff]  ;;  %1131 = vst [vmem:[%s5626_s10 + $0x4f8] sm:$0xff] %v1130_v63 }
  0xb5   : > { %1133 = vst [vmem:[%s5626_s10 + $0x500] sm:$0xff] %v1132_v0  ;;  %1135 = vst [vmem:[%s5626_s10 + $0x508] sm:$0xff] %v1134_v1  ;;  %v1136_v2 = vld [vmem:[%s5621_s11 + $0xa20] sm:$0xff]  ;;  %v1138_v3 = vld [vmem:[%s5621_s11 + $0xa30] sm:$0xff] }
  0xb6   : > { %v1140_v4 = vld [vmem:[%s5621_s11 + $0xa40] sm:$0xff]  ;;  %1137 = vst [vmem:[%s5626_s10 + $0x510] sm:$0xff] %v1136_v2  ;;  %1139 = vst [vmem:[%s5626_s10 + $0x518] sm:$0xff] %v1138_v3  ;;  %v1142_v5 = vld [vmem:[%s5621_s11 + $0xa50] sm:$0xff] }
  0xb7   : > { %1141 = vst [vmem:[%s5626_s10 + $0x520] sm:$0xff] %v1140_v4  ;;  %v1144_v6 = vld [vmem:[%s5621_s11 + $0xa60] sm:$0xff]  ;;  %v1146_v7 = vld [vmem:[%s5621_s11 + $0xa70] sm:$0xff]  ;;  %1143 = vst [vmem:[%s5626_s10 + $0x528] sm:$0xff] %v1142_v5 }
  0xb8   : > { %1145 = vst [vmem:[%s5626_s10 + $0x530] sm:$0xff] %v1144_v6  ;;  %1147 = vst [vmem:[%s5626_s10 + $0x538] sm:$0xff] %v1146_v7  ;;  %v1148_v8 = vld [vmem:[%s5621_s11 + $0xa80] sm:$0xff]  ;;  %v1150_v9 = vld [vmem:[%s5621_s11 + $0xa90] sm:$0xff] }
  0xb9   : > { %v1152_v10 = vld [vmem:[%s5621_s11 + $0xaa0] sm:$0xff]  ;;  %1149 = vst [vmem:[%s5626_s10 + $0x540] sm:$0xff] %v1148_v8  ;;  %1151 = vst [vmem:[%s5626_s10 + $0x548] sm:$0xff] %v1150_v9  ;;  %v1154_v11 = vld [vmem:[%s5621_s11 + $0xab0] sm:$0xff] }
  0xba   : > { %1153 = vst [vmem:[%s5626_s10 + $0x550] sm:$0xff] %v1152_v10  ;;  %v1156_v12 = vld [vmem:[%s5621_s11 + $0xac0] sm:$0xff]  ;;  %v1158_v13 = vld [vmem:[%s5621_s11 + $0xad0] sm:$0xff]  ;;  %1155 = vst [vmem:[%s5626_s10 + $0x558] sm:$0xff] %v1154_v11 }
  0xbb   : > { %1157 = vst [vmem:[%s5626_s10 + $0x560] sm:$0xff] %v1156_v12  ;;  %1159 = vst [vmem:[%s5626_s10 + $0x568] sm:$0xff] %v1158_v13  ;;  %v1160_v14 = vld [vmem:[%s5621_s11 + $0xae0] sm:$0xff]  ;;  %v1162_v15 = vld [vmem:[%s5621_s11 + $0xaf0] sm:$0xff] }
  0xbc   : > { %v1164_v16 = vld [vmem:[%s5621_s11 + $0xb00] sm:$0xff]  ;;  %1161 = vst [vmem:[%s5626_s10 + $0x570] sm:$0xff] %v1160_v14  ;;  %1163 = vst [vmem:[%s5626_s10 + $0x578] sm:$0xff] %v1162_v15  ;;  %v1166_v17 = vld [vmem:[%s5621_s11 + $0xb10] sm:$0xff] }
  0xbd   : > { %1165 = vst [vmem:[%s5626_s10 + $0x580] sm:$0xff] %v1164_v16  ;;  %v1168_v18 = vld [vmem:[%s5621_s11 + $0xb20] sm:$0xff]  ;;  %v1170_v19 = vld [vmem:[%s5621_s11 + $0xb30] sm:$0xff]  ;;  %1167 = vst [vmem:[%s5626_s10 + $0x588] sm:$0xff] %v1166_v17 }
  0xbe   : > { %1169 = vst [vmem:[%s5626_s10 + $0x590] sm:$0xff] %v1168_v18  ;;  %1171 = vst [vmem:[%s5626_s10 + $0x598] sm:$0xff] %v1170_v19  ;;  %v1172_v20 = vld [vmem:[%s5621_s11 + $0xb40] sm:$0xff]  ;;  %v1174_v21 = vld [vmem:[%s5621_s11 + $0xb50] sm:$0xff] }
  0xbf   : > { %v1176_v22 = vld [vmem:[%s5621_s11 + $0xb60] sm:$0xff]  ;;  %1173 = vst [vmem:[%s5626_s10 + $0x5a0] sm:$0xff] %v1172_v20  ;;  %1175 = vst [vmem:[%s5626_s10 + $0x5a8] sm:$0xff] %v1174_v21  ;;  %v1178_v23 = vld [vmem:[%s5621_s11 + $0xb70] sm:$0xff] }
  0xc0   : > { %1177 = vst [vmem:[%s5626_s10 + $0x5b0] sm:$0xff] %v1176_v22  ;;  %v1180_v24 = vld [vmem:[%s5621_s11 + $0xb80] sm:$0xff]  ;;  %v1182_v25 = vld [vmem:[%s5621_s11 + $0xb90] sm:$0xff]  ;;  %1179 = vst [vmem:[%s5626_s10 + $0x5b8] sm:$0xff] %v1178_v23 }
  0xc1   : > { %1181 = vst [vmem:[%s5626_s10 + $0x5c0] sm:$0xff] %v1180_v24  ;;  %1183 = vst [vmem:[%s5626_s10 + $0x5c8] sm:$0xff] %v1182_v25  ;;  %v1184_v26 = vld [vmem:[%s5621_s11 + $0xba0] sm:$0xff]  ;;  %v1186_v27 = vld [vmem:[%s5621_s11 + $0xbb0] sm:$0xff] }
  0xc2   : > { %v1188_v28 = vld [vmem:[%s5621_s11 + $0xbc0] sm:$0xff]  ;;  %1185 = vst [vmem:[%s5626_s10 + $0x5d0] sm:$0xff] %v1184_v26  ;;  %1187 = vst [vmem:[%s5626_s10 + $0x5d8] sm:$0xff] %v1186_v27  ;;  %v1190_v29 = vld [vmem:[%s5621_s11 + $0xbd0] sm:$0xff] }
  0xc3   : > { %1189 = vst [vmem:[%s5626_s10 + $0x5e0] sm:$0xff] %v1188_v28  ;;  %v1192_v30 = vld [vmem:[%s5621_s11 + $0xbe0] sm:$0xff]  ;;  %v1194_v31 = vld [vmem:[%s5621_s11 + $0xbf0] sm:$0xff]  ;;  %1191 = vst [vmem:[%s5626_s10 + $0x5e8] sm:$0xff] %v1190_v29 }
  0xc4   : > { %1193 = vst [vmem:[%s5626_s10 + $0x5f0] sm:$0xff] %v1192_v30  ;;  %1195 = vst [vmem:[%s5626_s10 + $0x5f8] sm:$0xff] %v1194_v31 }
  0xc5 PF: > { %p4210_p0 = scmp.ge.s32.totalorder %s5283_s25, 1  ;;  %p1216_p1 = scmp.lt.s32.totalorder %s5283_s25, 7 }
  0xc7   : > { %p1217_p2 = pnand %p4210_p0, %p1216_p1 }
  0xc8   : > { %s1223_s0 = sand.u32 (!%p1217_p2), 1, %s5259_s19   ;;  %s1230_s28 = sand.u32 (!%p1217_p2), 1, %s5251_s17  }
  0xc9   : > { %1220 = sbr.rel (%p1217_p2) target bundleno = 730 (0x2da), region = 89  ;;  %s1263_s5 = sand.u32 (!%p1217_p2), 1, %s5243_s15  }
  0xca   : > { %s4674_s26 = smul.u32 (!%p1217_p2), 768, %s1223_s0  ;;  %s4211_s30 = sshll.u32 (!%p1217_p2), %s1263_s5, 8 }
  0xcb   : > { %s4675_s29 = smul.u32 (!%p1217_p2), 1536, %s1230_s28  ;;  %s4212_s8 = sshll.u32 (!%p1217_p2), %s5271_s22, 1 }
  0xcc   : > { %p1270_p3 = scmp.lt.s32.totalorder (!%p1217_p2), %s4212_s8, 3  ;;  %s6025_s19 = scalar_lea.vmem (!%p1217_p2), [#allocation2], %s4674_s26 }
  0xcd   : > { %s6027_s17 = scalar_lea.vmem (!%p1217_p2), [#allocation3], %s4675_s29  ;;  %s6029_s15 = scalar_lea.vmem (!%p1217_p2), [#allocation4], %s4211_s30 }
  0xce   : > { %p4214_p4 = scmp.ne.s32.totalorder (!%p1217_p2), %s5267_s21, 0 }
  0xd0   : > { %s6703_s8 = smov (!%p1270_p3, %s4212_s8), 3  ;;  %1283 = sbr.rel (%p4214_p4) target bundleno = 226 (0xe2), region = 101 }
  0xd1   : > { %s1272_s11 = scalar_lea.vmem %s6670_s2, %s6703_s8  ;;  %s1277_s27 = scalar_lea.vmem %s6671_s3, %s6703_s8  ;;  %v5285_v32 = vmov (!%p4214_p4), 0.0  }
  0xd2   : > { %1284 = vst [vmem:[%s6029_s15] sm:$0xff] (!%p4214_p4), %v5285_v32  ;;  %1285 = vst [vmem:[%s6029_s15 + $0x8] sm:$0xff] (!%p4214_p4), %v5285_v32 }
  0xd3   : > { %1286 = vst [vmem:[%s6029_s15 + $0x10] sm:$0xff] (!%p4214_p4), %v5285_v32  ;;  %1287 = vst [vmem:[%s6029_s15 + $0x18] sm:$0xff] (!%p4214_p4), %v5285_v32 }
  0xd4   : > { %1288 = vst [vmem:[%s6029_s15 + $0x20] sm:$0xff] (!%p4214_p4), %v5285_v32  ;;  %1289 = vst [vmem:[%s6029_s15 + $0x28] sm:$0xff] (!%p4214_p4), %v5285_v32 }
  0xd5   : > { %1290 = vst [vmem:[%s6029_s15 + $0x30] sm:$0xff] (!%p4214_p4), %v5285_v32  ;;  %1291 = vst [vmem:[%s6029_s15 + $0x38] sm:$0xff] (!%p4214_p4), %v5285_v32 }
  0xd6   : > { %1292 = vst [vmem:[%s6029_s15 + $0x40] sm:$0xff] (!%p4214_p4), %v5285_v32  ;;  %1293 = vst [vmem:[%s6029_s15 + $0x48] sm:$0xff] (!%p4214_p4), %v5285_v32 }
  0xd7   : > { %1294 = vst [vmem:[%s6029_s15 + $0x50] sm:$0xff] %v5285_v32  ;;  %1295 = vst [vmem:[%s6029_s15 + $0x58] sm:$0xff] %v5285_v32 }
  0xd8   : > { %1296 = vst [vmem:[%s6029_s15 + $0x60] sm:$0xff] %v5285_v32  ;;  %1297 = vst [vmem:[%s6029_s15 + $0x68] sm:$0xff] %v5285_v32 }
  0xd9   : > { %1298 = vst [vmem:[%s6029_s15 + $0x70] sm:$0xff] %v5285_v32  ;;  %1299 = vst [vmem:[%s6029_s15 + $0x78] sm:$0xff] %v5285_v32 }
  0xda   : > { %1300 = vst [vmem:[%s6029_s15 + $0x80] sm:$0xff] %v5285_v32  ;;  %1301 = vst [vmem:[%s6029_s15 + $0x88] sm:$0xff] %v5285_v32 }
  0xdb   : > { %1302 = vst [vmem:[%s6029_s15 + $0x90] sm:$0xff] %v5285_v32  ;;  %1303 = vst [vmem:[%s6029_s15 + $0x98] sm:$0xff] %v5285_v32 }
  0xdc   : > { %1304 = vst [vmem:[%s6029_s15 + $0xa0] sm:$0xff] %v5285_v32  ;;  %1305 = vst [vmem:[%s6029_s15 + $0xa8] sm:$0xff] %v5285_v32 }
  0xdd   : > { %1306 = vst [vmem:[%s6029_s15 + $0xb0] sm:$0xff] %v5285_v32  ;;  %1307 = vst [vmem:[%s6029_s15 + $0xb8] sm:$0xff] %v5285_v32 }
  0xde   : > { %1308 = vst [vmem:[%s6029_s15 + $0xc0] sm:$0xff] %v5285_v32  ;;  %1309 = vst [vmem:[%s6029_s15 + $0xc8] sm:$0xff] %v5285_v32 }
  0xdf   : > { %1310 = vst [vmem:[%s6029_s15 + $0xd0] sm:$0xff] %v5285_v32  ;;  %1311 = vst [vmem:[%s6029_s15 + $0xd8] sm:$0xff] %v5285_v32 }
  0xe0   : > { %1312 = vst [vmem:[%s6029_s15 + $0xe0] sm:$0xff] %v5285_v32  ;;  %1313 = vst [vmem:[%s6029_s15 + $0xe8] sm:$0xff] %v5285_v32 }
  0xe1   : > { %1314 = vst [vmem:[%s6029_s15 + $0xf0] sm:$0xff] %v5285_v32  ;;  %1315 = vst [vmem:[%s6029_s15 + $0xf8] sm:$0xff] %v5285_v32 }
  0xe2 PF: > { %v4765_v33 = vld [vmem:[%s6027_s17 + $0x4] ss:$8 sps:$4 sm:$0xff]   ;;  %v4769_v35 = vld [vmem:[%s6027_s17] ss:$8 sps:$4 sm:$0xff]   ;;  %v4771_v37 = vld [vmem:[%s6027_s17 + $0x14] ss:$8 sps:$4 sm:$0xff]  }
  0xe3   : > { %v4767_v34 = vld [vmem:[%s6027_s17 + $0x304] ss:$8 sps:$4 sm:$0xff]   ;;  %3076 = vmatprep.subr.bf16.mxu1 %v4765_v33  ;;  %v4770_v36 = vld [vmem:[%s6027_s17 + $0x300] ss:$8 sps:$4 sm:$0xff]   ;;  %v4773_v38 = vld [vmem:[%s6027_s17 + $0x314] ss:$8 sps:$4 sm:$0xff]  }
  0xe4   : > { %3415 = vmatprep.subr.bf16.mxu0 %v4767_v34  ;;  %3077 = vmatpush1.bf16.msra.mxu1 %v4769_v35  ;;  %v4775_v39 = vld [vmem:[%s6027_s17 + $0x10] ss:$8 sps:$4 sm:$0xff]   ;;  %v4777_v41 = vld [vmem:[%s6027_s17 + $0x24] ss:$8 sps:$4 sm:$0xff]   ;;  %v4781_v43 = vld [vmem:[%s6027_s17 + $0x20] ss:$8 sps:$4 sm:$0xff]  }
  0xe5   : > { %3416 = vmatpush1.bf16.msra.mxu0 %v4770_v36  ;;  %3078 = vmatprep.subr.bf16.mxu1 %v4771_v37  ;;  %v4776_v40 = vld [vmem:[%s6027_s17 + $0x310] ss:$8 sps:$4 sm:$0xff]   ;;  %v4779_v42 = vld [vmem:[%s6027_s17 + $0x324] ss:$8 sps:$4 sm:$0xff]   ;;  %v4782_v44 = vld [vmem:[%s6027_s17 + $0x320] ss:$8 sps:$4 sm:$0xff]  }
  0xe6   : > { %3417 = vmatprep.subr.bf16.mxu0 %v4773_v38  ;;  %v4783_v45 = vld [vmem:[%s6027_s17 + $0x34] ss:$8 sps:$4 sm:$0xff]   ;;  %v4787_v47 = vld [vmem:[%s6027_s17 + $0x30] ss:$8 sps:$4 sm:$0xff]   ;;  %v4789_v49 = vld [vmem:[%s6027_s17 + $0x44] ss:$8 sps:$4 sm:$0xff]  }
  0xe7   : > { %v4785_v46 = vld [vmem:[%s6027_s17 + $0x334] ss:$8 sps:$4 sm:$0xff]   ;;  %v4788_v48 = vld [vmem:[%s6027_s17 + $0x330] ss:$8 sps:$4 sm:$0xff]   ;;  %v4791_v50 = vld [vmem:[%s6027_s17 + $0x344] ss:$8 sps:$4 sm:$0xff]  }
  0xe8   : > { %3079 = vmatpush1.bf16.msra.mxu1 %v4775_v39  ;;  %v4793_v51 = vld [vmem:[%s6027_s17 + $0x40] ss:$8 sps:$4 sm:$0xff]   ;;  %v4795_v53 = vld [vmem:[%s6027_s17 + $0x54] ss:$8 sps:$4 sm:$0xff]   ;;  %v4799_v55 = vld [vmem:[%s6027_s17 + $0x50] ss:$8 sps:$4 sm:$0xff]  }
  0xe9   : > { %3418 = vmatpush1.bf16.msra.mxu0 %v4776_v40  ;;  %3080 = vmatprep.subr.bf16.mxu1 %v4777_v41  ;;  %v4794_v52 = vld [vmem:[%s6027_s17 + $0x340] ss:$8 sps:$4 sm:$0xff]   ;;  %v4797_v54 = vld [vmem:[%s6027_s17 + $0x354] ss:$8 sps:$4 sm:$0xff]   ;;  %v4800_v56 = vld [vmem:[%s6027_s17 + $0x350] ss:$8 sps:$4 sm:$0xff]  }
  0xea   : > { %3419 = vmatprep.subr.bf16.mxu0 %v4779_v42  ;;  %v4801_v57 = vld [vmem:[%s6027_s17 + $0x64] ss:$8 sps:$4 sm:$0xff]   ;;  %v4805_v59 = vld [vmem:[%s6027_s17 + $0x60] ss:$8 sps:$4 sm:$0xff]   ;;  %v4807_v61 = vld [vmem:[%s6027_s17 + $0x74] ss:$8 sps:$4 sm:$0xff]  }
  0xeb   : > { %v4803_v58 = vld [vmem:[%s6027_s17 + $0x364] ss:$8 sps:$4 sm:$0xff]   ;;  %v4806_v60 = vld [vmem:[%s6027_s17 + $0x360] ss:$8 sps:$4 sm:$0xff]   ;;  %v4809_v62 = vld [vmem:[%s6027_s17 + $0x374] ss:$8 sps:$4 sm:$0xff]  }
  0xec   : > { %3081 = vmatpush1.bf16.msra.mxu1 %v4781_v43  ;;  %v4811_v63 = vld [vmem:[%s6027_s17 + $0x70] ss:$8 sps:$4 sm:$0xff]   ;;  %v4813_v1 = vld [vmem:[%s6027_s17 + $0x84] ss:$8 sps:$4 sm:$0xff]   ;;  %v4817_v3 = vld [vmem:[%s6027_s17 + $0x80] ss:$8 sps:$4 sm:$0xff]  }
  0xed   : > { %3420 = vmatpush1.bf16.msra.mxu0 %v4782_v44  ;;  %3082 = vmatprep.subr.bf16.mxu1 %v4783_v45  ;;  %v4812_v0 = vld [vmem:[%s6027_s17 + $0x370] ss:$8 sps:$4 sm:$0xff]   ;;  %v4815_v2 = vld [vmem:[%s6027_s17 + $0x384] ss:$8 sps:$4 sm:$0xff]   ;;  %v4818_v4 = vld [vmem:[%s6027_s17 + $0x380] ss:$8 sps:$4 sm:$0xff]  }
  0xee   : > { %3421 = vmatprep.subr.bf16.mxu0 %v4785_v46  ;;  %v4819_v5 = vld [vmem:[%s6027_s17 + $0x94] ss:$8 sps:$4 sm:$0xff]   ;;  %v4823_v7 = vld [vmem:[%s6027_s17 + $0x90] ss:$8 sps:$4 sm:$0xff]   ;;  %v4825_v9 = vld [vmem:[%s6027_s17 + $0xa4] ss:$8 sps:$4 sm:$0xff]  }
  0xef   : > { %v4821_v6 = vld [vmem:[%s6027_s17 + $0x394] ss:$8 sps:$4 sm:$0xff]   ;;  %v4824_v8 = vld [vmem:[%s6027_s17 + $0x390] ss:$8 sps:$4 sm:$0xff]   ;;  %v4827_v10 = vld [vmem:[%s6027_s17 + $0x3a4] ss:$8 sps:$4 sm:$0xff]  }
  0xf0   : > { %3083 = vmatpush1.bf16.msra.mxu1 %v4787_v47  ;;  %v4829_v11 = vld [vmem:[%s6027_s17 + $0xa0] ss:$8 sps:$4 sm:$0xff]   ;;  %v4831_v13 = vld [vmem:[%s6027_s17 + $0xb4] ss:$8 sps:$4 sm:$0xff]   ;;  %v4835_v15 = vld [vmem:[%s6027_s17 + $0xb0] ss:$8 sps:$4 sm:$0xff]  }
  0xf1   : > { %3422 = vmatpush1.bf16.msra.mxu0 %v4788_v48  ;;  %3084 = vmatprep.subr.bf16.mxu1 %v4789_v49  ;;  %v4830_v12 = vld [vmem:[%s6027_s17 + $0x3a0] ss:$8 sps:$4 sm:$0xff]   ;;  %v4833_v14 = vld [vmem:[%s6027_s17 + $0x3b4] ss:$8 sps:$4 sm:$0xff]   ;;  %v4836_v16 = vld [vmem:[%s6027_s17 + $0x3b0] ss:$8 sps:$4 sm:$0xff]  }
  0xf2   : > { %3423 = vmatprep.subr.bf16.mxu0 %v4791_v50  ;;  %v4837_v17 = vld [vmem:[%s6027_s17 + $0xc4] ss:$8 sps:$4 sm:$0xff]   ;;  %v4841_v21 = vld [vmem:[%s6027_s17 + $0xc0] ss:$8 sps:$4 sm:$0xff]   ;;  %v4843_v23 = vld [vmem:[%s6027_s17 + $0xd4] ss:$8 sps:$4 sm:$0xff]  }
  0xf3   : > { %v4863_v18 = vld [vmem:[%s6025_s19 + $0x4] ss:$48 sps:$4 sm:$0xff]   ;;  %v4866_v20 = vld [vmem:[%s6025_s19 + $0x1c] ss:$48 sps:$4 sm:$0xff]   ;;  %v4842_v22 = vld [vmem:[%s6027_s17 + $0x3c0] ss:$8 sps:$4 sm:$0xff]  }
  0xf4   : > { %3085 = vmatpush1.bf16.msra.mxu1 %v4793_v51  ;;  %v4839_v19 = vld [vmem:[%s6027_s17 + $0x3c4] ss:$8 sps:$4 sm:$0xff]   ;;  %3108 = vmatprep.mubr.bf16.mxu1 %v4863_v18  ;;  %v4845_v24 = vld [vmem:[%s6027_s17 + $0x3d4] ss:$8 sps:$4 sm:$0xff]   ;;  %v4847_v25 = vld [vmem:[%s6027_s17 + $0xd0] ss:$8 sps:$4 sm:$0xff]  }
  0xf5   : > { %3424 = vmatpush1.bf16.msra.mxu0 %v4794_v52  ;;  %3086 = vmatprep.subr.bf16.mxu1 %v4795_v53  ;;  %v4848_v26 = vld [vmem:[%s6027_s17 + $0x3d0] ss:$8 sps:$4 sm:$0xff]   ;;  %v4849_v27 = vld [vmem:[%s6027_s17 + $0xe4] ss:$8 sps:$4 sm:$0xff]   ;;  %v4853_v29 = vld [vmem:[%s6027_s17 + $0xe0] ss:$8 sps:$4 sm:$0xff]  }
  0xf6   : > { %3425 = vmatprep.subr.bf16.mxu0 %v4797_v54  ;;  %3447 = vmatprep.mubr.bf16.mxu0 %v4866_v20  ;;  %v4851_v28 = vld [vmem:[%s6027_s17 + $0x3e4] ss:$8 sps:$4 sm:$0xff]   ;;  %v4854_v30 = vld [vmem:[%s6027_s17 + $0x3e0] ss:$8 sps:$4 sm:$0xff]   ;;  %v4855_v31 = vld [vmem:[%s6027_s17 + $0xf4] ss:$8 sps:$4 sm:$0xff]  }
  0xf7   : > { %v4857_v32 = vld [vmem:[%s6027_s17 + $0x3f4] ss:$8 sps:$4 sm:$0xff]   ;;  %v4859_v33 = vld [vmem:[%s6027_s17 + $0xf0] ss:$8 sps:$4 sm:$0xff]   ;;  %v4869_v35 = vld [vmem:[%s6027_s17 + $0x104] ss:$8 sps:$4 sm:$0xff]  }
  0xf8   : > { %3087 = vmatpush1.bf16.msra.mxu1 %v4799_v55  ;;  %v4860_v34 = vld [vmem:[%s6027_s17 + $0x3f0] ss:$8 sps:$4 sm:$0xff]   ;;  %v4872_v36 = vld [vmem:[%s6027_s17 + $0x404] ss:$8 sps:$4 sm:$0xff]   ;;  %v4867_v39 = vld [vmem:[%s6027_s17 + $0x100] ss:$8 sps:$4 sm:$0xff]  }
  0xf9   : > { %3426 = vmatpush1.bf16.msra.mxu0 %v4800_v56  ;;  %3088 = vmatprep.subr.bf16.mxu1 %v4801_v57  ;;  %v4861_v37 = vld [vmem:[%s6025_s19] ss:$48 sps:$4 sm:$0xff]   ;;  %v4864_v38 = vld [vmem:[%s6025_s19 + $0x18] ss:$48 sps:$4 sm:$0xff]   ;;  %v4875_v41 = vld [vmem:[%s6027_s17 + $0x114] ss:$8 sps:$4 sm:$0xff]  }
  0xfa   : > { %3427 = vmatprep.subr.bf16.mxu0 %v4803_v58  ;;  %v4870_v40 = vld [vmem:[%s6027_s17 + $0x400] ss:$8 sps:$4 sm:$0xff]   ;;  %v4878_v42 = vld [vmem:[%s6027_s17 + $0x414] ss:$8 sps:$4 sm:$0xff]   ;;  %v4873_v45 = vld [vmem:[%s6027_s17 + $0x110] ss:$8 sps:$4 sm:$0xff]  }
  0xfb   : > { %v4879_v43 = vld [vmem:[%s6025_s19 + $0x64] ss:$48 sps:$4 sm:$0xff]   ;;  %v4881_v44 = vld [vmem:[%s6025_s19 + $0x7c] ss:$48 sps:$4 sm:$0xff]   ;;  %v4876_v46 = vld [vmem:[%s6027_s17 + $0x410] ss:$8 sps:$4 sm:$0xff]  }
  0xfc   : > { %3089 = vmatpush1.bf16.msra.mxu1 %v4805_v59  ;;  %v4886_v47 = vld [vmem:[%s6027_s17 + $0x124] ss:$8 sps:$4 sm:$0xff]   ;;  %v4883_v49 = vld [vmem:[%s6025_s19 + $0x60] ss:$48 sps:$4 sm:$0xff]   ;;  %v4887_v51 = vld [vmem:[%s6025_s19 + $0x78] ss:$48 sps:$4 sm:$0xff]  }
  0xfd   : > { %3428 = vmatpush1.bf16.msra.mxu0 %v4806_v60  ;;  %3090 = vmatprep.subr.bf16.mxu1 %v4807_v61  ;;  %v4890_v48 = vld [vmem:[%s6027_s17 + $0x424] ss:$8 sps:$4 sm:$0xff]   ;;  %v4884_v50 = vld [vmem:[%s6027_s17 + $0x120] ss:$8 sps:$4 sm:$0xff]   ;;  %v4893_v53 = vld [vmem:[%s6027_s17 + $0x134] ss:$8 sps:$4 sm:$0xff]  }
  0xfe   : > { %3429 = vmatprep.subr.bf16.mxu0 %v4809_v62  ;;  %v4888_v52 = vld [vmem:[%s6027_s17 + $0x420] ss:$8 sps:$4 sm:$0xff]   ;;  %v4896_v54 = vld [vmem:[%s6027_s17 + $0x434] ss:$8 sps:$4 sm:$0xff]   ;;  %v4891_v57 = vld [vmem:[%s6027_s17 + $0x130] ss:$8 sps:$4 sm:$0xff]  }
  0xff   : > { %v4897_v55 = vld [vmem:[%s6025_s19 + $0xc4] ss:$48 sps:$4 sm:$0xff]   ;;  %v4899_v56 = vld [vmem:[%s6025_s19 + $0xdc] ss:$48 sps:$4 sm:$0xff]   ;;  %v4894_v58 = vld [vmem:[%s6027_s17 + $0x430] ss:$8 sps:$4 sm:$0xff]  }
 0x100   : > { %3091 = vmatpush1.bf16.msra.mxu1 %v4811_v63  ;;  %v4904_v59 = vld [vmem:[%s6027_s17 + $0x144] ss:$8 sps:$4 sm:$0xff]   ;;  %v4901_v61 = vld [vmem:[%s6025_s19 + $0xc0] ss:$48 sps:$4 sm:$0xff]   ;;  %v4905_v63 = vld [vmem:[%s6025_s19 + $0xd8] ss:$48 sps:$4 sm:$0xff]  }
 0x101   : > { %3430 = vmatpush1.bf16.msra.mxu0 %v4812_v0  ;;  %3092 = vmatprep.subr.bf16.mxu1 %v4813_v1  ;;  %v4908_v60 = vld [vmem:[%s6027_s17 + $0x444] ss:$8 sps:$4 sm:$0xff]   ;;  %v4902_v62 = vld [vmem:[%s6027_s17 + $0x140] ss:$8 sps:$4 sm:$0xff]   ;;  %v4911_v1 = vld [vmem:[%s6027_s17 + $0x154] ss:$8 sps:$4 sm:$0xff]  }
 0x102   : > { %3431 = vmatprep.subr.bf16.mxu0 %v4815_v2  ;;  %v4906_v0 = vld [vmem:[%s6027_s17 + $0x440] ss:$8 sps:$4 sm:$0xff]   ;;  %v4914_v2 = vld [vmem:[%s6027_s17 + $0x454] ss:$8 sps:$4 sm:$0xff]   ;;  %v4930_v18 = vld [vmem:[%s6027_s17 + $0x470] ss:$8 sps:$4 sm:$0xff]  }
 0x103   : > { %v4944_v20 = vld [vmem:[%s6027_s17 + $0x484] ss:$8 sps:$4 sm:$0xff]   ;;  %p4503_p5 = scmp.ne.s32.totalorder %s5267_s21, 2 }
 0x104   : > { %3093 = vmatpush1.bf16.msra.mxu1 %v4817_v3  ;;  %v4915_v3 = vld [vmem:[%s6025_s19 + $0x124] ss:$48 sps:$4 sm:$0xff]  }
 0x105   : > { %3432 = vmatpush1.bf16.msra.mxu0 %v4818_v4  ;;  %3094 = vmatprep.subr.bf16.mxu1 %v4819_v5  ;;  %v4917_v4 = vld [vmem:[%s6025_s19 + $0x13c] ss:$48 sps:$4 sm:$0xff]   ;;  %v4909_v5 = vld [vmem:[%s6027_s17 + $0x150] ss:$8 sps:$4 sm:$0xff]  }
 0x106   : > { %3433 = vmatprep.subr.bf16.mxu0 %v4821_v6  ;;  %v4912_v6 = vld [vmem:[%s6027_s17 + $0x450] ss:$8 sps:$4 sm:$0xff]  }
 0x108   : > { %3095 = vmatpush1.bf16.msra.mxu1 %v4823_v7  ;;  %v4922_v7 = vld [vmem:[%s6027_s17 + $0x164] ss:$8 sps:$4 sm:$0xff]  }
 0x109   : > { %3434 = vmatpush1.bf16.msra.mxu0 %v4824_v8  ;;  %3096 = vmatprep.subr.bf16.mxu1 %v4825_v9  ;;  %v4926_v8 = vld [vmem:[%s6027_s17 + $0x464] ss:$8 sps:$4 sm:$0xff]   ;;  %v4919_v9 = vld [vmem:[%s6025_s19 + $0x120] ss:$48 sps:$4 sm:$0xff]  }
 0x10a   : > { %3435 = vmatprep.subr.bf16.mxu0 %v4827_v10  ;;  %v4920_v10 = vld [vmem:[%s6027_s17 + $0x160] ss:$8 sps:$4 sm:$0xff]  }
 0x10c   : > { %3097 = vmatpush1.bf16.msra.mxu1 %v4829_v11  ;;  %v4923_v11 = vld [vmem:[%s6025_s19 + $0x138] ss:$48 sps:$4 sm:$0xff]  }
 0x10d   : > { %3436 = vmatpush1.bf16.msra.mxu0 %v4830_v12  ;;  %3098 = vmatprep.subr.bf16.mxu1 %v4831_v13  ;;  %v4924_v12 = vld [vmem:[%s6027_s17 + $0x460] ss:$8 sps:$4 sm:$0xff]   ;;  %v4929_v13 = vld [vmem:[%s6027_s17 + $0x174] ss:$8 sps:$4 sm:$0xff]  }
 0x10e   : > { %3437 = vmatprep.subr.bf16.mxu0 %v4833_v14  ;;  %v4932_v14 = vld [vmem:[%s6027_s17 + $0x474] ss:$8 sps:$4 sm:$0xff]  }
 0x110   : > { %3099 = vmatpush1.bf16.msra.mxu1 %v4835_v15  ;;  %v4933_v15 = vld [vmem:[%s6025_s19 + $0x184] ss:$48 sps:$4 sm:$0xff]  }
 0x111   : > { %3438 = vmatpush1.bf16.msra.mxu0 %v4836_v16  ;;  %3100 = vmatprep.subr.bf16.mxu1 %v4837_v17  ;;  %v4935_v16 = vld [vmem:[%s6025_s19 + $0x19c] ss:$48 sps:$4 sm:$0xff]   ;;  %v4927_v17 = vld [vmem:[%s6027_s17 + $0x170] ss:$8 sps:$4 sm:$0xff]  }
 0x112   : > { %3439 = vmatprep.subr.bf16.mxu0 %v4839_v19  ;;  %v4940_v19 = vld [vmem:[%s6027_s17 + $0x184] ss:$8 sps:$4 sm:$0xff]  }
 0x114   : > { %3101 = vmatpush1.bf16.msra.mxu1 %v4841_v21  ;;  %v4937_v21 = vld [vmem:[%s6025_s19 + $0x180] ss:$48 sps:$4 sm:$0xff]  }
 0x115   : > { %3440 = vmatpush1.bf16.msra.mxu0 %v4842_v22  ;;  %3102 = vmatprep.subr.bf16.mxu1 %v4843_v23  ;;  %v4938_v22 = vld [vmem:[%s6027_s17 + $0x180] ss:$8 sps:$4 sm:$0xff]  }
 0x116   : > { %3441 = vmatprep.subr.bf16.mxu0 %v4845_v24  ;;  %v4941_v23 = vld [vmem:[%s6025_s19 + $0x198] ss:$48 sps:$4 sm:$0xff]  }
 0x117   : > { %v4942_v24 = vld [vmem:[%s6027_s17 + $0x480] ss:$8 sps:$4 sm:$0xff]  }
 0x118   : > { %3103 = vmatpush1.bf16.msra.mxu1 %v4847_v25  ;;  %v4947_v25 = vld [vmem:[%s6027_s17 + $0x194] ss:$8 sps:$4 sm:$0xff]  }
 0x119   : > { %3442 = vmatpush1.bf16.msra.mxu0 %v4848_v26  ;;  %3104 = vmatprep.subr.bf16.mxu1 %v4849_v27  ;;  %v4950_v26 = vld [vmem:[%s6027_s17 + $0x494] ss:$8 sps:$4 sm:$0xff]  }
 0x11a   : > { %3443 = vmatprep.subr.bf16.mxu0 %v4851_v28  ;;  %v4951_v27 = vld [vmem:[%s6025_s19 + $0x1e4] ss:$48 sps:$4 sm:$0xff]   ;;  %v4953_v28 = vld [vmem:[%s6025_s19 + $0x1fc] ss:$48 sps:$4 sm:$0xff]  }
 0x11c   : > { %3105 = vmatpush1.bf16.msra.mxu1 %v4853_v29  ;;  %v4945_v29 = vld [vmem:[%s6027_s17 + $0x190] ss:$8 sps:$4 sm:$0xff]  }
 0x11d   : > { %3444 = vmatpush1.bf16.msra.mxu0 %v4854_v30  ;;  %3106 = vmatprep.subr.bf16.mxu1 %v4855_v31  ;;  %v4948_v30 = vld [vmem:[%s6027_s17 + $0x490] ss:$8 sps:$4 sm:$0xff]   ;;  %v4958_v31 = vld [vmem:[%s6027_s17 + $0x1a4] ss:$8 sps:$4 sm:$0xff]  }
 0x11e   : > { %3445 = vmatprep.subr.bf16.mxu0 %v4857_v32  ;;  %v4962_v32 = vld [vmem:[%s6027_s17 + $0x4a4] ss:$8 sps:$4 sm:$0xff]  }
 0x120   : > { %3107 = vmatpush1.bf16.msra.mxu1 %v4859_v33  ;;  %v4955_v33 = vld [vmem:[%s6025_s19 + $0x1e0] ss:$48 sps:$4 sm:$0xff]  }
 0x121   : > { %3446 = vmatpush1.bf16.msra.mxu0 %v4860_v34  ;;  %3189 = vmatprep.subr.bf16.mxu1 %v4869_v35  ;;  %v4956_v34 = vld [vmem:[%s6027_s17 + $0x1a0] ss:$8 sps:$4 sm:$0xff]  }
 0x122   : > { %3528 = vmatprep.subr.bf16.mxu0 %v4872_v36  ;;  %v4959_v35 = vld [vmem:[%s6025_s19 + $0x1f8] ss:$48 sps:$4 sm:$0xff]  }
 0x123   : > { %3109 = vmatmul.mubr.bf16.vlgmr.msra.gmra.mrb[0].mxu1 %v4861_v37  ;;  %v4960_v36 = vld [vmem:[%s6027_s17 + $0x4a0] ss:$8 sps:$4 sm:$0xff]   ;;  %v4965_v37 = vld [vmem:[%s6027_s17 + $0x1b4] ss:$8 sps:$4 sm:$0xff]  }
 0x124   : > { %3448 = vmatmul.mubr.bf16.vlgmr.msra.gmra.mrb[0].mxu0 %v4864_v38  ;;  %3190 = vmatpush1.bf16.msra.mxu1 %v4867_v39  ;;  %v4968_v38 = vld [vmem:[%s6027_s17 + $0x4b4] ss:$8 sps:$4 sm:$0xff]  }
 0x125   : > { %3529 = vmatpush1.bf16.msra.mxu0 %v4870_v40  ;;  %3191 = vmatprep.subr.bf16.mxu1 %v4875_v41  ;;  %v4969_v39 = vld [vmem:[%s6025_s19 + $0x244] ss:$48 sps:$4 sm:$0xff]   ;;  %v4971_v40 = vld [vmem:[%s6025_s19 + $0x25c] ss:$48 sps:$4 sm:$0xff]   ;;  %v4963_v41 = vld [vmem:[%s6027_s17 + $0x1b0] ss:$8 sps:$4 sm:$0xff]  }
 0x126   : > { %3530 = vmatprep.subr.bf16.mxu0 %v4878_v42  ;;  %3118 = vmatprep.mubr.bf16.mxu1 %v4879_v43  ;;  %v4966_v42 = vld [vmem:[%s6027_s17 + $0x4b0] ss:$8 sps:$4 sm:$0xff]   ;;  %v4976_v43 = vld [vmem:[%s6027_s17 + $0x1c4] ss:$8 sps:$4 sm:$0xff]  }
 0x127   : > { %3457 = vmatprep.mubr.bf16.mxu0 %v4881_v44  ;;  %v4980_v44 = vld [vmem:[%s6027_s17 + $0x4c4] ss:$8 sps:$4 sm:$0xff]  }
 0x128   : > { %3192 = vmatpush1.bf16.msra.mxu1 %v4873_v45  ;;  %v4973_v45 = vld [vmem:[%s6025_s19 + $0x240] ss:$48 sps:$4 sm:$0xff]  }
 0x129   : > { %3531 = vmatpush1.bf16.msra.mxu0 %v4876_v46  ;;  %3193 = vmatprep.subr.bf16.mxu1 %v4886_v47  ;;  %v4974_v46 = vld [vmem:[%s6027_s17 + $0x1c0] ss:$8 sps:$4 sm:$0xff]  }
 0x12a   : > { %3532 = vmatprep.subr.bf16.mxu0 %v4890_v48  ;;  %v4977_v47 = vld [vmem:[%s6025_s19 + $0x258] ss:$48 sps:$4 sm:$0xff]  }
 0x12b   : > { %3119 = vmatmul.mubr.bf16.gmra.mrb[4].mxu1 %v4883_v49  ;;  %v4978_v48 = vld [vmem:[%s6027_s17 + $0x4c0] ss:$8 sps:$4 sm:$0xff]   ;;  %v4983_v49 = vld [vmem:[%s6027_s17 + $0x1d4] ss:$8 sps:$4 sm:$0xff]  }
 0x12c   : > { %3458 = vmatmul.mubr.bf16.gmra.mrb[4].mxu0 %v4887_v51  ;;  %3194 = vmatpush1.bf16.msra.mxu1 %v4884_v50  ;;  %v4986_v50 = vld [vmem:[%s6027_s17 + $0x4d4] ss:$8 sps:$4 sm:$0xff]  }
 0x12d   : > { %3533 = vmatpush1.bf16.msra.mxu0 %v4888_v52  ;;  %3195 = vmatprep.subr.bf16.mxu1 %v4893_v53  ;;  %v4987_v51 = vld [vmem:[%s6025_s19 + $0x2a4] ss:$48 sps:$4 sm:$0xff]   ;;  %v4989_v52 = vld [vmem:[%s6025_s19 + $0x2bc] ss:$48 sps:$4 sm:$0xff]   ;;  %v4981_v53 = vld [vmem:[%s6027_s17 + $0x1d0] ss:$8 sps:$4 sm:$0xff]  }
 0x12e   : > { %3534 = vmatprep.subr.bf16.mxu0 %v4896_v54  ;;  %3128 = vmatprep.mubr.bf16.mxu1 %v4897_v55  ;;  %v4984_v54 = vld [vmem:[%s6027_s17 + $0x4d0] ss:$8 sps:$4 sm:$0xff]   ;;  %v4994_v55 = vld [vmem:[%s6027_s17 + $0x1e4] ss:$8 sps:$4 sm:$0xff]  }
 0x12f   : > { %3467 = vmatprep.mubr.bf16.mxu0 %v4899_v56  ;;  %v4998_v56 = vld [vmem:[%s6027_s17 + $0x4e4] ss:$8 sps:$4 sm:$0xff]  }
 0x130   : > { %3196 = vmatpush1.bf16.msra.mxu1 %v4891_v57  ;;  %v4991_v57 = vld [vmem:[%s6025_s19 + $0x2a0] ss:$48 sps:$4 sm:$0xff]  }
 0x131   : > { %3535 = vmatpush1.bf16.msra.mxu0 %v4894_v58  ;;  %3197 = vmatprep.subr.bf16.mxu1 %v4904_v59  ;;  %v4992_v58 = vld [vmem:[%s6027_s17 + $0x1e0] ss:$8 sps:$4 sm:$0xff]  }
 0x132   : > { %3536 = vmatprep.subr.bf16.mxu0 %v4908_v60  ;;  %v4995_v59 = vld [vmem:[%s6025_s19 + $0x2b8] ss:$48 sps:$4 sm:$0xff]  }
 0x133   : > { %3129 = vmatmul.mubr.bf16.gmra.mrb[8].mxu1 %v4901_v61  ;;  %v4996_v60 = vld [vmem:[%s6027_s17 + $0x4e0] ss:$8 sps:$4 sm:$0xff]   ;;  %v5001_v61 = vld [vmem:[%s6027_s17 + $0x1f4] ss:$8 sps:$4 sm:$0xff]  }
 0x134   : > { %3468 = vmatmul.mubr.bf16.gmra.mrb[8].mxu0 %v4905_v63  ;;  %3198 = vmatpush1.bf16.msra.mxu1 %v4902_v62  ;;  %v5004_v62 = vld [vmem:[%s6027_s17 + $0x4f4] ss:$8 sps:$4 sm:$0xff]  }
 0x135   : > { %3537 = vmatpush1.bf16.msra.mxu0 %v4906_v0  ;;  %3199 = vmatprep.subr.bf16.mxu1 %v4911_v1  ;;  %v5007_v63 = vld [vmem:[%s6025_s19 + $0xc] ss:$48 sps:$4 sm:$0xff]   ;;  %v5010_v0 = vld [vmem:[%s6025_s19 + $0x24] ss:$48 sps:$4 sm:$0xff]   ;;  %v4999_v1 = vld [vmem:[%s6027_s17 + $0x1f0] ss:$8 sps:$4 sm:$0xff]  }
 0x136   : > { %3538 = vmatprep.subr.bf16.mxu0 %v4914_v2  ;;  %3138 = vmatprep.mubr.bf16.mxu1 %v4915_v3  ;;  %v5002_v2 = vld [vmem:[%s6027_s17 + $0x4f0] ss:$8 sps:$4 sm:$0xff]   ;;  %v5013_v3 = vld [vmem:[%s6027_s17 + $0x204] ss:$8 sps:$4 sm:$0xff]  }
 0x137   : > { %3477 = vmatprep.mubr.bf16.mxu0 %v4917_v4  ;;  %v5016_v4 = vld [vmem:[%s6027_s17 + $0x504] ss:$8 sps:$4 sm:$0xff]  }
 0x138   : > { %3200 = vmatpush1.bf16.msra.mxu1 %v4909_v5  ;;  %v5005_v5 = vld [vmem:[%s6025_s19 + $0x8] ss:$48 sps:$4 sm:$0xff]  }
 0x139   : > { %3539 = vmatpush1.bf16.msra.mxu0 %v4912_v6  ;;  %3201 = vmatprep.subr.bf16.mxu1 %v4922_v7  ;;  %v5008_v6 = vld [vmem:[%s6025_s19 + $0x20] ss:$48 sps:$4 sm:$0xff]  }
 0x13a   : > { %3540 = vmatprep.subr.bf16.mxu0 %v4926_v8  ;;  %v5011_v7 = vld [vmem:[%s6027_s17 + $0x200] ss:$8 sps:$4 sm:$0xff]  }
 0x13b   : > { %3139 = vmatmul.mubr.bf16.gmra.mrb[12].mxu1 %v4919_v9  ;;  %v5014_v8 = vld [vmem:[%s6027_s17 + $0x500] ss:$8 sps:$4 sm:$0xff]   ;;  %v5019_v9 = vld [vmem:[%s6027_s17 + $0x214] ss:$8 sps:$4 sm:$0xff]  }
 0x13c   : > { %3478 = vmatmul.mubr.bf16.gmra.mrb[12].mxu0 %v4923_v11  ;;  %3202 = vmatpush1.bf16.msra.mxu1 %v4920_v10  ;;  %v5022_v10 = vld [vmem:[%s6027_s17 + $0x514] ss:$8 sps:$4 sm:$0xff]  }
 0x13d   : > { %3541 = vmatpush1.bf16.msra.mxu0 %v4924_v12  ;;  %3203 = vmatprep.subr.bf16.mxu1 %v4929_v13  ;;  %v5023_v11 = vld [vmem:[%s6025_s19 + $0x6c] ss:$48 sps:$4 sm:$0xff]   ;;  %v5025_v12 = vld [vmem:[%s6025_s19 + $0x84] ss:$48 sps:$4 sm:$0xff]   ;;  %v5017_v13 = vld [vmem:[%s6027_s17 + $0x210] ss:$8 sps:$4 sm:$0xff]  }
 0x13e   : > { %3542 = vmatprep.subr.bf16.mxu0 %v4932_v14  ;;  %3148 = vmatprep.mubr.bf16.mxu1 %v4933_v15  ;;  %v5020_v14 = vld [vmem:[%s6027_s17 + $0x510] ss:$8 sps:$4 sm:$0xff]   ;;  %v5030_v15 = vld [vmem:[%s6027_s17 + $0x224] ss:$8 sps:$4 sm:$0xff]  }
 0x13f   : > { %3487 = vmatprep.mubr.bf16.mxu0 %v4935_v16  ;;  %v5034_v16 = vld [vmem:[%s6027_s17 + $0x524] ss:$8 sps:$4 sm:$0xff]  }
 0x140   : > { %3204 = vmatpush1.bf16.msra.mxu1 %v4927_v17  ;;  %v5027_v17 = vld [vmem:[%s6025_s19 + $0x68] ss:$48 sps:$4 sm:$0xff]  }
 0x141   : > { %3543 = vmatpush1.bf16.msra.mxu0 %v4930_v18  ;;  %3205 = vmatprep.subr.bf16.mxu1 %v4940_v19  ;;  %v5028_v18 = vld [vmem:[%s6027_s17 + $0x220] ss:$8 sps:$4 sm:$0xff]  }
 0x142   : > { %3544 = vmatprep.subr.bf16.mxu0 %v4944_v20  ;;  %v5031_v19 = vld [vmem:[%s6025_s19 + $0x80] ss:$48 sps:$4 sm:$0xff]  }
 0x143   : > { %3149 = vmatmul.mubr.bf16.gmra.mrb[16].mxu1 %v4937_v21  ;;  %v5032_v20 = vld [vmem:[%s6027_s17 + $0x520] ss:$8 sps:$4 sm:$0xff]   ;;  %v5037_v21 = vld [vmem:[%s6027_s17 + $0x234] ss:$8 sps:$4 sm:$0xff]  }
 0x144   : > { %3488 = vmatmul.mubr.bf16.gmra.mrb[16].mxu0 %v4941_v23  ;;  %3206 = vmatpush1.bf16.msra.mxu1 %v4938_v22  ;;  %v5040_v22 = vld [vmem:[%s6027_s17 + $0x534] ss:$8 sps:$4 sm:$0xff]  }
 0x145   : > { %3545 = vmatpush1.bf16.msra.mxu0 %v4942_v24  ;;  %3207 = vmatprep.subr.bf16.mxu1 %v4947_v25  ;;  %v5041_v23 = vld [vmem:[%s6025_s19 + $0xcc] ss:$48 sps:$4 sm:$0xff]   ;;  %v5043_v24 = vld [vmem:[%s6025_s19 + $0xe4] ss:$48 sps:$4 sm:$0xff]   ;;  %v5035_v25 = vld [vmem:[%s6027_s17 + $0x230] ss:$8 sps:$4 sm:$0xff]  }
 0x146   : > { %3546 = vmatprep.subr.bf16.mxu0 %v4950_v26  ;;  %3158 = vmatprep.mubr.bf16.mxu1 %v4951_v27  ;;  %v5038_v26 = vld [vmem:[%s6027_s17 + $0x530] ss:$8 sps:$4 sm:$0xff]   ;;  %v5048_v27 = vld [vmem:[%s6027_s17 + $0x244] ss:$8 sps:$4 sm:$0xff]  }
 0x147   : > { %3497 = vmatprep.mubr.bf16.mxu0 %v4953_v28  ;;  %v5052_v28 = vld [vmem:[%s6027_s17 + $0x544] ss:$8 sps:$4 sm:$0xff]  }
 0x148   : > { %3208 = vmatpush1.bf16.msra.mxu1 %v4945_v29  ;;  %v5045_v29 = vld [vmem:[%s6025_s19 + $0xc8] ss:$48 sps:$4 sm:$0xff]  }
 0x149   : > { %3547 = vmatpush1.bf16.msra.mxu0 %v4948_v30  ;;  %3209 = vmatprep.subr.bf16.mxu1 %v4958_v31  ;;  %v5046_v30 = vld [vmem:[%s6027_s17 + $0x240] ss:$8 sps:$4 sm:$0xff]  }
 0x14a   : > { %3548 = vmatprep.subr.bf16.mxu0 %v4962_v32  ;;  %v5049_v31 = vld [vmem:[%s6025_s19 + $0xe0] ss:$48 sps:$4 sm:$0xff]  }
 0x14b   : > { %3159 = vmatmul.mubr.bf16.gmra.mrb[20].mxu1 %v4955_v33  ;;  %v5050_v32 = vld [vmem:[%s6027_s17 + $0x540] ss:$8 sps:$4 sm:$0xff]   ;;  %v5055_v33 = vld [vmem:[%s6027_s17 + $0x254] ss:$8 sps:$4 sm:$0xff]  }
 0x14c   : > { %3498 = vmatmul.mubr.bf16.gmra.mrb[20].mxu0 %v4959_v35  ;;  %3210 = vmatpush1.bf16.msra.mxu1 %v4956_v34  ;;  %v5058_v34 = vld [vmem:[%s6027_s17 + $0x554] ss:$8 sps:$4 sm:$0xff]  }
 0x14d   : > { %3549 = vmatpush1.bf16.msra.mxu0 %v4960_v36  ;;  %3211 = vmatprep.subr.bf16.mxu1 %v4965_v37  ;;  %v5059_v35 = vld [vmem:[%s6025_s19 + $0x12c] ss:$48 sps:$4 sm:$0xff]   ;;  %v5061_v36 = vld [vmem:[%s6025_s19 + $0x144] ss:$48 sps:$4 sm:$0xff]   ;;  %v5053_v37 = vld [vmem:[%s6027_s17 + $0x250] ss:$8 sps:$4 sm:$0xff]  }
 0x14e   : > { %3550 = vmatprep.subr.bf16.mxu0 %v4968_v38  ;;  %3168 = vmatprep.mubr.bf16.mxu1 %v4969_v39  ;;  %v5056_v38 = vld [vmem:[%s6027_s17 + $0x550] ss:$8 sps:$4 sm:$0xff]   ;;  %v5066_v39 = vld [vmem:[%s6027_s17 + $0x264] ss:$8 sps:$4 sm:$0xff]  }
 0x14f   : > { %3507 = vmatprep.mubr.bf16.mxu0 %v4971_v40  ;;  %v5070_v40 = vld [vmem:[%s6027_s17 + $0x564] ss:$8 sps:$4 sm:$0xff]  }
 0x150   : > { %3212 = vmatpush1.bf16.msra.mxu1 %v4963_v41  ;;  %v5063_v41 = vld [vmem:[%s6025_s19 + $0x128] ss:$48 sps:$4 sm:$0xff]  }
 0x151   : > { %3551 = vmatpush1.bf16.msra.mxu0 %v4966_v42  ;;  %3213 = vmatprep.subr.bf16.mxu1 %v4976_v43  ;;  %v5064_v42 = vld [vmem:[%s6027_s17 + $0x260] ss:$8 sps:$4 sm:$0xff]  }
 0x152   : > { %3552 = vmatprep.subr.bf16.mxu0 %v4980_v44  ;;  %v5067_v43 = vld [vmem:[%s6025_s19 + $0x140] ss:$48 sps:$4 sm:$0xff]  }
 0x153   : > { %3169 = vmatmul.mubr.bf16.gmra.mrb[24].mxu1 %v4973_v45  ;;  %v5068_v44 = vld [vmem:[%s6027_s17 + $0x560] ss:$8 sps:$4 sm:$0xff]   ;;  %v5073_v45 = vld [vmem:[%s6027_s17 + $0x274] ss:$8 sps:$4 sm:$0xff]  }
 0x154   : > { %3508 = vmatmul.mubr.bf16.gmra.mrb[24].mxu0 %v4977_v47  ;;  %3214 = vmatpush1.bf16.msra.mxu1 %v4974_v46  ;;  %v5076_v46 = vld [vmem:[%s6027_s17 + $0x574] ss:$8 sps:$4 sm:$0xff]  }
 0x155   : > { %3553 = vmatpush1.bf16.msra.mxu0 %v4978_v48  ;;  %3215 = vmatprep.subr.bf16.mxu1 %v4983_v49  ;;  %v5077_v47 = vld [vmem:[%s6025_s19 + $0x18c] ss:$48 sps:$4 sm:$0xff]   ;;  %v5079_v48 = vld [vmem:[%s6025_s19 + $0x1a4] ss:$48 sps:$4 sm:$0xff]   ;;  %v5071_v49 = vld [vmem:[%s6027_s17 + $0x270] ss:$8 sps:$4 sm:$0xff]  }
 0x156   : > { %3554 = vmatprep.subr.bf16.mxu0 %v4986_v50  ;;  %3178 = vmatprep.mubr.bf16.mxu1 %v4987_v51  ;;  %v5074_v50 = vld [vmem:[%s6027_s17 + $0x570] ss:$8 sps:$4 sm:$0xff]   ;;  %v5084_v51 = vld [vmem:[%s6027_s17 + $0x284] ss:$8 sps:$4 sm:$0xff]  }
 0x157   : > { %3517 = vmatprep.mubr.bf16.mxu0 %v4989_v52  ;;  %v5088_v52 = vld [vmem:[%s6027_s17 + $0x584] ss:$8 sps:$4 sm:$0xff]  }
 0x158   : > { %3216 = vmatpush1.bf16.msra.mxu1 %v4981_v53  ;;  %v5081_v53 = vld [vmem:[%s6025_s19 + $0x188] ss:$48 sps:$4 sm:$0xff]  }
 0x159   : > { %3555 = vmatpush1.bf16.msra.mxu0 %v4984_v54  ;;  %3217 = vmatprep.subr.bf16.mxu1 %v4994_v55  ;;  %v5082_v54 = vld [vmem:[%s6027_s17 + $0x280] ss:$8 sps:$4 sm:$0xff]  }
 0x15a   : > { %3556 = vmatprep.subr.bf16.mxu0 %v4998_v56  ;;  %v5085_v55 = vld [vmem:[%s6025_s19 + $0x1a0] ss:$48 sps:$4 sm:$0xff]  }
 0x15b   : > { %3179 = vmatmul.mubr.bf16.gmra.mrb[28].mxu1 %v4991_v57  ;;  %v5086_v56 = vld [vmem:[%s6027_s17 + $0x580] ss:$8 sps:$4 sm:$0xff]   ;;  %v5091_v57 = vld [vmem:[%s6027_s17 + $0x294] ss:$8 sps:$4 sm:$0xff]  }
 0x15c   : > { %3518 = vmatmul.mubr.bf16.gmra.mrb[28].mxu0 %v4995_v59  ;;  %3218 = vmatpush1.bf16.msra.mxu1 %v4992_v58  ;;  %v5094_v58 = vld [vmem:[%s6027_s17 + $0x594] ss:$8 sps:$4 sm:$0xff]  }
 0x15d   : > { %3557 = vmatpush1.bf16.msra.mxu0 %v4996_v60  ;;  %3219 = vmatprep.subr.bf16.mxu1 %v5001_v61  ;;  %v5095_v59 = vld [vmem:[%s6025_s19 + $0x1ec] ss:$48 sps:$4 sm:$0xff]   ;;  %v5097_v60 = vld [vmem:[%s6025_s19 + $0x204] ss:$48 sps:$4 sm:$0xff]   ;;  %v5089_v61 = vld [vmem:[%s6027_s17 + $0x290] ss:$8 sps:$4 sm:$0xff]  }
 0x15e   : > { %3558 = vmatprep.subr.bf16.mxu0 %v5004_v62  ;;  %3221 = vmatprep.mubr.bf16.mxu1 %v5007_v63  ;;  %v5092_v62 = vld [vmem:[%s6027_s17 + $0x590] ss:$8 sps:$4 sm:$0xff]   ;;  %v5102_v63 = vld [vmem:[%s6027_s17 + $0x2a4] ss:$8 sps:$4 sm:$0xff]  }
 0x15f   : > { %3560 = vmatprep.mubr.bf16.mxu0 %v5010_v0  ;;  %v5106_v0 = vld [vmem:[%s6027_s17 + $0x5a4] ss:$8 sps:$4 sm:$0xff]  }
 0x160   : > { %3220 = vmatpush1.bf16.msra.mxu1 %v4999_v1  ;;  %v5099_v1 = vld [vmem:[%s6025_s19 + $0x1e8] ss:$48 sps:$4 sm:$0xff]  }
 0x161   : > { %3559 = vmatpush1.bf16.msra.mxu0 %v5002_v2  ;;  %3302 = vmatprep.subr.bf16.mxu1 %v5013_v3  ;;  %v5100_v2 = vld [vmem:[%s6027_s17 + $0x2a0] ss:$8 sps:$4 sm:$0xff]  }
 0x162   : > { %3641 = vmatprep.subr.bf16.mxu0 %v5016_v4  ;;  %v5103_v3 = vld [vmem:[%s6025_s19 + $0x200] ss:$48 sps:$4 sm:$0xff]  }
 0x163   : > { %3222 = vmatmul.mubr.bf16.vlgmr.msra.gmra.mrb[0].mxu1 %v5005_v5  ;;  %v5104_v4 = vld [vmem:[%s6027_s17 + $0x5a0] ss:$8 sps:$4 sm:$0xff]   ;;  %v5109_v5 = vld [vmem:[%s6027_s17 + $0x2b4] ss:$8 sps:$4 sm:$0xff]  }
 0x164   : > { %3561 = vmatmul.mubr.bf16.vlgmr.msra.gmra.mrb[0].mxu0 %v5008_v6  ;;  %3303 = vmatpush1.bf16.msra.mxu1 %v5011_v7  ;;  %v5112_v6 = vld [vmem:[%s6027_s17 + $0x5b4] ss:$8 sps:$4 sm:$0xff]  }
 0x165   : > { %3642 = vmatpush1.bf16.msra.mxu0 %v5014_v8  ;;  %3304 = vmatprep.subr.bf16.mxu1 %v5019_v9  ;;  %v5113_v7 = vld [vmem:[%s6025_s19 + $0x24c] ss:$48 sps:$4 sm:$0xff]   ;;  %v5115_v8 = vld [vmem:[%s6025_s19 + $0x264] ss:$48 sps:$4 sm:$0xff]   ;;  %v5107_v9 = vld [vmem:[%s6027_s17 + $0x2b0] ss:$8 sps:$4 sm:$0xff]  }
 0x166   : > { %3643 = vmatprep.subr.bf16.mxu0 %v5022_v10  ;;  %3231 = vmatprep.mubr.bf16.mxu1 %v5023_v11  ;;  %v5110_v10 = vld [vmem:[%s6027_s17 + $0x5b0] ss:$8 sps:$4 sm:$0xff]   ;;  %v5120_v11 = vld [vmem:[%s6027_s17 + $0x2c4] ss:$8 sps:$4 sm:$0xff]  }
 0x167   : > { %3570 = vmatprep.mubr.bf16.mxu0 %v5025_v12  ;;  %v5124_v12 = vld [vmem:[%s6027_s17 + $0x5c4] ss:$8 sps:$4 sm:$0xff]  }
 0x168   : > { %3305 = vmatpush1.bf16.msra.mxu1 %v5017_v13  ;;  %v5117_v13 = vld [vmem:[%s6025_s19 + $0x248] ss:$48 sps:$4 sm:$0xff]  }
 0x169   : > { %3644 = vmatpush1.bf16.msra.mxu0 %v5020_v14  ;;  %3306 = vmatprep.subr.bf16.mxu1 %v5030_v15  ;;  %v5118_v14 = vld [vmem:[%s6027_s17 + $0x2c0] ss:$8 sps:$4 sm:$0xff]  }
 0x16a   : > { %3645 = vmatprep.subr.bf16.mxu0 %v5034_v16  ;;  %v5121_v15 = vld [vmem:[%s6025_s19 + $0x260] ss:$48 sps:$4 sm:$0xff]  }
 0x16b   : > { %3232 = vmatmul.mubr.bf16.gmra.mrb[4].mxu1 %v5027_v17  ;;  %v5122_v16 = vld [vmem:[%s6027_s17 + $0x5c0] ss:$8 sps:$4 sm:$0xff]   ;;  %v5127_v17 = vld [vmem:[%s6027_s17 + $0x2d4] ss:$8 sps:$4 sm:$0xff]  }
 0x16c   : > { %3571 = vmatmul.mubr.bf16.gmra.mrb[4].mxu0 %v5031_v19  ;;  %3307 = vmatpush1.bf16.msra.mxu1 %v5028_v18  ;;  %v5130_v18 = vld [vmem:[%s6027_s17 + $0x5d4] ss:$8 sps:$4 sm:$0xff]  }
 0x16d   : > { %3646 = vmatpush1.bf16.msra.mxu0 %v5032_v20  ;;  %3308 = vmatprep.subr.bf16.mxu1 %v5037_v21  ;;  %v5131_v19 = vld [vmem:[%s6025_s19 + $0x2ac] ss:$48 sps:$4 sm:$0xff]   ;;  %v5133_v20 = vld [vmem:[%s6025_s19 + $0x2c4] ss:$48 sps:$4 sm:$0xff]   ;;  %v5125_v21 = vld [vmem:[%s6027_s17 + $0x2d0] ss:$8 sps:$4 sm:$0xff]  }
 0x16e   : > { %3647 = vmatprep.subr.bf16.mxu0 %v5040_v22  ;;  %3241 = vmatprep.mubr.bf16.mxu1 %v5041_v23  ;;  %v5128_v22 = vld [vmem:[%s6027_s17 + $0x5d0] ss:$8 sps:$4 sm:$0xff]   ;;  %v5138_v23 = vld [vmem:[%s6027_s17 + $0x2e4] ss:$8 sps:$4 sm:$0xff]  }
 0x16f   : > { %3580 = vmatprep.mubr.bf16.mxu0 %v5043_v24  ;;  %v5142_v24 = vld [vmem:[%s6027_s17 + $0x5e4] ss:$8 sps:$4 sm:$0xff]  }
 0x170   : > { %3309 = vmatpush1.bf16.msra.mxu1 %v5035_v25  ;;  %v5135_v25 = vld [vmem:[%s6025_s19 + $0x2a8] ss:$48 sps:$4 sm:$0xff]  }
 0x171   : > { %3648 = vmatpush1.bf16.msra.mxu0 %v5038_v26  ;;  %3310 = vmatprep.subr.bf16.mxu1 %v5048_v27  ;;  %v5136_v26 = vld [vmem:[%s6027_s17 + $0x2e0] ss:$8 sps:$4 sm:$0xff]  }
 0x172   : > { %3649 = vmatprep.subr.bf16.mxu0 %v5052_v28  ;;  %v5139_v27 = vld [vmem:[%s6025_s19 + $0x2c0] ss:$48 sps:$4 sm:$0xff]  }
 0x173   : > { %3242 = vmatmul.mubr.bf16.gmra.mrb[8].mxu1 %v5045_v29  ;;  %v5140_v28 = vld [vmem:[%s6027_s17 + $0x5e0] ss:$8 sps:$4 sm:$0xff]   ;;  %v5145_v29 = vld [vmem:[%s6027_s17 + $0x2f4] ss:$8 sps:$4 sm:$0xff]  }
 0x174   : > { %3581 = vmatmul.mubr.bf16.gmra.mrb[8].mxu0 %v5049_v31  ;;  %3311 = vmatpush1.bf16.msra.mxu1 %v5046_v30  ;;  %v5148_v30 = vld [vmem:[%s6027_s17 + $0x5f4] ss:$8 sps:$4 sm:$0xff]  }
 0x175   : > { %3650 = vmatpush1.bf16.msra.mxu0 %v5050_v32  ;;  %3312 = vmatprep.subr.bf16.mxu1 %v5055_v33  ;;  %v5151_v31 = vld [vmem:[%s6025_s19 + $0x14] ss:$48 sps:$4 sm:$0xff]   ;;  %v5154_v32 = vld [vmem:[%s6025_s19 + $0x2c] ss:$48 sps:$4 sm:$0xff]   ;;  %v5143_v33 = vld [vmem:[%s6027_s17 + $0x2f0] ss:$8 sps:$4 sm:$0xff]  }
 0x176   : > { %3651 = vmatprep.subr.bf16.mxu0 %v5058_v34  ;;  %3251 = vmatprep.mubr.bf16.mxu1 %v5059_v35  ;;  %v5146_v34 = vld [vmem:[%s6027_s17 + $0x5f0] ss:$8 sps:$4 sm:$0xff]  }
 0x177   : > { %3590 = vmatprep.mubr.bf16.mxu0 %v5061_v36  ;;  %v5149_v35 = vld [vmem:[%s6025_s19 + $0x10] ss:$48 sps:$4 sm:$0xff]   ;;  %v5152_v36 = vld [vmem:[%s6025_s19 + $0x28] ss:$48 sps:$4 sm:$0xff]  }
 0x178   : > { %3313 = vmatpush1.bf16.msra.mxu1 %v5053_v37  ;;  %v5155_v37 = vld [vmem:[%s6025_s19 + $0x74] ss:$48 sps:$4 sm:$0xff]  }
 0x179   : > { %3652 = vmatpush1.bf16.msra.mxu0 %v5056_v38  ;;  %3314 = vmatprep.subr.bf16.mxu1 %v5066_v39  ;;  %v5157_v38 = vld [vmem:[%s6025_s19 + $0x8c] ss:$48 sps:$4 sm:$0xff]   ;;  %v5159_v39 = vld [vmem:[%s6025_s19 + $0x70] ss:$48 sps:$4 sm:$0xff]  }
 0x17a   : > { %3653 = vmatprep.subr.bf16.mxu0 %v5070_v40  ;;  %v5160_v40 = vld [vmem:[%s6025_s19 + $0x88] ss:$48 sps:$4 sm:$0xff]  }
 0x17b   : > { %3252 = vmatmul.mubr.bf16.gmra.mrb[12].mxu1 %v5063_v41  ;;  %v5161_v41 = vld [vmem:[%s6025_s19 + $0xd4] ss:$48 sps:$4 sm:$0xff]  }
 0x17c   : > { %3591 = vmatmul.mubr.bf16.gmra.mrb[12].mxu0 %v5067_v43  ;;  %3315 = vmatpush1.bf16.msra.mxu1 %v5064_v42  ;;  %v5163_v42 = vld [vmem:[%s6025_s19 + $0xec] ss:$48 sps:$4 sm:$0xff]   ;;  %v5165_v43 = vld [vmem:[%s6025_s19 + $0xd0] ss:$48 sps:$4 sm:$0xff]  }
 0x17d   : > { %3654 = vmatpush1.bf16.msra.mxu0 %v5068_v44  ;;  %3316 = vmatprep.subr.bf16.mxu1 %v5073_v45  ;;  %v5166_v44 = vld [vmem:[%s6025_s19 + $0xe8] ss:$48 sps:$4 sm:$0xff]   ;;  %v5167_v45 = vld [vmem:[%s6025_s19 + $0x134] ss:$48 sps:$4 sm:$0xff]  }
 0x17e   : > { %3655 = vmatprep.subr.bf16.mxu0 %v5076_v46  ;;  %3261 = vmatprep.mubr.bf16.mxu1 %v5077_v47  ;;  %v5169_v46 = vld [vmem:[%s6025_s19 + $0x14c] ss:$48 sps:$4 sm:$0xff]   ;;  %v5171_v47 = vld [vmem:[%s6025_s19 + $0x130] ss:$48 sps:$4 sm:$0xff]  }
 0x17f   : > { %3600 = vmatprep.mubr.bf16.mxu0 %v5079_v48  ;;  %v5172_v48 = vld [vmem:[%s6025_s19 + $0x148] ss:$48 sps:$4 sm:$0xff]  }
 0x180   : > { %3317 = vmatpush1.bf16.msra.mxu1 %v5071_v49  ;;  %v5173_v49 = vld [vmem:[%s6025_s19 + $0x194] ss:$48 sps:$4 sm:$0xff]  }
 0x181   : > { %3656 = vmatpush1.bf16.msra.mxu0 %v5074_v50  ;;  %3318 = vmatprep.subr.bf16.mxu1 %v5084_v51  ;;  %v5175_v50 = vld [vmem:[%s6025_s19 + $0x1ac] ss:$48 sps:$4 sm:$0xff]   ;;  %v5177_v51 = vld [vmem:[%s6025_s19 + $0x190] ss:$48 sps:$4 sm:$0xff]  }
 0x182   : > { %3657 = vmatprep.subr.bf16.mxu0 %v5088_v52  ;;  %v5178_v52 = vld [vmem:[%s6025_s19 + $0x1a8] ss:$48 sps:$4 sm:$0xff]  }
 0x183   : > { %3262 = vmatmul.mubr.bf16.gmra.mrb[16].mxu1 %v5081_v53  ;;  %v5179_v53 = vld [vmem:[%s6025_s19 + $0x1f4] ss:$48 sps:$4 sm:$0xff]  }
 0x184   : > { %3601 = vmatmul.mubr.bf16.gmra.mrb[16].mxu0 %v5085_v55  ;;  %3319 = vmatpush1.bf16.msra.mxu1 %v5082_v54  ;;  %v5181_v54 = vld [vmem:[%s6025_s19 + $0x20c] ss:$48 sps:$4 sm:$0xff]   ;;  %v5183_v55 = vld [vmem:[%s6025_s19 + $0x1f0] ss:$48 sps:$4 sm:$0xff]  }
 0x185   : > { %3658 = vmatpush1.bf16.msra.mxu0 %v5086_v56  ;;  %3320 = vmatprep.subr.bf16.mxu1 %v5091_v57  ;;  %v5184_v56 = vld [vmem:[%s6025_s19 + $0x208] ss:$48 sps:$4 sm:$0xff]   ;;  %v5185_v57 = vld [vmem:[%s6025_s19 + $0x254] ss:$48 sps:$4 sm:$0xff]  }
 0x186   : > { %3659 = vmatprep.subr.bf16.mxu0 %v5094_v58  ;;  %3271 = vmatprep.mubr.bf16.mxu1 %v5095_v59  ;;  %v5187_v58 = vld [vmem:[%s6025_s19 + $0x26c] ss:$48 sps:$4 sm:$0xff]   ;;  %v5189_v59 = vld [vmem:[%s6025_s19 + $0x250] ss:$48 sps:$4 sm:$0xff]  }
 0x187   : > { %3610 = vmatprep.mubr.bf16.mxu0 %v5097_v60  ;;  %v5190_v60 = vld [vmem:[%s6025_s19 + $0x268] ss:$48 sps:$4 sm:$0xff]  }
 0x188   : > { %3321 = vmatpush1.bf16.msra.mxu1 %v5089_v61  ;;  %v5191_v61 = vld [vmem:[%s6025_s19 + $0x2b4] ss:$48 sps:$4 sm:$0xff]  }
 0x189   : > { %3660 = vmatpush1.bf16.msra.mxu0 %v5092_v62  ;;  %3322 = vmatprep.subr.bf16.mxu1 %v5102_v63  ;;  %v5193_v62 = vld [vmem:[%s6025_s19 + $0x2cc] ss:$48 sps:$4 sm:$0xff]   ;;  %v5195_v63 = vld [vmem:[%s6025_s19 + $0x2b0] ss:$48 sps:$4 sm:$0xff]  }
 0x18a   : > { %3661 = vmatprep.subr.bf16.mxu0 %v5106_v0  ;;  %v5196_v0 = vld [vmem:[%s6025_s19 + $0x2c8] ss:$48 sps:$4 sm:$0xff]  }
 0x18b   : > { %3272 = vmatmul.mubr.bf16.gmra.mrb[20].mxu1 %v5099_v1 }
 0x18c   : > { %3611 = vmatmul.mubr.bf16.gmra.mrb[20].mxu0 %v5103_v3  ;;  %3323 = vmatpush1.bf16.msra.mxu1 %v5100_v2  ;;  %v1316_v2 = vld [vmem:[%s6029_s15] sm:$0xff] }
 0x18d   : > { %3662 = vmatpush1.bf16.msra.mxu0 %v5104_v4  ;;  %3324 = vmatprep.subr.bf16.mxu1 %v5109_v5 }
 0x18e   : > { %3663 = vmatprep.subr.bf16.mxu0 %v5112_v6  ;;  %3281 = vmatprep.mubr.bf16.mxu1 %v5113_v7  ;;  %v1317_v6 = vld [vmem:[%s6029_s15 + $0x8] sm:$0xff] }
 0x18f   : > { %3620 = vmatprep.mubr.bf16.mxu0 %v5115_v8 }
 0x190   : > { %3325 = vmatpush1.bf16.msra.mxu1 %v5107_v9 }
 0x191   : > { %3664 = vmatpush1.bf16.msra.mxu0 %v5110_v10  ;;  %3326 = vmatprep.subr.bf16.mxu1 %v5120_v11  ;;  %v1318_v10 = vld [vmem:[%s6029_s15 + $0x10] sm:$0xff] }
 0x192   : > { %3665 = vmatprep.subr.bf16.mxu0 %v5124_v12 }
 0x193   : > { %3282 = vmatmul.mubr.bf16.gmra.mrb[24].mxu1 %v5117_v13 }
 0x194   : > { %3621 = vmatmul.mubr.bf16.gmra.mrb[24].mxu0 %v5121_v15  ;;  %3327 = vmatpush1.bf16.msra.mxu1 %v5118_v14  ;;  %v1319_v15 = vld [vmem:[%s6029_s15 + $0x18] sm:$0xff] }
 0x195   : > { %3666 = vmatpush1.bf16.msra.mxu0 %v5122_v16  ;;  %3328 = vmatprep.subr.bf16.mxu1 %v5127_v17 }
 0x196   : > { %3667 = vmatprep.subr.bf16.mxu0 %v5130_v18  ;;  %3291 = vmatprep.mubr.bf16.mxu1 %v5131_v19 }
 0x197   : > { %3630 = vmatprep.mubr.bf16.mxu0 %v5133_v20 }
 0x198   : > { %3329 = vmatpush1.bf16.msra.mxu1 %v5125_v21 }
 0x199   : > { %3668 = vmatpush1.bf16.msra.mxu0 %v5128_v22  ;;  %3330 = vmatprep.subr.bf16.mxu1 %v5138_v23  ;;  %v1320_v22 = vld [vmem:[%s6029_s15 + $0x20] sm:$0xff] }
 0x19a   : > { %3669 = vmatprep.subr.bf16.mxu0 %v5142_v24 }
 0x19b   : > { %3292 = vmatmul.mubr.bf16.gmra.mrb[28].mxu1 %v5135_v25 }
 0x19c   : > { %3631 = vmatmul.mubr.bf16.gmra.mrb[28].mxu0 %v5139_v27  ;;  %3331 = vmatpush1.bf16.msra.mxu1 %v5136_v26  ;;  %v1321_v26 = vld [vmem:[%s6029_s15 + $0x28] sm:$0xff] }
 0x19d   : > { %3670 = vmatpush1.bf16.msra.mxu0 %v5140_v28  ;;  %3332 = vmatprep.subr.bf16.mxu1 %v5145_v29 }
 0x19e   : > { %3671 = vmatprep.subr.bf16.mxu0 %v5148_v30  ;;  %3334 = vmatprep.mubr.bf16.mxu1 %v5151_v31  ;;  %v1322_v30 = vld [vmem:[%s6029_s15 + $0x30] sm:$0xff] }
 0x19f   : > { %3673 = vmatprep.mubr.bf16.mxu0 %v5154_v32 }
 0x1a0   : > { %3333 = vmatpush1.bf16.msra.mxu1 %v5143_v33 }
 0x1a1   : > { %3672 = vmatpush1.bf16.msra.mxu0 %v5146_v34 }
 0x1a3   : > { %3335 = vmatmul.mubr.bf16.vlgmr.msra.gmra.mrb[0].mxu1 %v5149_v35  ;;  %v1323_v35 = vld [vmem:[%s6029_s15 + $0x38] sm:$0xff] }
 0x1a4   : > { %3674 = vmatmul.mubr.bf16.vlgmr.msra.gmra.mrb[0].mxu0 %v5152_v36  ;;  %3344 = vmatprep.mubr.bf16.mxu1 %v5155_v37 }
 0x1a5   : > { %3683 = vmatprep.mubr.bf16.mxu0 %v5157_v38 }
 0x1ab   : > { %3345 = vmatmul.mubr.bf16.gmra.mrb[4].mxu1 %v5159_v39 }
 0x1ac   : > { %3684 = vmatmul.mubr.bf16.gmra.mrb[4].mxu0 %v5160_v40  ;;  %3354 = vmatprep.mubr.bf16.mxu1 %v5161_v41 }
 0x1ad   : > { %3693 = vmatprep.mubr.bf16.mxu0 %v5163_v42  ;;  %v1324_v42 = vld [vmem:[%s6029_s15 + $0x40] sm:$0xff] }
 0x1b3   : > { %3355 = vmatmul.mubr.bf16.gmra.mrb[8].mxu1 %v5165_v43 }
 0x1b4   : > { %3694 = vmatmul.mubr.bf16.gmra.mrb[8].mxu0 %v5166_v44  ;;  %3364 = vmatprep.mubr.bf16.mxu1 %v5167_v45 }
 0x1b5   : > { %3703 = vmatprep.mubr.bf16.mxu0 %v5169_v46  ;;  %v1325_v46 = vld [vmem:[%s6029_s15 + $0x48] sm:$0xff] }
 0x1bb   : > { %3365 = vmatmul.mubr.bf16.gmra.mrb[12].mxu1 %v5171_v47 }
 0x1bc   : > { %3704 = vmatmul.mubr.bf16.gmra.mrb[12].mxu0 %v5172_v48  ;;  %3374 = vmatprep.mubr.bf16.mxu1 %v5173_v49 }
 0x1bd   : > { %3713 = vmatprep.mubr.bf16.mxu0 %v5175_v50  ;;  %v1326_v50 = vld [vmem:[%s6029_s15 + $0x50] sm:$0xff] }
 0x1c3   : > { %3375 = vmatmul.mubr.bf16.gmra.mrb[16].mxu1 %v5177_v51 }
 0x1c4   : > { %3714 = vmatmul.mubr.bf16.gmra.mrb[16].mxu0 %v5178_v52  ;;  %3384 = vmatprep.mubr.bf16.mxu1 %v5179_v53 }
 0x1c5   : > { %3723 = vmatprep.mubr.bf16.mxu0 %v5181_v54 }
 0x1cb   : > { %3385 = vmatmul.mubr.bf16.gmra.mrb[20].mxu1 %v5183_v55  ;;  %v1327_v55 = vld [vmem:[%s6029_s15 + $0x58] sm:$0xff] }
 0x1cc   : > { %3724 = vmatmul.mubr.bf16.gmra.mrb[20].mxu0 %v5184_v56  ;;  %3394 = vmatprep.mubr.bf16.mxu1 %v5185_v57 }
 0x1cd   : > { %3733 = vmatprep.mubr.bf16.mxu0 %v5187_v58 }
 0x1d3   : > { %3395 = vmatmul.mubr.bf16.gmra.mrb[24].mxu1 %v5189_v59 }
 0x1d4   : > { %3734 = vmatmul.mubr.bf16.gmra.mrb[24].mxu0 %v5190_v60  ;;  %3404 = vmatprep.mubr.bf16.mxu1 %v5191_v61 }
 0x1d5   : > { %3743 = vmatprep.mubr.bf16.mxu0 %v5193_v62  ;;  %v1328_v62 = vld [vmem:[%s6029_s15 + $0x60] sm:$0xff] }
 0x1db   : > { %3405 = vmatmul.mubr.bf16.gmra.mrb[28].mxu1 %v5195_v63 }
 0x1dc   : > { %3744 = vmatmul.mubr.bf16.gmra.mrb[28].mxu0 %v5196_v0 }
 0x276   : > { %v3336_v1 = vpop.f32.mrb[0].mxu1 }
 0x277   : > { %v3675_v3 = vpop.f32.mrb[0].mxu0  ;;  %v3338_v5 = vpop.f32.mrb[1].mxu1 }
 0x278   : > { %v4512_v4 = vadd.f32 %v3675_v3, %v3336_v1  ;;  %v3677_v7 = vpop.f32.mrb[1].mxu0  ;;  %v3340_v9 = vpop.f32.mrb[2].mxu1 }
 0x279   : > { %v4513_v8 = vadd.f32 %v3677_v7, %v3338_v5  ;;  %v3679_v11 = vpop.f32.mrb[2].mxu0  ;;  %v3342_v14 = vpop.f32.mrb[3].mxu1 }
 0x27a   : > { %v3754_v12 = vadd.f32 %v4512_v4, %v1316_v2  ;;  %v4514_v13 = vadd.f32 %v3679_v11, %v3340_v9  ;;  %v3681_v16 = vpop.f32.mrb[3].mxu0  ;;  %v1329_v2 = vld [vmem:[%s6029_s15 + $0x68] sm:$0xff]  ;;  %v1331_v11 = vld [vmem:[%s6029_s15 + $0x78] sm:$0xff] }
 0x27b   : > { %v3755_v17 = vadd.f32 %v4513_v8, %v1317_v6  ;;  %v4515_v18 = vadd.f32 %v3681_v16, %v3342_v14  ;;  %v1330_v6 = vld [vmem:[%s6029_s15 + $0x70] sm:$0xff] }
 0x27c   : > { %3786 = vst [vmem:[%s6029_s15] sm:$0xff] %v3754_v12  ;;  %v3756_v19 = vadd.f32 %v4514_v13, %v1318_v10 }
 0x27d   : > { %3787 = vst [vmem:[%s6029_s15 + $0x8] sm:$0xff] %v3755_v17  ;;  %v3757_v20 = vadd.f32 %v4515_v18, %v1319_v15  ;;  %v1332_v18 = vld [vmem:[%s6029_s15 + $0x80] sm:$0xff] }
 0x27e   : > { %3788 = vst [vmem:[%s6029_s15 + $0x10] sm:$0xff] %v3756_v19  ;;  %v3346_v21 = vpop.f32.mrb[4].mxu1 }
 0x27f   : > { %3789 = vst [vmem:[%s6029_s15 + $0x18] sm:$0xff] %v3757_v20  ;;  %v3685_v23 = vpop.f32.mrb[4].mxu0  ;;  %v3348_v25 = vpop.f32.mrb[5].mxu1 }
 0x280   : > { %v4516_v24 = vadd.f32 %v3685_v23, %v3346_v21  ;;  %v3687_v27 = vpop.f32.mrb[5].mxu0  ;;  %v3350_v29 = vpop.f32.mrb[6].mxu1 }
 0x281   : > { %v4517_v28 = vadd.f32 %v3687_v27, %v3348_v25  ;;  %v3689_v31 = vpop.f32.mrb[6].mxu0  ;;  %v3352_v34 = vpop.f32.mrb[7].mxu1 }
 0x282   : > { %v3758_v32 = vadd.f32 %v4516_v24, %v1320_v22  ;;  %v4518_v33 = vadd.f32 %v3689_v31, %v3350_v29  ;;  %v3691_v36 = vpop.f32.mrb[7].mxu0  ;;  %v1333_v22 = vld [vmem:[%s6029_s15 + $0x88] sm:$0xff]  ;;  %v1335_v31 = vld [vmem:[%s6029_s15 + $0x98] sm:$0xff] }
 0x283   : > { %v3759_v37 = vadd.f32 %v4517_v28, %v1321_v26  ;;  %v4519_v38 = vadd.f32 %v3691_v36, %v3352_v34  ;;  %v1334_v26 = vld [vmem:[%s6029_s15 + $0x90] sm:$0xff] }
 0x284   : > { %3790 = vst [vmem:[%s6029_s15 + $0x20] sm:$0xff] %v3758_v32  ;;  %v3760_v39 = vadd.f32 %v4518_v33, %v1322_v30 }
 0x285   : > { %3791 = vst [vmem:[%s6029_s15 + $0x28] sm:$0xff] %v3759_v37  ;;  %v3761_v40 = vadd.f32 %v4519_v38, %v1323_v35  ;;  %v1336_v38 = vld [vmem:[%s6029_s15 + $0xa0] sm:$0xff] }
 0x286   : > { %3792 = vst [vmem:[%s6029_s15 + $0x30] sm:$0xff] %v3760_v39  ;;  %v3356_v41 = vpop.f32.mrb[8].mxu1 }
 0x287   : > { %3793 = vst [vmem:[%s6029_s15 + $0x38] sm:$0xff] %v3761_v40  ;;  %v3695_v43 = vpop.f32.mrb[8].mxu0  ;;  %v3358_v45 = vpop.f32.mrb[9].mxu1 }
 0x288   : > { %v4520_v44 = vadd.f32 %v3695_v43, %v3356_v41  ;;  %v3697_v47 = vpop.f32.mrb[9].mxu0  ;;  %v3360_v49 = vpop.f32.mrb[10].mxu1 }
 0x289   : > { %v4521_v48 = vadd.f32 %v3697_v47, %v3358_v45  ;;  %v3699_v51 = vpop.f32.mrb[10].mxu0  ;;  %v3362_v54 = vpop.f32.mrb[11].mxu1 }
 0x28a   : > { %v3762_v52 = vadd.f32 %v4520_v44, %v1324_v42  ;;  %v4522_v53 = vadd.f32 %v3699_v51, %v3360_v49  ;;  %v3701_v56 = vpop.f32.mrb[11].mxu0  ;;  %v1337_v42 = vld [vmem:[%s6029_s15 + $0xa8] sm:$0xff]  ;;  %v1339_v51 = vld [vmem:[%s6029_s15 + $0xb8] sm:$0xff] }
 0x28b   : > { %v3763_v57 = vadd.f32 %v4521_v48, %v1325_v46  ;;  %v4523_v58 = vadd.f32 %v3701_v56, %v3362_v54  ;;  %v1338_v46 = vld [vmem:[%s6029_s15 + $0xb0] sm:$0xff] }
 0x28c   : > { %3794 = vst [vmem:[%s6029_s15 + $0x40] sm:$0xff] %v3762_v52  ;;  %v3764_v59 = vadd.f32 %v4522_v53, %v1326_v50 }
 0x28d   : > { %3795 = vst [vmem:[%s6029_s15 + $0x48] sm:$0xff] %v3763_v57  ;;  %v3765_v60 = vadd.f32 %v4523_v58, %v1327_v55  ;;  %v1340_v58 = vld [vmem:[%s6029_s15 + $0xc0] sm:$0xff] }
 0x28e   : > { %3796 = vst [vmem:[%s6029_s15 + $0x50] sm:$0xff] %v3764_v59  ;;  %v3366_v61 = vpop.f32.mrb[12].mxu1 }
 0x28f   : > { %3797 = vst [vmem:[%s6029_s15 + $0x58] sm:$0xff] %v3765_v60  ;;  %v3705_v63 = vpop.f32.mrb[12].mxu0  ;;  %v3368_v1 = vpop.f32.mrb[13].mxu1 }
 0x290   : > { %v4524_v0 = vadd.f32 %v3705_v63, %v3366_v61  ;;  %v3707_v3 = vpop.f32.mrb[13].mxu0  ;;  %v3370_v5 = vpop.f32.mrb[14].mxu1 }
 0x291   : > { %v4525_v4 = vadd.f32 %v3707_v3, %v3368_v1  ;;  %v3709_v7 = vpop.f32.mrb[14].mxu0  ;;  %v3372_v10 = vpop.f32.mrb[15].mxu1 }
 0x292   : > { %v3766_v8 = vadd.f32 %v4524_v0, %v1328_v62  ;;  %v4526_v9 = vadd.f32 %v3709_v7, %v3370_v5  ;;  %v3711_v12 = vpop.f32.mrb[15].mxu0  ;;  %v1341_v62 = vld [vmem:[%s6029_s15 + $0xc8] sm:$0xff]  ;;  %v1343_v7 = vld [vmem:[%s6029_s15 + $0xd8] sm:$0xff] }
 0x293   : > { %v3767_v13 = vadd.f32 %v4525_v4, %v1329_v2  ;;  %v4527_v14 = vadd.f32 %v3711_v12, %v3372_v10  ;;  %v1342_v2 = vld [vmem:[%s6029_s15 + $0xd0] sm:$0xff] }
 0x294   : > { %3798 = vst [vmem:[%s6029_s15 + $0x60] sm:$0xff] %v3766_v8  ;;  %v3768_v15 = vadd.f32 %v4526_v9, %v1330_v6 }
 0x295   : > { %3799 = vst [vmem:[%s6029_s15 + $0x68] sm:$0xff] %v3767_v13  ;;  %v3769_v16 = vadd.f32 %v4527_v14, %v1331_v11  ;;  %v1344_v14 = vld [vmem:[%s6029_s15 + $0xe0] sm:$0xff] }
 0x296   : > { %3800 = vst [vmem:[%s6029_s15 + $0x70] sm:$0xff] %v3768_v15  ;;  %v3376_v17 = vpop.f32.mrb[16].mxu1 }
 0x297   : > { %3801 = vst [vmem:[%s6029_s15 + $0x78] sm:$0xff] %v3769_v16  ;;  %v3715_v19 = vpop.f32.mrb[16].mxu0  ;;  %v3378_v21 = vpop.f32.mrb[17].mxu1 }
 0x298   : > { %v4528_v20 = vadd.f32 %v3715_v19, %v3376_v17  ;;  %v3717_v23 = vpop.f32.mrb[17].mxu0  ;;  %v3380_v25 = vpop.f32.mrb[18].mxu1 }
 0x299   : > { %v4529_v24 = vadd.f32 %v3717_v23, %v3378_v21  ;;  %v3719_v27 = vpop.f32.mrb[18].mxu0  ;;  %v3382_v30 = vpop.f32.mrb[19].mxu1 }
 0x29a   : > { %v3770_v28 = vadd.f32 %v4528_v20, %v1332_v18  ;;  %v4530_v29 = vadd.f32 %v3719_v27, %v3380_v25  ;;  %v3721_v32 = vpop.f32.mrb[19].mxu0  ;;  %v1345_v18 = vld [vmem:[%s6029_s15 + $0xe8] sm:$0xff]  ;;  %v1347_v27 = vld [vmem:[%s6029_s15 + $0xf8] sm:$0xff] }
 0x29b   : > { %v3771_v33 = vadd.f32 %v4529_v24, %v1333_v22  ;;  %v4531_v34 = vadd.f32 %v3721_v32, %v3382_v30  ;;  %v1346_v22 = vld [vmem:[%s6029_s15 + $0xf0] sm:$0xff] }
 0x29c   : > { %3802 = vst [vmem:[%s6029_s15 + $0x80] sm:$0xff] %v3770_v28  ;;  %v3772_v35 = vadd.f32 %v4530_v29, %v1334_v26 }
 0x29d   : > { %3803 = vst [vmem:[%s6029_s15 + $0x88] sm:$0xff] %v3771_v33  ;;  %v3773_v36 = vadd.f32 %v4531_v34, %v1335_v31  ;;  %v3856_v33 = vlaneseq (!%p4503_p5) }
 0x29e   : > { %3804 = vst [vmem:[%s6029_s15 + $0x90] sm:$0xff] %v3772_v35  ;;  %v3386_v37 = vpop.f32.mrb[20].mxu1  ;;  %v3854_v35 = vld [vmem:[%s1272_s11] sm:$0x3] (!%p4503_p5) }
 0x29f   : > { %3805 = vst [vmem:[%s6029_s15 + $0x98] sm:$0xff] %v3773_v36  ;;  %v3725_v39 = vpop.f32.mrb[20].mxu0  ;;  %v3388_v41 = vpop.f32.mrb[21].mxu1  ;;  %v3857_v34 = vshrl.u32 (!%p4503_p5), %v3856_v33, 7  ;;  %v3898_v36 = vld [vmem:[%s1277_s27] sm:$0x3] (!%p4503_p5) }
 0x2a0   : > { %v4532_v40 = vadd.f32 %v3725_v39, %v3386_v37  ;;  %v3727_v43 = vpop.f32.mrb[21].mxu0  ;;  %v3390_v45 = vpop.f32.mrb[22].mxu1  ;;  %v3822_v37 = vld [vmem:[%s6029_s15] sm:$0xff] (!%p4503_p5)  ;;  %v3823_v39 = vld [vmem:[%s6029_s15 + $0x8] sm:$0xff] (!%p4503_p5) }
 0x2a1   : > { %v4533_v44 = vadd.f32 %v3727_v43, %v3388_v41  ;;  %v3729_v47 = vpop.f32.mrb[22].mxu0  ;;  %v3392_v50 = vpop.f32.mrb[23].mxu1  ;;  %v3824_v41 = vld [vmem:[%s6029_s15 + $0x10] sm:$0xff] (!%p4503_p5)  ;;  %v3826_v43 = vld [vmem:[%s6029_s15 + $0x20] sm:$0xff] (!%p4503_p5) }
 0x2a2   : > { %v3774_v48 = vadd.f32 %v4532_v40, %v1336_v38  ;;  %v4534_v49 = vadd.f32 %v3729_v47, %v3390_v45  ;;  %v3731_v52 = vpop.f32.mrb[23].mxu0  ;;  %v3858_v38 = vsub.s32 (!%p4503_p5), 0, %v3857_v34  ;;  %v3862_v40 = vsub.s32 (!%p4503_p5), 1, %v3857_v34 }
 0x2a3   : > { %v3775_v53 = vadd.f32 %v4533_v44, %v1337_v42  ;;  %v4535_v54 = vadd.f32 %v3731_v52, %v3392_v50  ;;  %v3825_v42 = vld [vmem:[%s6029_s15 + $0x18] sm:$0xff] (!%p4503_p5) }
 0x2a4   : > { %3806 = vst [vmem:[%s6029_s15 + $0xa0] sm:$0xff] %v3774_v48  ;;  %v3776_v55 = vadd.f32 %v4534_v49, %v1338_v46  ;;  %v6432_v44 = vrot.slane (!%p4503_p5), %v3854_v35, %v3858_v38  ;;  %v6434_v45 = vrot.slane (!%p4503_p5), %v3898_v36, %v3858_v38  ;;  %v6436_v46 = vrot.slane (!%p4503_p5), %v3854_v35, %v3862_v40  ;;  %v3827_v48 = vld [vmem:[%s6029_s15 + $0x28] sm:$0xff] (!%p4503_p5)  ;;  %v3828_v49 = vld [vmem:[%s6029_s15 + $0x30] sm:$0xff] (!%p4503_p5)  ;;  %v3829_v50 = vld [vmem:[%s6029_s15 + $0x38] sm:$0xff] (!%p4503_p5) }
 0x2a5   : > { %3807 = vst [vmem:[%s6029_s15 + $0xa8] sm:$0xff] %v3775_v53  ;;  %v3777_v56 = vadd.f32 %v4535_v54, %v1339_v51  ;;  %v6438_v47 = vrot.slane (!%p4503_p5), %v3898_v36, %v3862_v40  ;;  %v3840_v33 = vld [vmem:[%s6029_s15 + $0x90] sm:$0xff] (!%p4503_p5) }
 0x2a6   : > { %3808 = vst [vmem:[%s6029_s15 + $0xb0] sm:$0xff] %v3776_v55  ;;  %v3396_v57 = vpop.f32.mrb[24].mxu1  ;;  %v3866_v51 = vmul.f32 (!%p4503_p5), %v6432_v44, %v3822_v37  ;;  %v3867_v52 = vmul.f32 (!%p4503_p5), %v6436_v46, %v3823_v39  ;;  %v3868_v53 = vmul.f32 (!%p4503_p5), %v6432_v44, %v3824_v41  ;;  %v3869_v54 = vmul.f32 (!%p4503_p5), %v6436_v46, %v3825_v42  ;;  %v3841_v38 = vld [vmem:[%s6029_s15 + $0x98] sm:$0xff] (!%p4503_p5) }
 0x2a7   : > { %3809 = vst [vmem:[%s6029_s15 + $0xb8] sm:$0xff] %v3777_v56  ;;  %v3735_v59 = vpop.f32.mrb[24].mxu0  ;;  %v3398_v61 = vpop.f32.mrb[25].mxu1  ;;  %v3870_v55 = vmul.f32 (!%p4503_p5), %v6432_v44, %v3826_v43  ;;  %v3871_v56 = vmul.f32 (!%p4503_p5), %v6436_v46, %v3827_v48 }
 0x2a8   : > { %v4536_v60 = vadd.f32 %v3735_v59, %v3396_v57  ;;  %v3737_v63 = vpop.f32.mrb[25].mxu0  ;;  %v3400_v1 = vpop.f32.mrb[26].mxu1  ;;  %v3872_v57 = vmul.f32 (!%p4503_p5), %v6432_v44, %v3828_v49  ;;  %v3910_v59 = vadd.f32 (!%p4503_p5), %v6434_v45, %v3866_v51 }
 0x2a9   : > { %v4537_v0 = vadd.f32 %v3737_v63, %v3398_v61  ;;  %v3739_v3 = vpop.f32.mrb[26].mxu0  ;;  %v3402_v6 = vpop.f32.mrb[27].mxu1  ;;  %v3912_v61 = vadd.f32 (!%p4503_p5), %v6434_v45, %v3868_v53  ;;  %v3830_v63 = vld [vmem:[%s6029_s15 + $0x40] sm:$0xff] (!%p4503_p5) }
 0x2aa   : > { %v3778_v4 = vadd.f32 %v4536_v60, %v1340_v58  ;;  %v4538_v5 = vadd.f32 %v3739_v3, %v3400_v1  ;;  %v3741_v8 = vpop.f32.mrb[27].mxu0  ;;  %v3873_v58 = vmul.f32 (!%p4503_p5), %v6436_v46, %v3829_v50  ;;  %v3911_v60 = vadd.f32 (!%p4503_p5), %v6438_v47, %v3867_v52  ;;  %v3832_v1 = vld [vmem:[%s6029_s15 + $0x50] sm:$0xff] (!%p4503_p5) }
 0x2ab   : > { %v3779_v9 = vadd.f32 %v4537_v0, %v1341_v62  ;;  %v4539_v10 = vadd.f32 %v3741_v8, %v3402_v6  ;;  %v3913_v62 = vadd.f32 (!%p4503_p5), %v6438_v47, %v3869_v54  ;;  %v3831_v0 = vld [vmem:[%s6029_s15 + $0x48] sm:$0xff] (!%p4503_p5)  ;;  %v3915_v3 = vadd.f32 (!%p4503_p5), %v6438_v47, %v3871_v56  ;;  %v3833_v6 = vld [vmem:[%s6029_s15 + $0x58] sm:$0xff] (!%p4503_p5)  ;;  %v3842_v39 = vld [vmem:[%s6029_s15 + $0xa0] sm:$0xff] (!%p4503_p5) }
 0x2ac   : > { %3810 = vst [vmem:[%s6029_s15 + $0xc0] sm:$0xff] %v3778_v4  ;;  %v3780_v11 = vadd.f32 %v4538_v5, %v1342_v2  ;;  %v3914_v2 = vadd.f32 (!%p4503_p5), %v6434_v45, %v3870_v55  ;;  %v3916_v4 = vadd.f32 (!%p4503_p5), %v6434_v45, %v3872_v57  ;;  %v3917_v5 = vadd.f32 (!%p4503_p5), %v6438_v47, %v3873_v58  ;;  %v3835_v8 = vld [vmem:[%s6029_s15 + $0x68] sm:$0xff] (!%p4503_p5) }
 0x2ad   : > { %3811 = vst [vmem:[%s6029_s15 + $0xc8] sm:$0xff] %v3779_v9  ;;  %v3781_v12 = vadd.f32 %v4539_v10, %v1343_v7  ;;  %v3834_v7 = vld [vmem:[%s6029_s15 + $0x60] sm:$0xff] (!%p4503_p5)  ;;  %v3942_v9 = vmax.f32 (!%p4503_p5), %v3910_v59, 0.0  ;;  %v3943_v10 = vmax.f32 (!%p4503_p5), %v3911_v60, 0.0  ;;  %v3843_v40 = vld [vmem:[%s6029_s15 + $0xa8] sm:$0xff] (!%p4503_p5)  ;;  %v3844_v49 = vld [vmem:[%s6029_s15 + $0xb0] sm:$0xff] (!%p4503_p5)  ;;  %v3884_v57 = vmul.f32 (!%p4503_p5), %v6432_v44, %v3840_v33 }
 0x2ae   : > { %3812 = vst [vmem:[%s6029_s15 + $0xd0] sm:$0xff] %v3780_v11  ;;  %v3406_v13 = vpop.f32.mrb[28].mxu1  ;;  %v3944_v11 = vmax.f32 (!%p4503_p5), %v3912_v61, 0.0  ;;  %v3845_v50 = vld [vmem:[%s6029_s15 + $0xb8] sm:$0xff] (!%p4503_p5)  ;;  %v3885_v58 = vmul.f32 (!%p4503_p5), %v6436_v46, %v3841_v38  ;;  %v3886_v59 = vmul.f32 (!%p4503_p5), %v6432_v44, %v3842_v39  ;;  %v3887_v60 = vmul.f32 (!%p4503_p5), %v6436_v46, %v3843_v40 }
 0x2af   : > { %3813 = vst [vmem:[%s6029_s15 + $0xd8] sm:$0xff] %v3781_v12  ;;  %v3745_v15 = vpop.f32.mrb[28].mxu0  ;;  %v3408_v17 = vpop.f32.mrb[29].mxu1  ;;  %v3945_v12 = vmax.f32 (!%p4503_p5), %v3913_v62, 0.0  ;;  %3974 = vst [vmem:[%s6029_s15] sm:$0xff] (!%p4503_p5), %v3942_v9  ;;  %v3888_v61 = vmul.f32 (!%p4503_p5), %v6432_v44, %v3844_v49  ;;  %v3889_v62 = vmul.f32 (!%p4503_p5), %v6436_v46, %v3845_v50 }
 0x2b0   : > { %v4540_v16 = vadd.f32 %v3745_v15, %v3406_v13  ;;  %v3747_v19 = vpop.f32.mrb[29].mxu0  ;;  %v3410_v21 = vpop.f32.mrb[30].mxu1  ;;  %v3836_v13 = vld [vmem:[%s6029_s15 + $0x70] sm:$0xff] (!%p4503_p5)  ;;  %v3946_v15 = vmax.f32 (!%p4503_p5), %v3914_v2, 0.0  ;;  %3975 = vst [vmem:[%s6029_s15 + $0x8] sm:$0xff] (!%p4503_p5), %v3943_v10  ;;  %3976 = vst [vmem:[%s6029_s15 + $0x10] sm:$0xff] (!%p4503_p5), %v3944_v11  ;;  %v3929_v2 = vadd.f32 (!%p4503_p5), %v6438_v47, %v3885_v58 }
 0x2b1   : > { %v4541_v20 = vadd.f32 %v3747_v19, %v3408_v17  ;;  %v3749_v23 = vpop.f32.mrb[30].mxu0  ;;  %v3412_v26 = vpop.f32.mrb[31].mxu1  ;;  %3821 = sbr.rel (%p4503_p5) target bundleno = 712 (0x2c8), region = 105  ;;  %v3948_v17 = vmax.f32 (!%p4503_p5), %v3916_v4, 0.0  ;;  %3977 = vst [vmem:[%s6029_s15 + $0x18] sm:$0xff] (!%p4503_p5), %v3945_v12  ;;  %v3874_v19 = vmul.f32 (!%p4503_p5), %v6432_v44, %v3830_v63  ;;  %v3933_v9 = vadd.f32 (!%p4503_p5), %v6438_v47, %v3889_v62 }
 0x2b2   : > { %v3782_v24 = vadd.f32 %v4540_v16, %v1344_v14  ;;  %v4542_v25 = vadd.f32 %v3749_v23, %v3410_v21  ;;  %v3751_v28 = vpop.f32.mrb[31].mxu0  ;;  %v3837_v14 = vld [vmem:[%s6029_s15 + $0x78] sm:$0xff] (!%p4503_p5)  ;;  %v3947_v16 = vmax.f32 (!%p4503_p5), %v3915_v3, 0.0  ;;  %v3876_v21 = vmul.f32 (!%p4503_p5), %v6432_v44, %v3832_v1  ;;  %3978 = vst [vmem:[%s6029_s15 + $0x20] sm:$0xff] (!%p4503_p5), %v3946_v15 }
 0x2b3   : > { %v3783_v29 = vadd.f32 %v4541_v20, %v1345_v18  ;;  %v4543_v30 = vadd.f32 %v3751_v28, %v3412_v26  ;;  %v3949_v18 = vmax.f32 (!%p4503_p5), %v3917_v5, 0.0  ;;  %v3875_v20 = vmul.f32 (!%p4503_p5), %v6436_v46, %v3831_v0  ;;  %3980 = vst [vmem:[%s6029_s15 + $0x30] sm:$0xff] (!%p4503_p5), %v3948_v17  ;;  %v3846_v3 = vld [vmem:[%s6029_s15 + $0xc0] sm:$0xff] (!%p4503_p5) }
 0x2b4   : > { %3814 = vst [vmem:[%s6029_s15 + $0xe0] sm:$0xff] %v3782_v24  ;;  %v3784_v31 = vadd.f32 %v4542_v25, %v1346_v22  ;;  %v3877_v22 = vmul.f32 (!%p4503_p5), %v6436_v46, %v3833_v6  ;;  %3979 = vst [vmem:[%s6029_s15 + $0x28] sm:$0xff] (!%p4503_p5), %v3947_v16  ;;  %v3878_v23 = vmul.f32 (!%p4503_p5), %v6432_v44, %v3834_v7  ;;  %v3847_v4 = vld [vmem:[%s6029_s15 + $0xc8] sm:$0xff] (!%p4503_p5)  ;;  %v3961_v16 = vmax.f32 (!%p4503_p5), %v3929_v2, 0.0 }
 0x2b5   : > { %3815 = vst [vmem:[%s6029_s15 + $0xe8] sm:$0xff] %v3783_v29  ;;  %v3785_v32 = vadd.f32 %v4543_v30, %v1347_v27  ;;  %3981 = vst [vmem:[%s6029_s15 + $0x38] sm:$0xff] (!%p4503_p5), %v3949_v18  ;;  %v3879_v24 = vmul.f32 (!%p4503_p5), %v6436_v46, %v3835_v8  ;;  %v3880_v25 = vmul.f32 (!%p4503_p5), %v6432_v44, %v3836_v13  ;;  %v3848_v5 = vld [vmem:[%s6029_s15 + $0xd0] sm:$0xff] (!%p4503_p5) }
 0x2b6   : > { %3816 = vst [vmem:[%s6029_s15 + $0xf0] sm:$0xff] %v3784_v31  ;;  %v3881_v26 = vmul.f32 (!%p4503_p5), %v6436_v46, %v3837_v14  ;;  %v3918_v27 = vadd.f32 (!%p4503_p5), %v6434_v45, %v3874_v19  ;;  %v3919_v28 = vadd.f32 (!%p4503_p5), %v6438_v47, %v3875_v20  ;;  %v3920_v29 = vadd.f32 (!%p4503_p5), %v6434_v45, %v3876_v21  ;;  %v3838_v31 = vld [vmem:[%s6029_s15 + $0x80] sm:$0xff] (!%p4503_p5)  ;;  %v3849_v10 = vld [vmem:[%s6029_s15 + $0xd8] sm:$0xff] (!%p4503_p5) }
 0x2b7   : > { %3817 = vst [vmem:[%s6029_s15 + $0xf8] sm:$0xff] %v3785_v32  ;;  %v3921_v30 = vadd.f32 (!%p4503_p5), %v6438_v47, %v3877_v22  ;;  %v3839_v32 = vld [vmem:[%s6029_s15 + $0x88] sm:$0xff] (!%p4503_p5)  ;;  %v3922_v34 = vadd.f32 (!%p4503_p5), %v6434_v45, %v3878_v23  ;;  %v3923_v35 = vadd.f32 (!%p4503_p5), %v6438_v47, %v3879_v24  ;;  %v3924_v36 = vadd.f32 (!%p4503_p5), %v6434_v45, %v3880_v25 }
 0x2b8   : > { %v3925_v37 = vadd.f32 %v6438_v47, %v3881_v26  ;;  %v3950_v41 = vmax.f32 %v3918_v27, 0.0  ;;  %v3951_v42 = vmax.f32 %v3919_v28, 0.0  ;;  %v3952_v43 = vmax.f32 %v3920_v29, 0.0  ;;  %3993 = vst [vmem:[%s6029_s15 + $0x98] sm:$0xff] %v3961_v16 }
 0x2b9   : > { %v3953_v48 = vmax.f32 %v3921_v30, 0.0  ;;  %v3954_v51 = vmax.f32 %v3922_v34, 0.0  ;;  %v3955_v52 = vmax.f32 %v3923_v35, 0.0  ;;  %v3956_v53 = vmax.f32 %v3924_v36, 0.0 }
 0x2ba   : > { %v3957_v54 = vmax.f32 %v3925_v37, 0.0  ;;  %3982 = vst [vmem:[%s6029_s15 + $0x40] sm:$0xff] %v3950_v41  ;;  %3983 = vst [vmem:[%s6029_s15 + $0x48] sm:$0xff] %v3951_v42  ;;  %v3882_v55 = vmul.f32 %v6432_v44, %v3838_v31  ;;  %v3883_v56 = vmul.f32 %v6436_v46, %v3839_v32  ;;  %v3928_v1 = vadd.f32 %v6434_v45, %v3884_v57 }
 0x2bb   : > { %3984 = vst [vmem:[%s6029_s15 + $0x50] sm:$0xff] %v3952_v43  ;;  %3985 = vst [vmem:[%s6029_s15 + $0x58] sm:$0xff] %v3953_v48  ;;  %v3930_v6 = vadd.f32 %v6434_v45, %v3886_v59  ;;  %v3931_v7 = vadd.f32 %v6438_v47, %v3887_v60  ;;  %v3932_v8 = vadd.f32 %v6434_v45, %v3888_v61  ;;  %v3850_v11 = vld [vmem:[%s6029_s15 + $0xe0] sm:$0xff]  ;;  %v3965_v22 = vmax.f32 %v3933_v9, 0.0 }
 0x2bc   : > { %3986 = vst [vmem:[%s6029_s15 + $0x60] sm:$0xff] %v3954_v51  ;;  %3987 = vst [vmem:[%s6029_s15 + $0x68] sm:$0xff] %v3955_v52  ;;  %v3926_v63 = vadd.f32 %v6434_v45, %v3882_v55  ;;  %v3927_v0 = vadd.f32 %v6438_v47, %v3883_v56  ;;  %v3851_v12 = vld [vmem:[%s6029_s15 + $0xe8] sm:$0xff]  ;;  %v3960_v15 = vmax.f32 %v3928_v1, 0.0  ;;  %v3890_v23 = vmul.f32 %v6432_v44, %v3846_v3 }
 0x2bd   : > { %3988 = vst [vmem:[%s6029_s15 + $0x70] sm:$0xff] %v3956_v53  ;;  %3989 = vst [vmem:[%s6029_s15 + $0x78] sm:$0xff] %v3957_v54  ;;  %v3852_v17 = vld [vmem:[%s6029_s15 + $0xf0] sm:$0xff]  ;;  %v3962_v19 = vmax.f32 %v3930_v6, 0.0  ;;  %v3963_v20 = vmax.f32 %v3931_v7, 0.0  ;;  %v3964_v21 = vmax.f32 %v3932_v8, 0.0  ;;  %v3891_v24 = vmul.f32 %v6436_v46, %v3847_v4 }
 0x2be   : > { %v3958_v13 = vmax.f32 %v3926_v63, 0.0  ;;  %v3959_v14 = vmax.f32 %v3927_v0, 0.0  ;;  %v3853_v18 = vld [vmem:[%s6029_s15 + $0xf8] sm:$0xff]  ;;  %3992 = vst [vmem:[%s6029_s15 + $0x90] sm:$0xff] %v3960_v15  ;;  %v3892_v25 = vmul.f32 %v6432_v44, %v3848_v5  ;;  %v3893_v26 = vmul.f32 %v6436_v46, %v3849_v10  ;;  %3997 = vst [vmem:[%s6029_s15 + $0xb8] sm:$0xff] %v3965_v22 }
 0x2bf   : > { %3994 = vst [vmem:[%s6029_s15 + $0xa0] sm:$0xff] %v3962_v19  ;;  %3995 = vst [vmem:[%s6029_s15 + $0xa8] sm:$0xff] %v3963_v20  ;;  %v3894_v27 = vmul.f32 %v6432_v44, %v3850_v11  ;;  %v3895_v28 = vmul.f32 %v6436_v46, %v3851_v12  ;;  %v3896_v29 = vmul.f32 %v6432_v44, %v3852_v17 }
 0x2c0   : > { %3990 = vst [vmem:[%s6029_s15 + $0x80] sm:$0xff] %v3958_v13  ;;  %3991 = vst [vmem:[%s6029_s15 + $0x88] sm:$0xff] %v3959_v14  ;;  %v3897_v30 = vmul.f32 %v6436_v46, %v3853_v18  ;;  %v3934_v31 = vadd.f32 %v6434_v45, %v3890_v23  ;;  %v3935_v32 = vadd.f32 %v6438_v47, %v3891_v24 }
 0x2c1   : > { %3996 = vst [vmem:[%s6029_s15 + $0xb0] sm:$0xff] %v3964_v21  ;;  %v3936_v33 = vadd.f32 %v6434_v45, %v3892_v25  ;;  %v3937_v34 = vadd.f32 %v6438_v47, %v3893_v26  ;;  %v3938_v35 = vadd.f32 %v6434_v45, %v3894_v27  ;;  %v3939_v36 = vadd.f32 %v6438_v47, %v3895_v28 }
 0x2c2   : > { %v3940_v44 = vadd.f32 %v6434_v45, %v3896_v29  ;;  %v3941_v46 = vadd.f32 %v6438_v47, %v3897_v30  ;;  %v3966_v37 = vmax.f32 %v3934_v31, 0.0  ;;  %v3967_v38 = vmax.f32 %v3935_v32, 0.0 }
 0x2c3   : > { %v3968_v39 = vmax.f32 %v3936_v33, 0.0  ;;  %v3969_v40 = vmax.f32 %v3937_v34, 0.0  ;;  %v3970_v41 = vmax.f32 %v3938_v35, 0.0  ;;  %v3971_v42 = vmax.f32 %v3939_v36, 0.0 }
 0x2c4   : > { %v3972_v43 = vmax.f32 %v3940_v44, 0.0  ;;  %v3973_v48 = vmax.f32 %v3941_v46, 0.0  ;;  %3998 = vst [vmem:[%s6029_s15 + $0xc0] sm:$0xff] %v3966_v37  ;;  %3999 = vst [vmem:[%s6029_s15 + $0xc8] sm:$0xff] %v3967_v38 }
 0x2c5   : > { %4000 = vst [vmem:[%s6029_s15 + $0xd0] sm:$0xff] %v3968_v39  ;;  %4001 = vst [vmem:[%s6029_s15 + $0xd8] sm:$0xff] %v3969_v40 }
 0x2c6   : > { %4002 = vst [vmem:[%s6029_s15 + $0xe0] sm:$0xff] %v3970_v41  ;;  %4003 = vst [vmem:[%s6029_s15 + $0xe8] sm:$0xff] %v3971_v42 }
 0x2c7   : > { %4004 = vst [vmem:[%s6029_s15 + $0xf0] sm:$0xff] %v3972_v43  ;;  %4005 = vst [vmem:[%s6029_s15 + $0xf8] sm:$0xff] %v3973_v48 }
 0x2c8 PF: > { %4012 = sbr.rel (!%p5405_p12) target bundleno = 730 (0x2da), region = 109  ;;  %s4511_s27 = sshll.u32 (%p5405_p12), %s5271_s22, 4  ;;  %v4028_v45 = vld [vmem:[%s6029_s15] sm:$0xff] (%p5405_p12)  ;;  %v4030_v47 = vld [vmem:[%s6029_s15 + $0x8] sm:$0xff] (%p5405_p12)  ;;  %v4032_v49 = vld [vmem:[%s6029_s15 + $0x10] sm:$0xff] (%p5405_p12) }
 0x2c9   : > { %s6572_s29 = scalar_lea.vmem (%p5405_p12), %s6672_s4, %s4511_s27  ;;  %v4034_v50 = vld [vmem:[%s6029_s15 + $0x18] sm:$0xff] (%p5405_p12)  ;;  %v4036_v51 = vld [vmem:[%s6029_s15 + $0x20] sm:$0xff] (%p5405_p12)  ;;  %v4046_v56 = vld [vmem:[%s6029_s15 + $0x48] sm:$0xff] (%p5405_p12) }
 0x2ca   : > { %4029 = vst [vmem:[%s6572_s29] sm:$0xff] (%p5405_p12), %v4028_v45  ;;  %4031 = vst [vmem:[%s6572_s29 + $0x8] sm:$0xff] (%p5405_p12), %v4030_v47  ;;  %v4040_v53 = vld [vmem:[%s6029_s15 + $0x30] sm:$0xff] (%p5405_p12)  ;;  %v4044_v55 = vld [vmem:[%s6029_s15 + $0x40] sm:$0xff] (%p5405_p12) }
 0x2cb   : > { %v4038_v52 = vld [vmem:[%s6029_s15 + $0x28] sm:$0xff] (%p5405_p12)  ;;  %4033 = vst [vmem:[%s6572_s29 + $0x20] sm:$0xff] (%p5405_p12), %v4032_v49  ;;  %4035 = vst [vmem:[%s6572_s29 + $0x28] sm:$0xff] (%p5405_p12), %v4034_v50  ;;  %v4048_v57 = vld [vmem:[%s6029_s15 + $0x50] sm:$0xff] (%p5405_p12) }
 0x2cc   : > { %4037 = vst [vmem:[%s6572_s29 + $0x40] sm:$0xff] (%p5405_p12), %v4036_v51  ;;  %4039 = vst [vmem:[%s6572_s29 + $0x48] sm:$0xff] (%p5405_p12), %v4038_v52  ;;  %v4042_v54 = vld [vmem:[%s6029_s15 + $0x38] sm:$0xff] (%p5405_p12)  ;;  %v4052_v59 = vld [vmem:[%s6029_s15 + $0x60] sm:$0xff] (%p5405_p12) }
 0x2cd   : > { %4041 = vst [vmem:[%s6572_s29 + $0x60] sm:$0xff] (%p5405_p12), %v4040_v53  ;;  %4043 = vst [vmem:[%s6572_s29 + $0x68] sm:$0xff] (%p5405_p12), %v4042_v54  ;;  %v4050_v58 = vld [vmem:[%s6029_s15 + $0x58] sm:$0xff] (%p5405_p12)  ;;  %v4054_v60 = vld [vmem:[%s6029_s15 + $0x68] sm:$0xff] (%p5405_p12) }
 0x2ce   : > { %4045 = vst [vmem:[%s6572_s29 + $0x80] sm:$0xff] (%p5405_p12), %v4044_v55  ;;  %4047 = vst [vmem:[%s6572_s29 + $0x88] sm:$0xff] (%p5405_p12), %v4046_v56  ;;  %v4056_v61 = vld [vmem:[%s6029_s15 + $0x70] sm:$0xff] (%p5405_p12)  ;;  %v4058_v62 = vld [vmem:[%s6029_s15 + $0x78] sm:$0xff] (%p5405_p12) }
 0x2cf   : > { %4049 = vst [vmem:[%s6572_s29 + $0xa0] sm:$0xff] %v4048_v57  ;;  %4051 = vst [vmem:[%s6572_s29 + $0xa8] sm:$0xff] %v4050_v58  ;;  %v4060_v63 = vld [vmem:[%s6029_s15 + $0x80] sm:$0xff]  ;;  %v4062_v0 = vld [vmem:[%s6029_s15 + $0x88] sm:$0xff] }
 0x2d0   : > { %4053 = vst [vmem:[%s6572_s29 + $0xc0] sm:$0xff] %v4052_v59  ;;  %4055 = vst [vmem:[%s6572_s29 + $0xc8] sm:$0xff] %v4054_v60  ;;  %v4064_v1 = vld [vmem:[%s6029_s15 + $0x90] sm:$0xff]  ;;  %v4066_v2 = vld [vmem:[%s6029_s15 + $0x98] sm:$0xff] }
 0x2d1   : > { %4057 = vst [vmem:[%s6572_s29 + $0xe0] sm:$0xff] %v4056_v61  ;;  %4059 = vst [vmem:[%s6572_s29 + $0xe8] sm:$0xff] %v4058_v62  ;;  %v4068_v3 = vld [vmem:[%s6029_s15 + $0xa0] sm:$0xff]  ;;  %v4070_v4 = vld [vmem:[%s6029_s15 + $0xa8] sm:$0xff] }
 0x2d2   : > { %4061 = vst [vmem:[%s6572_s29 + $0x100] sm:$0xff] %v4060_v63  ;;  %4063 = vst [vmem:[%s6572_s29 + $0x108] sm:$0xff] %v4062_v0  ;;  %v4072_v5 = vld [vmem:[%s6029_s15 + $0xb0] sm:$0xff]  ;;  %v4074_v6 = vld [vmem:[%s6029_s15 + $0xb8] sm:$0xff] }
 0x2d3   : > { %4065 = vst [vmem:[%s6572_s29 + $0x120] sm:$0xff] %v4064_v1  ;;  %4067 = vst [vmem:[%s6572_s29 + $0x128] sm:$0xff] %v4066_v2  ;;  %v4076_v7 = vld [vmem:[%s6029_s15 + $0xc0] sm:$0xff]  ;;  %v4078_v8 = vld [vmem:[%s6029_s15 + $0xc8] sm:$0xff] }
 0x2d4   : > { %4069 = vst [vmem:[%s6572_s29 + $0x140] sm:$0xff] %v4068_v3  ;;  %4071 = vst [vmem:[%s6572_s29 + $0x148] sm:$0xff] %v4070_v4  ;;  %v4080_v9 = vld [vmem:[%s6029_s15 + $0xd0] sm:$0xff]  ;;  %v4082_v10 = vld [vmem:[%s6029_s15 + $0xd8] sm:$0xff] }
 0x2d5   : > { %4073 = vst [vmem:[%s6572_s29 + $0x160] sm:$0xff] %v4072_v5  ;;  %4075 = vst [vmem:[%s6572_s29 + $0x168] sm:$0xff] %v4074_v6  ;;  %v4084_v11 = vld [vmem:[%s6029_s15 + $0xe0] sm:$0xff]  ;;  %v4086_v12 = vld [vmem:[%s6029_s15 + $0xe8] sm:$0xff] }
 0x2d6   : > { %4077 = vst [vmem:[%s6572_s29 + $0x180] sm:$0xff] %v4076_v7  ;;  %4079 = vst [vmem:[%s6572_s29 + $0x188] sm:$0xff] %v4078_v8  ;;  %v4088_v13 = vld [vmem:[%s6029_s15 + $0xf0] sm:$0xff]  ;;  %v4090_v14 = vld [vmem:[%s6029_s15 + $0xf8] sm:$0xff] }
 0x2d7   : > { %4081 = vst [vmem:[%s6572_s29 + $0x1a0] sm:$0xff] %v4080_v9  ;;  %4083 = vst [vmem:[%s6572_s29 + $0x1a8] sm:$0xff] %v4082_v10 }
 0x2d8   : > { %4085 = vst [vmem:[%s6572_s29 + $0x1c0] sm:$0xff] %v4084_v11  ;;  %4087 = vst [vmem:[%s6572_s29 + $0x1c8] sm:$0xff] %v4086_v12 }
 0x2d9   : > { %4089 = vst [vmem:[%s6572_s29 + $0x1e0] sm:$0xff] %v4088_v13  ;;  %4091 = vst [vmem:[%s6572_s29 + $0x1e8] sm:$0xff] %v4090_v14 }
 0x2da PF: > { %s14_s25 = sadd.s32 1, %s5283_s25   ;;  %s6684_s14 = sld [smem:[#allocation5_spill]] }
 0x2db   : > { %p11_p6 = scmp.ge.s32.totalorder %s14_s25, 8   ;;  %s6685_s30 = sld [smem:[#allocation6_spill]] }
 0x2dc   : > { %s6686_s15 = smov %s5247_s16  ;;  %s6687_s16 = smov %s5403_s13 }
 0x2dd   : > { %s6688_s17 = smov %s5255_s18  ;;  %s6689_s18 = smov %s5400_s12 }
 0x2de   : > { %s6690_s19 = smov %s5263_s20  ;;  %s6691_s20 = smov %s5386_s7 }
 0x2df   : > { %s6692_s21 = smov %s5275_s23  ;;  %s6693_s22 = smov %s5279_s24 }
 0x2e0   : > { %s6694_s23 = smov %s6684_s14  ;;  %13 = sbr.rel (!%p11_p6) target bundleno = 9 (0x9), region = 177 }
 0x2e1   : > { %s6695_s24 = smov %s6685_s30 }

// kernel: netd3_forward.3
= control target key start
LH: loop header
LB: loop body
LE: loop exit
PB: predicated region body
PF: predicated region fallthrough
CT: control target
= control target key end

     0   :  { %17 = vsyncpa [#allocation3], 0  ;;  %s8870_s0 = inlined_call_operand.vmem [shape: bf16[32,4608], index: 0, kind: input, shape index: {}]   ;;  %s8871_s1 = inlined_call_operand.vmem [shape: bf16[4608,128], index: 1, kind: input, shape index: {}]   ;;  %s8872_s2 = inlined_call_operand.vmem [shape: f32[1,128], index: 2, kind: input, shape index: {}]   ;;  %s8873_s3 = inlined_call_operand.vmem [shape: f32[1,128], index: 3, kind: input, shape index: {}]   ;;  %s8874_s4 = inlined_call_operand.vmem [shape: bf16[9,8,32], index: 4, kind: input, shape index: {}]   ;;  %s8875_s5 = inlined_call_operand.vmem [shape: bf16[1152,128], index: 5, kind: input, shape index: {}]   ;;  %s8876_s6 = inlined_call_operand.vmem [shape: f32[1,128], index: 6, kind: input, shape index: {}]   ;;  %s8877_s7 = inlined_call_operand.vmem [shape: f32[1,128], index: 7, kind: input, shape index: {}]   ;;  %s8878_s8 = inlined_call_operand.vmem [shape: f32[128,2], index: 8, kind: input, shape index: {}]   ;;  %s8879_s9 = inlined_call_operand.vmem [shape: f32[1,2], index: 9, kind: input, shape index: {}]   ;;  %s8880_s10 = inlined_call_operand.hbm [shape: f32[2,2], index: 10, kind: output, shape index: {0}]   ;;  %s8881_s11 = inlined_call_operand.hbm [shape: f32[2,128], index: 11, kind: output, shape index: {1}]  }
   0x1   :  { %v6638_v0 = vld [vmem:[%s8871_s1 + $0x40] sm:$0xff]   ;;  %v6640_v2 = vld [vmem:[%s8871_s1 + $0x48] sm:$0xff]   ;;  %v6642_v4 = vld [vmem:[%s8871_s1 + $0x50] sm:$0xff]  }
   0x2   :  { %v6639_v1 = vld [vmem:[%s8871_s1] sm:$0xff]   ;;  %5661 = vmatprep.subr.bf16.mxu1 %v6638_v0  ;;  %v6641_v3 = vld [vmem:[%s8871_s1 + $0x8] sm:$0xff]   ;;  %v6643_v5 = vld [vmem:[%s8871_s1 + $0x10] sm:$0xff]  }
   0x3   :  { %5662 = vmatpush3.bf16.msra.mxu1 %v6639_v1  ;;  %v6644_v6 = vld [vmem:[%s8871_s1 + $0x58] sm:$0xff]   ;;  %v6646_v8 = vld [vmem:[%s8871_s1 + $0x60] sm:$0xff]   ;;  %v6648_v10 = vld [vmem:[%s8871_s1 + $0x68] sm:$0xff]  }
   0x4   :  { %5663 = vmatprep.subr.bf16.mxu1 %v6640_v2  ;;  %v6645_v7 = vld [vmem:[%s8871_s1 + $0x18] sm:$0xff]   ;;  %v6647_v9 = vld [vmem:[%s8871_s1 + $0x20] sm:$0xff]   ;;  %v6649_v12 = vld [vmem:[%s8871_s1 + $0x28] sm:$0xff]  }
   0x5   :  { %v6656_v11 = vld [vmem:[%s8870_s0 + $0x4] ss:$144 sps:$4 sm:$0xff]   ;;  %v6652_v15 = vld [vmem:[%s8871_s1 + $0x78] sm:$0xff]   ;;  %v6654_v18 = vld [vmem:[%s8870_s0] ss:$144 sps:$4 sm:$0xff]  }
   0x6   :  { %2808 = vmatprep.mubr.bf16.mxu1 %v6656_v11  ;;  %v6650_v13 = vld [vmem:[%s8871_s1 + $0x70] sm:$0xff]   ;;  %v6653_v16 = vld [vmem:[%s8871_s1 + $0x38] sm:$0xff]   ;;  %v6657_v17 = vld [vmem:[%s8871_s1 + $0xc0] sm:$0xff]  }
   0x7   :  { %5664 = vmatpush3.bf16.msra.mxu1 %v6641_v3  ;;  %v6651_v14 = vld [vmem:[%s8871_s1 + $0x30] sm:$0xff]   ;;  %v6658_v19 = vld [vmem:[%s8871_s1 + $0x80] sm:$0xff]   ;;  %v6659_v21 = vld [vmem:[%s8871_s1 + $0xc8] sm:$0xff]  }
   0x8   :  { %5665 = vmatprep.subr.bf16.mxu1 %v6642_v4  ;;  %v6668_v20 = vld [vmem:[%s8870_s0 + $0x124] ss:$144 sps:$4 sm:$0xff]   ;;  %v6660_v22 = vld [vmem:[%s8871_s1 + $0x88] sm:$0xff]   ;;  %v6671_v25 = vld [vmem:[%s8870_s0 + $0x120] ss:$144 sps:$4 sm:$0xff]  }
   0x9   :  { %v6661_v23 = vld [vmem:[%s8871_s1 + $0xd0] sm:$0xff]   ;;  %v6678_v26 = vld [vmem:[%s8870_s0 + $0xc] ss:$144 sps:$4 sm:$0xff]   ;;  %v6665_v29 = vld [vmem:[%s8871_s1 + $0xe0] sm:$0xff]  }
   0xa   :  { %v6662_v24 = vld [vmem:[%s8871_s1 + $0x90] sm:$0xff]   ;;  %v6663_v27 = vld [vmem:[%s8871_s1 + $0xd8] sm:$0xff]   ;;  %v6666_v30 = vld [vmem:[%s8871_s1 + $0xa0] sm:$0xff]  }
   0xb   :  { %5666 = vmatpush3.bf16.msra.mxu1 %v6643_v5  ;;  %v6664_v28 = vld [vmem:[%s8871_s1 + $0x98] sm:$0xff]   ;;  %v6667_v31 = vld [vmem:[%s8871_s1 + $0xe8] sm:$0xff]   ;;  %v6672_v33 = vld [vmem:[%s8871_s1 + $0xf0] sm:$0xff]  }
   0xc   :  { %5667 = vmatprep.subr.bf16.mxu1 %v6644_v6  ;;  %v6670_v32 = vld [vmem:[%s8871_s1 + $0xa8] sm:$0xff]   ;;  %v6673_v34 = vld [vmem:[%s8871_s1 + $0xb0] sm:$0xff]   ;;  %v6674_v35 = vld [vmem:[%s8871_s1 + $0xf8] sm:$0xff]  }
   0xd   :  { %v6675_v36 = vld [vmem:[%s8871_s1 + $0xb8] sm:$0xff]   ;;  %v6679_v37 = vld [vmem:[%s8871_s1 + $0x140] sm:$0xff]   ;;  %v6681_v41 = vld [vmem:[%s8871_s1 + $0x148] sm:$0xff]  }
   0xe   :  { %v6676_v38 = vld [vmem:[%s8870_s0 + $0x8] ss:$144 sps:$4 sm:$0xff]   ;;  %v6680_v39 = vld [vmem:[%s8871_s1 + $0x100] sm:$0xff]   ;;  %v6683_v40 = vld [vmem:[%s8870_s0 + $0x12c] ss:$144 sps:$4 sm:$0xff]  }
   0xf   :  { %5668 = vmatpush3.bf16.msra.mxu1 %v6645_v7  ;;  %v6682_v42 = vld [vmem:[%s8871_s1 + $0x108] sm:$0xff]   ;;  %v6686_v43 = vld [vmem:[%s8871_s1 + $0x150] sm:$0xff]   ;;  %v6688_v47 = vld [vmem:[%s8871_s1 + $0x158] sm:$0xff]  }
  0x10   :  { %5669 = vmatprep.subr.bf16.mxu1 %v6646_v8  ;;  %v6685_v44 = vld [vmem:[%s8870_s0 + $0x128] ss:$144 sps:$4 sm:$0xff]   ;;  %v6687_v45 = vld [vmem:[%s8871_s1 + $0x110] sm:$0xff]   ;;  %v6690_v49 = vld [vmem:[%s8871_s1 + $0x160] sm:$0xff]  }
  0x11   :  { %v6700_v46 = vld [vmem:[%s8870_s0 + $0x14] ss:$144 sps:$4 sm:$0xff]   ;;  %v6689_v48 = vld [vmem:[%s8871_s1 + $0x118] sm:$0xff]   ;;  %v6692_v51 = vld [vmem:[%s8871_s1 + $0x168] sm:$0xff]  }
  0x12   :  { %v6691_v50 = vld [vmem:[%s8871_s1 + $0x120] sm:$0xff]   ;;  %v6693_v52 = vld [vmem:[%s8871_s1 + $0x128] sm:$0xff]   ;;  %v6694_v53 = vld [vmem:[%s8871_s1 + $0x170] sm:$0xff]  }
  0x13   :  { %5670 = vmatpush3.bf16.msra.mxu1 %v6647_v9  ;;  %v6695_v54 = vld [vmem:[%s8871_s1 + $0x130] sm:$0xff]   ;;  %v6696_v55 = vld [vmem:[%s8871_s1 + $0x178] sm:$0xff]   ;;  %v6701_v58 = vld [vmem:[%s8871_s1 + $0x1c0] sm:$0xff]  }
  0x14   :  { %5671 = vmatprep.subr.bf16.mxu1 %v6648_v10  ;;  %v6697_v56 = vld [vmem:[%s8871_s1 + $0x138] sm:$0xff]   ;;  %v6698_v57 = vld [vmem:[%s8870_s0 + $0x10] ss:$144 sps:$4 sm:$0xff]   ;;  %v6705_v60 = vld [vmem:[%s8870_s0 + $0x134] ss:$144 sps:$4 sm:$0xff]  }
  0x15   :  { %v6702_v59 = vld [vmem:[%s8871_s1 + $0x180] sm:$0xff]   ;;  %v6703_v63 = vld [vmem:[%s8871_s1 + $0x1c8] sm:$0xff]   ;;  %v6708_v2 = vld [vmem:[%s8871_s1 + $0x1d0] sm:$0xff]  }
  0x16   :  { %v6747_v61 = vld [vmem:[%s8871_s1 + $0x340] sm:$0xff]   ;;  %v6704_v0 = vld [vmem:[%s8871_s1 + $0x188] sm:$0xff]   ;;  %v6709_v5 = vld [vmem:[%s8871_s1 + $0x190] sm:$0xff]  }
  0x17   :  { %5672 = vmatpush3.bf16.msra.mxu1 %v6649_v12  ;;  %v6748_v62 = vld [vmem:[%s8871_s1 + $0x300] sm:$0xff]   ;;  %5829 = vmatprep.subr.bf16.mxu0 %v6747_v61  ;;  %v6751_v1 = vld [vmem:[%s8871_s1 + $0x348] sm:$0xff]   ;;  %v6710_v6 = vld [vmem:[%s8871_s1 + $0x1d8] sm:$0xff]  }
  0x18   :  { %5673 = vmatprep.subr.bf16.mxu1 %v6650_v13  ;;  %5830 = vmatpush3.bf16.msra.mxu0 %v6748_v62  ;;  %v6707_v3 = vld [vmem:[%s8870_s0 + $0x130] ss:$144 sps:$4 sm:$0xff]   ;;  %v6754_v4 = vld [vmem:[%s8871_s1 + $0x308] sm:$0xff]   ;;  %v6711_v10 = vld [vmem:[%s8871_s1 + $0x198] sm:$0xff]  }
  0x19   :  { %5831 = vmatprep.subr.bf16.mxu0 %v6751_v1  ;;  %v6722_v7 = vld [vmem:[%s8870_s0 + $0x1c] ss:$144 sps:$4 sm:$0xff]   ;;  %v6758_v8 = vld [vmem:[%s8871_s1 + $0x350] sm:$0xff]   ;;  %v6712_v11 = vld [vmem:[%s8871_s1 + $0x1e0] sm:$0xff]  }
  0x1a   :  { %v6759_v9 = vld [vmem:[%s8871_s1 + $0x310] sm:$0xff]   ;;  %v6762_v12 = vld [vmem:[%s8871_s1 + $0x358] sm:$0xff]   ;;  %v6814_v62 = vld [vmem:[%s8871_s1 + $0x468] sm:$0xff]  }
  0x1b   :  { %5674 = vmatpush3.bf16.msra.mxu1 %v6651_v14  ;;  %v6763_v13 = vld [vmem:[%s8871_s1 + $0x318] sm:$0xff]   ;;  %v6713_v14 = vld [vmem:[%s8871_s1 + $0x1a0] sm:$0xff]  }
  0x1c   :  { %5675 = vmatprep.subr.bf16.mxu1 %v6652_v15  ;;  %5832 = vmatpush3.bf16.msra.mxu0 %v6754_v4  ;;  %v6714_v15 = vld [vmem:[%s8871_s1 + $0x1e8] sm:$0xff]   ;;  %v6740_v61 = vld [vmem:[%s8871_s1 + $0x278] sm:$0xff]   ;;  %v6742_v1 = vld [vmem:[%s8870_s0 + $0x20] ss:$144 sps:$4 sm:$0xff]  }
  0x1d   :  { %5833 = vmatprep.subr.bf16.mxu0 %v6758_v8  ;;  %v6818_v4 = vld [vmem:[%s8871_s1 + $0x470] sm:$0xff]   ;;  %v6822_v8 = vld [vmem:[%s8871_s1 + $0x478] sm:$0xff]  }
  0x1f   :  { %5676 = vmatpush3.bf16.msra.mxu1 %v6653_v16  ;;  %v6766_v16 = vld [vmem:[%s8871_s1 + $0x360] sm:$0xff]  }
  0x20   :  { %5689 = vmatprep.subr.bf16.mxu1 %v6657_v17  ;;  %5834 = vmatpush3.bf16.msra.mxu0 %v6759_v9  ;;  %v6767_v17 = vld [vmem:[%s8871_s1 + $0x320] sm:$0xff]   ;;  %v6750_v9 = vld [vmem:[%s8871_s1 + $0x288] sm:$0xff]  }
  0x21   :  { %5835 = vmatprep.subr.bf16.mxu0 %v6762_v12  ;;  %v6756_v12 = vld [vmem:[%s8871_s1 + $0x2d0] sm:$0xff]  }
  0x22   :  { %2809 = vmatmul.mubr.bf16.vlgmr.msra.gmra.mrb[0].mxu1 %v6654_v18  ;;  %v6715_v18 = vld [vmem:[%s8871_s1 + $0x1a8] sm:$0xff]  }
  0x23   :  { %5690 = vmatpush3.bf16.msra.mxu1 %v6658_v19  ;;  %2816 = vmatprep.mubr.bf16.mxu1 %v6668_v20  ;;  %v6716_v19 = vld [vmem:[%s8871_s1 + $0x1f0] sm:$0xff]   ;;  %v6770_v20 = vld [vmem:[%s8871_s1 + $0x368] sm:$0xff]  }
  0x24   :  { %5691 = vmatprep.subr.bf16.mxu1 %v6659_v21  ;;  %5836 = vmatpush3.bf16.msra.mxu0 %v6763_v13  ;;  %v6771_v21 = vld [vmem:[%s8871_s1 + $0x328] sm:$0xff]   ;;  %v6757_v13 = vld [vmem:[%s8871_s1 + $0x290] sm:$0xff]  }
  0x25   :  { %5837 = vmatprep.subr.bf16.mxu0 %v6766_v16  ;;  %v6830_v16 = vld [vmem:[%s8870_s0 + $0x44] ss:$144 sps:$4 sm:$0xff]  }
  0x27   :  { %5692 = vmatpush3.bf16.msra.mxu1 %v6660_v22  ;;  %v6717_v22 = vld [vmem:[%s8871_s1 + $0x1b0] sm:$0xff]  }
  0x28   :  { %5693 = vmatprep.subr.bf16.mxu1 %v6661_v23  ;;  %5838 = vmatpush3.bf16.msra.mxu0 %v6767_v17  ;;  %v6718_v23 = vld [vmem:[%s8871_s1 + $0x1f8] sm:$0xff]  }
  0x29   :  { %5839 = vmatprep.subr.bf16.mxu0 %v6770_v20  ;;  %v6781_v17 = vld [vmem:[%s8870_s0 + $0x2c] ss:$144 sps:$4 sm:$0xff]  }
  0x2a   :  { %2817 = vmatmul.mubr.bf16.gmra.mrb[4].mxu1 %v6671_v25  ;;  %v6775_v25 = vld [vmem:[%s8871_s1 + $0x330] sm:$0xff]   ;;  %v6761_v20 = vld [vmem:[%s8871_s1 + $0x298] sm:$0xff]  }
  0x2b   :  { %5694 = vmatpush3.bf16.msra.mxu1 %v6662_v24  ;;  %2857 = vmatprep.mubr.bf16.mxu1 %v6678_v26  ;;  %v6774_v24 = vld [vmem:[%s8871_s1 + $0x370] sm:$0xff]   ;;  %v6719_v26 = vld [vmem:[%s8871_s1 + $0x1b8] sm:$0xff]  }
  0x2c   :  { %5695 = vmatprep.subr.bf16.mxu1 %v6663_v27  ;;  %5840 = vmatpush3.bf16.msra.mxu0 %v6771_v21  ;;  %v6723_v27 = vld [vmem:[%s8871_s1 + $0x240] sm:$0xff]  }
  0x2d   :  { %5841 = vmatprep.subr.bf16.mxu0 %v6774_v24  ;;  %v6764_v21 = vld [vmem:[%s8871_s1 + $0x2e0] sm:$0xff]   ;;  %v6839_v24 = vld [vmem:[%s8871_s1 + $0x508] sm:$0xff]  }
  0x2f   :  { %5696 = vmatpush3.bf16.msra.mxu1 %v6664_v28  ;;  %v6778_v28 = vld [vmem:[%s8871_s1 + $0x378] sm:$0xff]  }
  0x30   :  { %5697 = vmatprep.subr.bf16.mxu1 %v6665_v29  ;;  %5842 = vmatpush3.bf16.msra.mxu0 %v6775_v25  ;;  %v6720_v29 = vld [vmem:[%s8870_s0 + $0x18] ss:$144 sps:$4 sm:$0xff]  }
  0x31   :  { %5843 = vmatprep.subr.bf16.mxu0 %v6778_v28  ;;  %v6768_v25 = vld [vmem:[%s8871_s1 + $0x2e8] sm:$0xff]   ;;  %v6845_v28 = vld [vmem:[%s8870_s0 + $0x160] ss:$144 sps:$4 sm:$0xff]  }
  0x33   :  { %5698 = vmatpush3.bf16.msra.mxu1 %v6666_v30  ;;  %v6724_v30 = vld [vmem:[%s8871_s1 + $0x200] sm:$0xff]  }
  0x34   :  { %5699 = vmatprep.subr.bf16.mxu1 %v6667_v31  ;;  %v6725_v31 = vld [vmem:[%s8871_s1 + $0x248] sm:$0xff]  }
  0x37   :  { %5700 = vmatpush3.bf16.msra.mxu1 %v6670_v32  ;;  %v6782_v32 = vld [vmem:[%s8871_s1 + $0x338] sm:$0xff]  }
  0x38   :  { %5701 = vmatprep.subr.bf16.mxu1 %v6672_v33  ;;  %v6727_v33 = vld [vmem:[%s8870_s0 + $0x13c] ss:$144 sps:$4 sm:$0xff]   ;;  %5844 = vmatpush3.bf16.msra.mxu0 %v6782_v32  ;;  %v6773_v32 = vld [vmem:[%s8871_s1 + $0x2b0] sm:$0xff]  }
  0x3b   :  { %5702 = vmatpush3.bf16.msra.mxu1 %v6673_v34  ;;  %v6784_v34 = vld [vmem:[%s8870_s0 + $0x30] ss:$144 sps:$4 sm:$0xff]  }
  0x3c   :  { %5703 = vmatprep.subr.bf16.mxu1 %v6674_v35  ;;  %v6786_v35 = vld [vmem:[%s8870_s0 + $0x34] ss:$144 sps:$4 sm:$0xff]  }
  0x3d   :  { %3102 = vmatprep.mubr.bf16.mxu0 %v6786_v35  ;;  %v6776_v35 = vld [vmem:[%s8871_s1 + $0x2f8] sm:$0xff]  }
  0x3e   :  { %3103 = vmatmul.mubr.bf16.vlgmr.msra.gmra.mrb[0].mxu0 %v6784_v34  ;;  %v6851_v34 = vld [vmem:[%s8871_s1 + $0x518] sm:$0xff]  }
  0x3f   :  { %5704 = vmatpush3.bf16.msra.mxu1 %v6675_v36  ;;  %v6726_v36 = vld [vmem:[%s8871_s1 + $0x208] sm:$0xff]  }
  0x40   :  { %5717 = vmatprep.subr.bf16.mxu1 %v6679_v37  ;;  %v6788_v37 = vld [vmem:[%s8871_s1 + $0x440] sm:$0xff]  }
  0x41   :  { %5885 = vmatprep.subr.bf16.mxu0 %v6788_v37  ;;  %v6854_v37 = vld [vmem:[%s8871_s1 + $0x560] sm:$0xff]  }
  0x42   :  { %2858 = vmatmul.mubr.bf16.vlgmr.msra.gmra.mrb[8].mxu1 %v6676_v38  ;;  %v6789_v38 = vld [vmem:[%s8871_s1 + $0x400] sm:$0xff]  }
  0x43   :  { %5718 = vmatpush3.bf16.msra.mxu1 %v6680_v39  ;;  %2865 = vmatprep.mubr.bf16.mxu1 %v6683_v40  ;;  %v6729_v39 = vld [vmem:[%s8870_s0 + $0x138] ss:$144 sps:$4 sm:$0xff]   ;;  %v6730_v40 = vld [vmem:[%s8871_s1 + $0x250] sm:$0xff]  }
  0x44   :  { %5719 = vmatprep.subr.bf16.mxu1 %v6681_v41  ;;  %v6731_v41 = vld [vmem:[%s8871_s1 + $0x210] sm:$0xff]   ;;  %5886 = vmatpush3.bf16.msra.mxu0 %v6789_v38  ;;  %v6855_v38 = vld [vmem:[%s8871_s1 + $0x520] sm:$0xff]  }
  0x47   :  { %5720 = vmatpush3.bf16.msra.mxu1 %v6682_v42  ;;  %v6732_v42 = vld [vmem:[%s8871_s1 + $0x258] sm:$0xff]  }
  0x48   :  { %5721 = vmatprep.subr.bf16.mxu1 %v6686_v43  ;;  %v6792_v43 = vld [vmem:[%s8871_s1 + $0x448] sm:$0xff]  }
  0x49   :  { %5887 = vmatprep.subr.bf16.mxu0 %v6792_v43  ;;  %v6858_v43 = vld [vmem:[%s8871_s1 + $0x568] sm:$0xff]  }
  0x4a   :  { %2866 = vmatmul.mubr.bf16.gmra.mrb[12].mxu1 %v6685_v44  ;;  %v6744_v44 = vld [vmem:[%s8870_s0 + $0x24] ss:$144 sps:$4 sm:$0xff]  }
  0x4b   :  { %5722 = vmatpush3.bf16.msra.mxu1 %v6687_v45  ;;  %2906 = vmatprep.mubr.bf16.mxu1 %v6700_v46  ;;  %v6795_v45 = vld [vmem:[%s8871_s1 + $0x408] sm:$0xff]   ;;  %v6733_v46 = vld [vmem:[%s8871_s1 + $0x218] sm:$0xff]  }
  0x4c   :  { %5723 = vmatprep.subr.bf16.mxu1 %v6688_v47  ;;  %5888 = vmatpush3.bf16.msra.mxu0 %v6795_v45  ;;  %v6798_v47 = vld [vmem:[%s8870_s0 + $0x154] ss:$144 sps:$4 sm:$0xff]   ;;  %v6790_v45 = vld [vmem:[%s8871_s1 + $0x3c8] sm:$0xff]  }
  0x4d   :  { %3110 = vmatprep.mubr.bf16.mxu0 %v6798_v47  ;;  %v6862_v47 = vld [vmem:[%s8871_s1 + $0x570] sm:$0xff]  }
  0x4f   :  { %5724 = vmatpush3.bf16.msra.mxu1 %v6689_v48  ;;  %v6734_v48 = vld [vmem:[%s8871_s1 + $0x260] sm:$0xff]  }
  0x50   :  { %5725 = vmatprep.subr.bf16.mxu1 %v6690_v49  ;;  %v6801_v49 = vld [vmem:[%s8870_s0 + $0x150] ss:$144 sps:$4 sm:$0xff]  }
  0x51   :  { %3111 = vmatmul.mubr.bf16.gmra.mrb[4].mxu0 %v6801_v49  ;;  %v6796_v49 = vld [vmem:[%s8870_s0 + $0x148] ss:$144 sps:$4 sm:$0xff]  }
  0x52   :  { %3200 = vmatprep.mubr.bf16.mxu0 %v6830_v16  ;;  %v6834_v16 = vld [vmem:[%s8871_s1 + $0x4c8] sm:$0xff]  }
  0x53   :  { %5726 = vmatpush3.bf16.msra.mxu1 %v6691_v50  ;;  %v6802_v50 = vld [vmem:[%s8871_s1 + $0x450] sm:$0xff]  }
  0x54   :  { %5727 = vmatprep.subr.bf16.mxu1 %v6692_v51  ;;  %v6803_v51 = vld [vmem:[%s8871_s1 + $0x410] sm:$0xff]   ;;  %5889 = vmatprep.subr.bf16.mxu0 %v6802_v50 }
  0x55   :  { %5890 = vmatpush3.bf16.msra.mxu0 %v6803_v51  ;;  %v6797_v50 = vld [vmem:[%s8871_s1 + $0x3d0] sm:$0xff]  }
  0x56   :  { %v6800_v51 = vld [vmem:[%s8871_s1 + $0x390] sm:$0xff]  }
  0x57   :  { %5728 = vmatpush3.bf16.msra.mxu1 %v6693_v52  ;;  %v6735_v52 = vld [vmem:[%s8871_s1 + $0x220] sm:$0xff]  }
  0x58   :  { %5729 = vmatprep.subr.bf16.mxu1 %v6694_v53  ;;  %v6736_v53 = vld [vmem:[%s8871_s1 + $0x268] sm:$0xff]  }
  0x5b   :  { %5730 = vmatpush3.bf16.msra.mxu1 %v6695_v54  ;;  %v6806_v54 = vld [vmem:[%s8871_s1 + $0x458] sm:$0xff]  }
  0x5c   :  { %5731 = vmatprep.subr.bf16.mxu1 %v6696_v55  ;;  %v6807_v55 = vld [vmem:[%s8871_s1 + $0x418] sm:$0xff]   ;;  %5891 = vmatprep.subr.bf16.mxu0 %v6806_v54 }
  0x5d   :  { %5892 = vmatpush3.bf16.msra.mxu0 %v6807_v55  ;;  %v6804_v54 = vld [vmem:[%s8871_s1 + $0x3d8] sm:$0xff]  }
  0x5e   :  { %v6870_v55 = vld [vmem:[%s8871_s1 + $0x538] sm:$0xff]  }
  0x5f   :  { %5732 = vmatpush3.bf16.msra.mxu1 %v6697_v56  ;;  %v6737_v56 = vld [vmem:[%s8871_s1 + $0x228] sm:$0xff]  }
  0x60   :  { %5745 = vmatprep.subr.bf16.mxu1 %v6701_v58  ;;  %v6810_v58 = vld [vmem:[%s8871_s1 + $0x460] sm:$0xff]  }
  0x61   :  { %5893 = vmatprep.subr.bf16.mxu0 %v6810_v58  ;;  %v6874_v58 = vld [vmem:[%s8870_s0 + $0x54] ss:$144 sps:$4 sm:$0xff]  }
  0x62   :  { %2907 = vmatmul.mubr.bf16.vlgmr.msra.gmra.mrb[16].mxu1 %v6698_v57  ;;  %v6738_v57 = vld [vmem:[%s8871_s1 + $0x270] sm:$0xff]  }
  0x63   :  { %5746 = vmatpush3.bf16.msra.mxu1 %v6702_v59  ;;  %2914 = vmatprep.mubr.bf16.mxu1 %v6705_v60  ;;  %v6811_v59 = vld [vmem:[%s8871_s1 + $0x420] sm:$0xff]   ;;  %v6739_v60 = vld [vmem:[%s8871_s1 + $0x230] sm:$0xff]  }
  0x64   :  { %5747 = vmatprep.subr.bf16.mxu1 %v6703_v63  ;;  %5894 = vmatpush3.bf16.msra.mxu0 %v6811_v59  ;;  %v6815_v63 = vld [vmem:[%s8871_s1 + $0x428] sm:$0xff]   ;;  %v6808_v59 = vld [vmem:[%s8871_s1 + $0x3e0] sm:$0xff]  }
  0x65   :  { %5895 = vmatprep.subr.bf16.mxu0 %v6814_v62  ;;  %v6809_v62 = vld [vmem:[%s8871_s1 + $0x3a0] sm:$0xff]  }
  0x67   :  { %5748 = vmatpush3.bf16.msra.mxu1 %v6704_v0  ;;  %v6741_v0 = vld [vmem:[%s8871_s1 + $0x238] sm:$0xff]  }
  0x68   :  { %5749 = vmatprep.subr.bf16.mxu1 %v6708_v2  ;;  %v6745_v2 = vld [vmem:[%s8871_s1 + $0x2c0] sm:$0xff]   ;;  %5896 = vmatpush3.bf16.msra.mxu0 %v6815_v63  ;;  %v6812_v63 = vld [vmem:[%s8871_s1 + $0x3e8] sm:$0xff]  }
  0x69   :  { %5897 = vmatprep.subr.bf16.mxu0 %v6818_v4  ;;  %v6817_v4 = vld [vmem:[%s8871_s1 + $0x3b0] sm:$0xff]  }
  0x6a   :  { %2915 = vmatmul.mubr.bf16.gmra.mrb[20].mxu1 %v6707_v3  ;;  %v6746_v3 = vld [vmem:[%s8871_s1 + $0x280] sm:$0xff]  }
  0x6b   :  { %5750 = vmatpush3.bf16.msra.mxu1 %v6709_v5  ;;  %2955 = vmatprep.mubr.bf16.mxu1 %v6722_v7  ;;  %v6819_v5 = vld [vmem:[%s8871_s1 + $0x430] sm:$0xff]   ;;  %v6749_v7 = vld [vmem:[%s8871_s1 + $0x2c8] sm:$0xff]  }
  0x6c   :  { %5751 = vmatprep.subr.bf16.mxu1 %v6710_v6  ;;  %v6752_v6 = vld [vmem:[%s8870_s0 + $0x144] ss:$144 sps:$4 sm:$0xff]   ;;  %5898 = vmatpush3.bf16.msra.mxu0 %v6819_v5 }
  0x6d   :  { %5899 = vmatprep.subr.bf16.mxu0 %v6822_v8  ;;  %v6886_v5 = vld [vmem:[%s8870_s0 + $0x174] ss:$144 sps:$4 sm:$0xff]  }
  0x6e   :  { %v6890_v8 = vld [vmem:[%s8871_s1 + $0x650] sm:$0xff]  }
  0x6f   :  { %5752 = vmatpush3.bf16.msra.mxu1 %v6711_v10  ;;  %v6826_v10 = vld [vmem:[%s8871_s1 + $0x438] sm:$0xff]  }
  0x70   :  { %5753 = vmatprep.subr.bf16.mxu1 %v6712_v11  ;;  %v6755_v11 = vld [vmem:[%s8870_s0 + $0x140] ss:$144 sps:$4 sm:$0xff]   ;;  %5900 = vmatpush3.bf16.msra.mxu0 %v6826_v10  ;;  %v6821_v10 = vld [vmem:[%s8871_s1 + $0x3b8] sm:$0xff]  }
  0x73   :  { %5754 = vmatpush3.bf16.msra.mxu1 %v6713_v14  ;;  %v6828_v14 = vld [vmem:[%s8870_s0 + $0x40] ss:$144 sps:$4 sm:$0xff]  }
  0x74   :  { %5755 = vmatprep.subr.bf16.mxu1 %v6714_v15  ;;  %v6760_v15 = vld [vmem:[%s8871_s1 + $0x2d8] sm:$0xff]   ;;  %3201 = vmatmul.mubr.bf16.vlgmr.msra.gmra.mrb[8].mxu0 %v6828_v14  ;;  %v6831_v14 = vld [vmem:[%s8871_s1 + $0x480] sm:$0xff]  }
  0x77   :  { %5756 = vmatpush3.bf16.msra.mxu1 %v6715_v18  ;;  %v6832_v18 = vld [vmem:[%s8871_s1 + $0x540] sm:$0xff]  }
  0x78   :  { %5757 = vmatprep.subr.bf16.mxu1 %v6716_v19  ;;  %v6833_v19 = vld [vmem:[%s8871_s1 + $0x500] sm:$0xff]   ;;  %5941 = vmatprep.subr.bf16.mxu0 %v6832_v18 }
  0x79   :  { %5942 = vmatpush3.bf16.msra.mxu0 %v6833_v19  ;;  %v6898_v18 = vld [vmem:[%s8871_s1 + $0x660] sm:$0xff]  }
  0x7a   :  { %v6899_v19 = vld [vmem:[%s8871_s1 + $0x620] sm:$0xff]  }
  0x7b   :  { %5758 = vmatpush3.bf16.msra.mxu1 %v6717_v22  ;;  %v6836_v22 = vld [vmem:[%s8871_s1 + $0x548] sm:$0xff]  }
  0x7c   :  { %5759 = vmatprep.subr.bf16.mxu1 %v6718_v23  ;;  %v6765_v23 = vld [vmem:[%s8871_s1 + $0x2a0] sm:$0xff]   ;;  %5943 = vmatprep.subr.bf16.mxu0 %v6836_v22  ;;  %v6840_v22 = vld [vmem:[%s8870_s0 + $0x158] ss:$144 sps:$4 sm:$0xff]  }
  0x7d   :  { %5944 = vmatpush3.bf16.msra.mxu0 %v6839_v24  ;;  %v6844_v24 = vld [vmem:[%s8871_s1 + $0x490] sm:$0xff]  }
  0x7f   :  { %5760 = vmatpush3.bf16.msra.mxu1 %v6719_v26  ;;  %v6842_v26 = vld [vmem:[%s8870_s0 + $0x164] ss:$144 sps:$4 sm:$0xff]  }
  0x80   :  { %5773 = vmatprep.subr.bf16.mxu1 %v6723_v27  ;;  %v6769_v27 = vld [vmem:[%s8871_s1 + $0x2a8] sm:$0xff]   ;;  %3208 = vmatprep.mubr.bf16.mxu0 %v6842_v26  ;;  %v6848_v26 = vld [vmem:[%s8871_s1 + $0x4d8] sm:$0xff]  }
  0x81   :  { %3209 = vmatmul.mubr.bf16.gmra.mrb[12].mxu0 %v6845_v28  ;;  %v6906_v28 = vld [vmem:[%s8871_s1 + $0x670] sm:$0xff]  }
  0x82   :  { %2956 = vmatmul.mubr.bf16.vlgmr.msra.gmra.mrb[24].mxu1 %v6720_v29  ;;  %v6846_v29 = vld [vmem:[%s8871_s1 + $0x550] sm:$0xff]   ;;  %3298 = vmatprep.mubr.bf16.mxu0 %v6874_v58 }
  0x83   :  { %5774 = vmatpush3.bf16.msra.mxu1 %v6724_v30  ;;  %2963 = vmatprep.mubr.bf16.mxu1 %v6727_v33  ;;  %v6847_v30 = vld [vmem:[%s8871_s1 + $0x510] sm:$0xff]   ;;  %v6850_v33 = vld [vmem:[%s8871_s1 + $0x558] sm:$0xff]  }
  0x84   :  { %5775 = vmatprep.subr.bf16.mxu1 %v6725_v31  ;;  %v6772_v31 = vld [vmem:[%s8871_s1 + $0x2f0] sm:$0xff]   ;;  %5945 = vmatprep.subr.bf16.mxu0 %v6846_v29 }
  0x85   :  { %5946 = vmatpush3.bf16.msra.mxu0 %v6847_v30  ;;  %v6907_v29 = vld [vmem:[%s8871_s1 + $0x630] sm:$0xff]   ;;  %v6849_v30 = vld [vmem:[%s8871_s1 + $0x498] sm:$0xff]  }
  0x86   :  { %5947 = vmatprep.subr.bf16.mxu0 %v6850_v33  ;;  %v6853_v33 = vld [vmem:[%s8871_s1 + $0x4a0] sm:$0xff]  }
  0x87   :  { %5776 = vmatpush3.bf16.msra.mxu1 %v6726_v36  ;;  %v6777_v36 = vld [vmem:[%s8871_s1 + $0x2b8] sm:$0xff]  }
  0x88   :  { %5777 = vmatprep.subr.bf16.mxu1 %v6730_v40  ;;  %v6783_v40 = vld [vmem:[%s8871_s1 + $0x3c0] sm:$0xff]  }
  0x89   :  { %5948 = vmatpush3.bf16.msra.mxu0 %v6851_v34  ;;  %v6914_v34 = vld [vmem:[%s8871_s1 + $0x638] sm:$0xff]  }
  0x8a   :  { %2964 = vmatmul.mubr.bf16.gmra.mrb[28].mxu1 %v6729_v39  ;;  %v6779_v39 = vld [vmem:[%s8870_s0 + $0x28] ss:$144 sps:$4 sm:$0xff]   ;;  %5949 = vmatprep.subr.bf16.mxu0 %v6854_v37  ;;  %v6918_v37 = vld [vmem:[%s8870_s0 + $0x64] ss:$144 sps:$4 sm:$0xff]  }
  0x8b   :  { %5778 = vmatpush3.bf16.msra.mxu1 %v6731_v41  ;;  %3004 = vmatprep.mubr.bf16.mxu1 %v6744_v44  ;;  %v6787_v41 = vld [vmem:[%s8871_s1 + $0x380] sm:$0xff]   ;;  %v6859_v44 = vld [vmem:[%s8871_s1 + $0x528] sm:$0xff]  }
  0x8c   :  { %5779 = vmatprep.subr.bf16.mxu1 %v6732_v42  ;;  %v6793_v42 = vld [vmem:[%s8870_s0 + $0x14c] ss:$144 sps:$4 sm:$0xff]  }
  0x8d   :  { %5950 = vmatpush3.bf16.msra.mxu0 %v6855_v38  ;;  %v6857_v38 = vld [vmem:[%s8871_s1 + $0x4a8] sm:$0xff]  }
  0x8e   :  { %5951 = vmatprep.subr.bf16.mxu0 %v6858_v43  ;;  %v6861_v43 = vld [vmem:[%s8871_s1 + $0x4b0] sm:$0xff]  }
  0x8f   :  { %5780 = vmatpush3.bf16.msra.mxu1 %v6733_v46  ;;  %v6791_v46 = vld [vmem:[%s8871_s1 + $0x388] sm:$0xff]  }
  0x90   :  { %5781 = vmatprep.subr.bf16.mxu1 %v6734_v48  ;;  %v6863_v48 = vld [vmem:[%s8871_s1 + $0x530] sm:$0xff]  }
  0x91   :  { %5952 = vmatpush3.bf16.msra.mxu0 %v6859_v44 }
  0x92   :  { %5953 = vmatprep.subr.bf16.mxu0 %v6862_v47 }
  0x93   :  { %5782 = vmatpush3.bf16.msra.mxu1 %v6735_v52  ;;  %v6866_v52 = vld [vmem:[%s8871_s1 + $0x578] sm:$0xff]  }
  0x94   :  { %5783 = vmatprep.subr.bf16.mxu1 %v6736_v53  ;;  %v6825_v53 = vld [vmem:[%s8870_s0 + $0x3c] ss:$144 sps:$4 sm:$0xff]  }
  0x95   :  { %5954 = vmatpush3.bf16.msra.mxu0 %v6863_v48  ;;  %v6864_v48 = vld [vmem:[%s8871_s1 + $0x4f8] sm:$0xff]  }
  0x96   :  { %5955 = vmatprep.subr.bf16.mxu0 %v6866_v52  ;;  %v6865_v52 = vld [vmem:[%s8871_s1 + $0x4b8] sm:$0xff]  }
  0x97   :  { %5784 = vmatpush3.bf16.msra.mxu1 %v6737_v56  ;;  %v6805_v56 = vld [vmem:[%s8871_s1 + $0x398] sm:$0xff]  }
  0x98   :  { %5785 = vmatprep.subr.bf16.mxu1 %v6738_v57  ;;  %v6872_v57 = vld [vmem:[%s8870_s0 + $0x50] ss:$144 sps:$4 sm:$0xff]  }
  0x99   :  { %5956 = vmatpush3.bf16.msra.mxu0 %v6870_v55  ;;  %v6871_v55 = vld [vmem:[%s8871_s1 + $0x5c0] sm:$0xff]  }
  0x9b   :  { %5786 = vmatpush3.bf16.msra.mxu1 %v6739_v60  ;;  %v6876_v60 = vld [vmem:[%s8871_s1 + $0x640] sm:$0xff]  }
  0x9c   :  { %5787 = vmatprep.subr.bf16.mxu1 %v6740_v61  ;;  %v6877_v61 = vld [vmem:[%s8871_s1 + $0x600] sm:$0xff]   ;;  %3299 = vmatmul.mubr.bf16.vlgmr.msra.gmra.mrb[16].mxu0 %v6872_v57  ;;  %v6881_v57 = vld [vmem:[%s8870_s0 + $0x16c] ss:$144 sps:$4 sm:$0xff]  }
  0x9d   :  { %5997 = vmatprep.subr.bf16.mxu0 %v6876_v60  ;;  %3306 = vmatprep.mubr.bf16.mxu0 %v6886_v5  ;;  %v6939_v5 = vld [vmem:[%s8871_s1 + $0x718] sm:$0xff]  }
  0x9e   :  { %5998 = vmatpush3.bf16.msra.mxu0 %v6877_v61  ;;  %v6935_v61 = vld [vmem:[%s8871_s1 + $0x710] sm:$0xff]  }
  0x9f   :  { %5788 = vmatpush3.bf16.msra.mxu1 %v6741_v0  ;;  %v6880_v0 = vld [vmem:[%s8871_s1 + $0x648] sm:$0xff]  }
  0xa0   :  { %5801 = vmatprep.subr.bf16.mxu1 %v6745_v2  ;;  %5999 = vmatprep.subr.bf16.mxu0 %v6880_v0  ;;  %v6883_v2 = vld [vmem:[%s8871_s1 + $0x608] sm:$0xff]  }
  0xa2   :  { %3005 = vmatmul.mubr.bf16.vlgmr.msra.gmra.mrb[32].mxu1 %v6742_v1  ;;  %v6813_v1 = vld [vmem:[%s8871_s1 + $0x3a8] sm:$0xff]   ;;  %6000 = vmatpush3.bf16.msra.mxu0 %v6883_v2 }
  0xa3   :  { %5802 = vmatpush3.bf16.msra.mxu1 %v6746_v3  ;;  %3012 = vmatprep.mubr.bf16.mxu1 %v6752_v6  ;;  %v6816_v3 = vld [vmem:[%s8871_s1 + $0x3f0] sm:$0xff]   ;;  %v6820_v6 = vld [vmem:[%s8871_s1 + $0x3f8] sm:$0xff]  }
  0xa4   :  { %5803 = vmatprep.subr.bf16.mxu1 %v6749_v7  ;;  %v6889_v7 = vld [vmem:[%s8870_s0 + $0x170] ss:$144 sps:$4 sm:$0xff]   ;;  %6001 = vmatprep.subr.bf16.mxu0 %v6890_v8 }
  0xa5   :  { %3307 = vmatmul.mubr.bf16.gmra.mrb[20].mxu0 %v6889_v7  ;;  %v6884_v7 = vld [vmem:[%s8870_s0 + $0x168] ss:$144 sps:$4 sm:$0xff]   ;;  %v6885_v8 = vld [vmem:[%s8871_s1 + $0x5d0] sm:$0xff]  }
  0xa6   :  { %3396 = vmatprep.mubr.bf16.mxu0 %v6918_v37 }
  0xa7   :  { %5804 = vmatpush3.bf16.msra.mxu1 %v6750_v9  ;;  %v6891_v9 = vld [vmem:[%s8871_s1 + $0x610] sm:$0xff]  }
  0xa8   :  { %5805 = vmatprep.subr.bf16.mxu1 %v6756_v12  ;;  %6002 = vmatpush3.bf16.msra.mxu0 %v6891_v9  ;;  %v6823_v12 = vld [vmem:[%s8870_s0 + $0x38] ss:$144 sps:$4 sm:$0xff]   ;;  %v6888_v9 = vld [vmem:[%s8871_s1 + $0x590] sm:$0xff]  }
  0xaa   :  { %3013 = vmatmul.mubr.bf16.gmra.mrb[36].mxu1 %v6755_v11  ;;  %v6827_v11 = vld [vmem:[%s8871_s1 + $0x4c0] sm:$0xff]  }
  0xab   :  { %5806 = vmatpush3.bf16.msra.mxu1 %v6757_v13  ;;  %3053 = vmatprep.mubr.bf16.mxu1 %v6781_v17  ;;  %v6894_v13 = vld [vmem:[%s8871_s1 + $0x658] sm:$0xff]  }
  0xac   :  { %5807 = vmatprep.subr.bf16.mxu1 %v6760_v15  ;;  %v6895_v15 = vld [vmem:[%s8871_s1 + $0x618] sm:$0xff]   ;;  %6003 = vmatprep.subr.bf16.mxu0 %v6894_v13 }
  0xad   :  { %v6837_v17 = vld [vmem:[%s8870_s0 + $0x15c] ss:$144 sps:$4 sm:$0xff]   ;;  %6004 = vmatpush3.bf16.msra.mxu0 %v6895_v15 }
  0xae   :  { %6005 = vmatprep.subr.bf16.mxu0 %v6898_v18  ;;  %v6892_v13 = vld [vmem:[%s8871_s1 + $0x5d8] sm:$0xff]   ;;  %v6947_v15 = vld [vmem:[%s8871_s1 + $0x728] sm:$0xff]   ;;  %v6950_v18 = vld [vmem:[%s8871_s1 + $0x770] sm:$0xff]  }
  0xaf   :  { %5808 = vmatpush3.bf16.msra.mxu1 %v6761_v20  ;;  %v6835_v20 = vld [vmem:[%s8871_s1 + $0x488] sm:$0xff]  }
  0xb0   :  { %5809 = vmatprep.subr.bf16.mxu1 %v6764_v21  ;;  %v6841_v21 = vld [vmem:[%s8871_s1 + $0x4d0] sm:$0xff]  }
  0xb1   :  { %6006 = vmatpush3.bf16.msra.mxu0 %v6899_v19  ;;  %v6951_v19 = vld [vmem:[%s8871_s1 + $0x730] sm:$0xff]  }
  0xb3   :  { %5810 = vmatpush3.bf16.msra.mxu1 %v6765_v23  ;;  %v6902_v23 = vld [vmem:[%s8871_s1 + $0x668] sm:$0xff]  }
  0xb4   :  { %5811 = vmatprep.subr.bf16.mxu1 %v6768_v25  ;;  %v6903_v25 = vld [vmem:[%s8871_s1 + $0x628] sm:$0xff]   ;;  %6007 = vmatprep.subr.bf16.mxu0 %v6902_v23 }
  0xb5   :  { %6008 = vmatpush3.bf16.msra.mxu0 %v6903_v25  ;;  %v6901_v23 = vld [vmem:[%s8871_s1 + $0x5a8] sm:$0xff]   ;;  %v6904_v25 = vld [vmem:[%s8871_s1 + $0x5f0] sm:$0xff]  }
  0xb6   :  { %6009 = vmatprep.subr.bf16.mxu0 %v6906_v28  ;;  %v6960_v28 = vld [vmem:[%s8870_s0 + $0x70] ss:$144 sps:$4 sm:$0xff]  }
  0xb7   :  { %5812 = vmatpush3.bf16.msra.mxu1 %v6769_v27  ;;  %v6869_v27 = vld [vmem:[%s8870_s0 + $0x4c] ss:$144 sps:$4 sm:$0xff]  }
  0xb8   :  { %5813 = vmatprep.subr.bf16.mxu1 %v6772_v31  ;;  %v6852_v31 = vld [vmem:[%s8871_s1 + $0x4e0] sm:$0xff]  }
  0xb9   :  { %6010 = vmatpush3.bf16.msra.mxu0 %v6907_v29 }
  0xbb   :  { %5814 = vmatpush3.bf16.msra.mxu1 %v6773_v32  ;;  %v6910_v32 = vld [vmem:[%s8871_s1 + $0x678] sm:$0xff]  }
  0xbc   :  { %5815 = vmatprep.subr.bf16.mxu1 %v6776_v35  ;;  %6011 = vmatprep.subr.bf16.mxu0 %v6910_v32  ;;  %v6856_v35 = vld [vmem:[%s8871_s1 + $0x4e8] sm:$0xff]  }
  0xbd   :  { %6012 = vmatpush3.bf16.msra.mxu0 %v6914_v34  ;;  %v6964_v34 = vld [vmem:[%s8871_s1 + $0x840] sm:$0xff]  }
  0xbf   :  { %5816 = vmatpush3.bf16.msra.mxu1 %v6777_v36  ;;  %v6916_v36 = vld [vmem:[%s8870_s0 + $0x60] ss:$144 sps:$4 sm:$0xff]  }
  0xc0   :  { %5857 = vmatprep.subr.bf16.mxu1 %v6783_v40  ;;  %3397 = vmatmul.mubr.bf16.vlgmr.msra.gmra.mrb[24].mxu0 %v6916_v36  ;;  %v6921_v40 = vld [vmem:[%s8871_s1 + $0x700] sm:$0xff]  }
  0xc1   :  { %v6965_v36 = vld [vmem:[%s8871_s1 + $0x800] sm:$0xff]  }
  0xc2   :  { %3054 = vmatmul.mubr.bf16.vlgmr.msra.gmra.mrb[40].mxu1 %v6779_v39  ;;  %v6920_v39 = vld [vmem:[%s8871_s1 + $0x740] sm:$0xff]  }
  0xc3   :  { %5858 = vmatpush3.bf16.msra.mxu1 %v6787_v41  ;;  %3061 = vmatprep.mubr.bf16.mxu1 %v6793_v42  ;;  %v6860_v41 = vld [vmem:[%s8871_s1 + $0x4f0] sm:$0xff]  }
  0xc4   :  { %5859 = vmatprep.subr.bf16.mxu1 %v6790_v45  ;;  %6053 = vmatprep.subr.bf16.mxu0 %v6920_v39  ;;  %v6924_v45 = vld [vmem:[%s8871_s1 + $0x748] sm:$0xff]   ;;  %v6909_v39 = vld [vmem:[%s8871_s1 + $0x5b8] sm:$0xff]  }
  0xc5   :  { %6054 = vmatpush3.bf16.msra.mxu0 %v6921_v40 }
  0xc6   :  { %6055 = vmatprep.subr.bf16.mxu0 %v6924_v45  ;;  %v6919_v45 = vld [vmem:[%s8871_s1 + $0x680] sm:$0xff]  }
  0xc7   :  { %5860 = vmatpush3.bf16.msra.mxu1 %v6791_v46 }
  0xc8   :  { %5861 = vmatprep.subr.bf16.mxu1 %v6797_v50  ;;  %v6927_v50 = vld [vmem:[%s8871_s1 + $0x708] sm:$0xff]  }
  0xc9   :  { %6056 = vmatpush3.bf16.msra.mxu0 %v6927_v50 }
  0xca   :  { %3062 = vmatmul.mubr.bf16.gmra.mrb[44].mxu1 %v6796_v49 }
  0xcb   :  { %5862 = vmatpush3.bf16.msra.mxu1 %v6800_v51  ;;  %3151 = vmatprep.mubr.bf16.mxu1 %v6825_v53  ;;  %v6930_v53 = vld [vmem:[%s8870_s0 + $0x184] ss:$144 sps:$4 sm:$0xff]  }
  0xcc   :  { %5863 = vmatprep.subr.bf16.mxu1 %v6804_v54  ;;  %v6867_v54 = vld [vmem:[%s8870_s0 + $0x48] ss:$144 sps:$4 sm:$0xff]   ;;  %3404 = vmatprep.mubr.bf16.mxu0 %v6930_v53  ;;  %v6974_v53 = vld [vmem:[%s8870_s0 + $0x194] ss:$144 sps:$4 sm:$0xff]  }
  0xcf   :  { %5864 = vmatpush3.bf16.msra.mxu1 %v6805_v56  ;;  %v6933_v56 = vld [vmem:[%s8870_s0 + $0x180] ss:$144 sps:$4 sm:$0xff]  }
  0xd0   :  { %5865 = vmatprep.subr.bf16.mxu1 %v6808_v59  ;;  %v6934_v59 = vld [vmem:[%s8871_s1 + $0x750] sm:$0xff]   ;;  %3405 = vmatmul.mubr.bf16.gmra.mrb[28].mxu0 %v6933_v56  ;;  %v6923_v56 = vld [vmem:[%s8871_s1 + $0x688] sm:$0xff]  }
  0xd1   :  { %6057 = vmatprep.subr.bf16.mxu0 %v6934_v59 }
  0xd2   :  { %6058 = vmatpush3.bf16.msra.mxu0 %v6935_v61  ;;  %v6928_v61 = vld [vmem:[%s8870_s0 + $0x178] ss:$144 sps:$4 sm:$0xff]  }
  0xd3   :  { %5866 = vmatpush3.bf16.msra.mxu1 %v6809_v62  ;;  %v6875_v62 = vld [vmem:[%s8871_s1 + $0x580] sm:$0xff]  }
  0xd4   :  { %5867 = vmatprep.subr.bf16.mxu1 %v6812_v63 }
  0xd7   :  { %5868 = vmatpush3.bf16.msra.mxu1 %v6813_v1  ;;  %v6878_v1 = vld [vmem:[%s8871_s1 + $0x5c8] sm:$0xff]  }
  0xd8   :  { %5869 = vmatprep.subr.bf16.mxu1 %v6816_v3 }
  0xdb   :  { %5870 = vmatpush3.bf16.msra.mxu1 %v6817_v4  ;;  %v6938_v4 = vld [vmem:[%s8871_s1 + $0x758] sm:$0xff]  }
  0xdc   :  { %5871 = vmatprep.subr.bf16.mxu1 %v6820_v6  ;;  %v6879_v6 = vld [vmem:[%s8871_s1 + $0x588] sm:$0xff]   ;;  %6059 = vmatprep.subr.bf16.mxu0 %v6938_v4  ;;  %v6937_v4 = vld [vmem:[%s8871_s1 + $0x698] sm:$0xff]  }
  0xdd   :  { %6060 = vmatpush3.bf16.msra.mxu0 %v6939_v5  ;;  %v6986_v5 = vld [vmem:[%s8871_s1 + $0x860] sm:$0xff]  }
  0xdf   :  { %5872 = vmatpush3.bf16.msra.mxu1 %v6821_v10  ;;  %v6942_v10 = vld [vmem:[%s8871_s1 + $0x760] sm:$0xff]  }
  0xe0   :  { %5913 = vmatprep.subr.bf16.mxu1 %v6827_v11  ;;  %v6943_v11 = vld [vmem:[%s8871_s1 + $0x720] sm:$0xff]   ;;  %6061 = vmatprep.subr.bf16.mxu0 %v6942_v10  ;;  %v6991_v10 = vld [vmem:[%s8871_s1 + $0x828] sm:$0xff]  }
  0xe1   :  { %6062 = vmatpush3.bf16.msra.mxu0 %v6943_v11  ;;  %v6944_v11 = vld [vmem:[%s8871_s1 + $0x6e8] sm:$0xff]  }
  0xe2   :  { %3152 = vmatmul.mubr.bf16.vlgmr.msra.gmra.mrb[48].mxu1 %v6823_v12  ;;  %v6913_v12 = vld [vmem:[%s8870_s0 + $0x5c] ss:$144 sps:$4 sm:$0xff]  }
  0xe3   :  { %5914 = vmatpush3.bf16.msra.mxu1 %v6831_v14  ;;  %3159 = vmatprep.mubr.bf16.mxu1 %v6837_v17  ;;  %v6946_v14 = vld [vmem:[%s8871_s1 + $0x768] sm:$0xff]   ;;  %v6896_v17 = vld [vmem:[%s8871_s1 + $0x5e0] sm:$0xff]  }
  0xe4   :  { %5915 = vmatprep.subr.bf16.mxu1 %v6834_v16  ;;  %v6893_v16 = vld [vmem:[%s8871_s1 + $0x598] sm:$0xff]   ;;  %6063 = vmatprep.subr.bf16.mxu0 %v6946_v14  ;;  %v6995_v14 = vld [vmem:[%s8871_s1 + $0x830] sm:$0xff]  }
  0xe5   :  { %6064 = vmatpush3.bf16.msra.mxu0 %v6947_v15  ;;  %v6948_v15 = vld [vmem:[%s8871_s1 + $0x6f0] sm:$0xff]  }
  0xe6   :  { %6065 = vmatprep.subr.bf16.mxu0 %v6950_v18  ;;  %v6998_v18 = vld [vmem:[%s8871_s1 + $0x878] sm:$0xff]  }
  0xe7   :  { %5916 = vmatpush3.bf16.msra.mxu1 %v6835_v20  ;;  %v6897_v20 = vld [vmem:[%s8871_s1 + $0x5a0] sm:$0xff]  }
  0xe8   :  { %5917 = vmatprep.subr.bf16.mxu1 %v6841_v21  ;;  %v6900_v21 = vld [vmem:[%s8871_s1 + $0x5e8] sm:$0xff]  }
  0xe9   :  { %6066 = vmatpush3.bf16.msra.mxu0 %v6951_v19 }
  0xea   :  { %3160 = vmatmul.mubr.bf16.gmra.mrb[52].mxu1 %v6840_v22  ;;  %v6954_v22 = vld [vmem:[%s8871_s1 + $0x778] sm:$0xff]  }
  0xeb   :  { %5918 = vmatpush3.bf16.msra.mxu1 %v6844_v24  ;;  %3249 = vmatprep.mubr.bf16.mxu1 %v6869_v27  ;;  %v6958_v24 = vld [vmem:[%s8871_s1 + $0x738] sm:$0xff]   ;;  %v6905_v27 = vld [vmem:[%s8871_s1 + $0x5b0] sm:$0xff]  }
  0xec   :  { %5919 = vmatprep.subr.bf16.mxu1 %v6848_v26  ;;  %6067 = vmatprep.subr.bf16.mxu0 %v6954_v22 }
  0xed   :  { %6068 = vmatpush3.bf16.msra.mxu0 %v6958_v24  ;;  %v7002_v24 = vld [vmem:[%s8871_s1 + $0x838] sm:$0xff]  }
  0xee   :  { %6109 = vmatprep.subr.bf16.mxu0 %v6964_v34  ;;  %v6955_v34 = vld [vmem:[%s8870_s0 + $0x68] ss:$144 sps:$4 sm:$0xff]  }
  0xef   :  { %5920 = vmatpush3.bf16.msra.mxu1 %v6849_v30  ;;  %v6908_v30 = vld [vmem:[%s8871_s1 + $0x5f8] sm:$0xff]  }
  0xf0   :  { %5921 = vmatprep.subr.bf16.mxu1 %v6852_v31  ;;  %v6962_v31 = vld [vmem:[%s8870_s0 + $0x74] ss:$144 sps:$4 sm:$0xff]  }
  0xf1   :  { %3494 = vmatprep.mubr.bf16.mxu0 %v6962_v31  ;;  %v6959_v31 = vld [vmem:[%s8871_s1 + $0x7c0] sm:$0xff]  }
  0xf2   :  { %3495 = vmatmul.mubr.bf16.vlgmr.msra.gmra.mrb[32].mxu0 %v6960_v28 }
  0xf3   :  { %5922 = vmatpush3.bf16.msra.mxu1 %v6853_v33  ;;  %6110 = vmatpush3.bf16.msra.mxu0 %v6965_v36 }
  0xf4   :  { %5923 = vmatprep.subr.bf16.mxu1 %v6856_v35  ;;  %3502 = vmatprep.mubr.bf16.mxu0 %v6974_v53  ;;  %v6984_v53 = vld [vmem:[%s8871_s1 + $0x7e0] sm:$0xff]  }
  0xf5   :  { %v5677_v42 = vpop.f32.mrb[0].mxu1 }
  0xf6   :  { %v5678_v44 = vpop.f32.mrb[1].mxu1 }
  0xf7   :  { %v7927_v46 = vadd.f32 %v5678_v44, %v5677_v42  ;;  %v5680_v47 = vpop.f32.mrb[2].mxu1  ;;  %5924 = vmatpush3.bf16.msra.mxu1 %v6857_v38  ;;  %v6911_v42 = vld [vmem:[%s8870_s0 + $0x58] ss:$144 sps:$4 sm:$0xff]  }
  0xf8   :  { %v5681_v49 = vpop.f32.mrb[3].mxu1  ;;  %5925 = vmatprep.subr.bf16.mxu1 %v6860_v41  ;;  %v6915_v41 = vld [vmem:[%s8871_s1 + $0x6c0] sm:$0xff]  }
  0xf9   :  { %v7935_v51 = vadd.f32 %v5681_v49, %v5680_v47  ;;  %v6925_v49 = vld [vmem:[%s8870_s0 + $0x17c] ss:$144 sps:$4 sm:$0xff]  }
  0xfb   :  { %5926 = vmatpush3.bf16.msra.mxu1 %v6861_v43  ;;  %v6968_v43 = vld [vmem:[%s8871_s1 + $0x848] sm:$0xff]  }
  0xfc   :  { %5927 = vmatprep.subr.bf16.mxu1 %v6864_v48  ;;  %v6922_v48 = vld [vmem:[%s8871_s1 + $0x6c8] sm:$0xff]   ;;  %6111 = vmatprep.subr.bf16.mxu0 %v6968_v43  ;;  %v7014_v43 = vld [vmem:[%s8870_s0 + $0x1a4] ss:$144 sps:$4 sm:$0xff]  }
  0xfd   :  { %v5683_v58 = vpop.f32.mrb[4].mxu1 }
  0xfe   :  { %v5684_v60 = vpop.f32.mrb[5].mxu1 }
  0xff   :  { %5928 = vmatpush3.bf16.msra.mxu1 %v6865_v52  ;;  %v7964_v63 = vadd.f32 %v5684_v60, %v5683_v58  ;;  %v5686_v0 = vpop.f32.mrb[6].mxu1  ;;  %v6978_v58 = vld [vmem:[%s8871_s1 + $0x850] sm:$0xff]  }
 0x100   :  { %5969 = vmatprep.subr.bf16.mxu1 %v6871_v55  ;;  %v5687_v2 = vpop.f32.mrb[7].mxu1  ;;  %v6979_v60 = vld [vmem:[%s8871_s1 + $0x810] sm:$0xff]  }
 0x101   :  { %v7969_v3 = vadd.f32 %v5687_v2, %v5686_v0  ;;  %v6957_v0 = vld [vmem:[%s8870_s0 + $0x6c] ss:$144 sps:$4 sm:$0xff]  }
 0x102   :  { %3250 = vmatmul.mubr.bf16.vlgmr.msra.gmra.mrb[56].mxu1 %v6867_v54  ;;  %v6983_v2 = vld [vmem:[%s8871_s1 + $0x818] sm:$0xff]  }
 0x103   :  { %5970 = vmatpush3.bf16.msra.mxu1 %v6875_v62  ;;  %3257 = vmatprep.mubr.bf16.mxu1 %v6881_v57  ;;  %v6977_v57 = vld [vmem:[%s8870_s0 + $0x190] ss:$144 sps:$4 sm:$0xff]  }
 0x104   :  { %5971 = vmatprep.subr.bf16.mxu1 %v6878_v1  ;;  %v6929_v62 = vld [vmem:[%s8871_s1 + $0x6d0] sm:$0xff]   ;;  %3503 = vmatmul.mubr.bf16.gmra.mrb[36].mxu0 %v6977_v57  ;;  %v6982_v1 = vld [vmem:[%s8871_s1 + $0x858] sm:$0xff]  }
 0x105   :  { %v6992_v57 = vld [vmem:[%s8871_s1 + $0x7f0] sm:$0xff]  }
 0x107   :  { %5972 = vmatpush3.bf16.msra.mxu1 %v6879_v6  ;;  %v6987_v6 = vld [vmem:[%s8871_s1 + $0x820] sm:$0xff]  }
 0x108   :  { %5973 = vmatprep.subr.bf16.mxu1 %v6885_v8  ;;  %v6941_v8 = vld [vmem:[%s8871_s1 + $0x6a0] sm:$0xff]  }
 0x10a   :  { %3258 = vmatmul.mubr.bf16.gmra.mrb[60].mxu1 %v6884_v7  ;;  %v6940_v7 = vld [vmem:[%s8871_s1 + $0x6e0] sm:$0xff]  }
 0x10b   :  { %5974 = vmatpush3.bf16.msra.mxu1 %v6888_v9  ;;  %3347 = vmatprep.mubr.bf16.mxu1 %v6913_v12  ;;  %v6990_v9 = vld [vmem:[%s8871_s1 + $0x868] sm:$0xff]  }
 0x10c   :  { %5975 = vmatprep.subr.bf16.mxu1 %v6892_v13  ;;  %v6945_v12 = vld [vmem:[%s8871_s1 + $0x6a8] sm:$0xff]   ;;  %v6994_v13 = vld [vmem:[%s8871_s1 + $0x870] sm:$0xff]  }
 0x10f   :  { %5976 = vmatpush3.bf16.msra.mxu1 %v6893_v16 }
 0x110   :  { %5977 = vmatprep.subr.bf16.mxu1 %v6896_v17 }
 0x113   :  { %5978 = vmatpush3.bf16.msra.mxu1 %v6897_v20 }
 0x114   :  { %5979 = vmatprep.subr.bf16.mxu1 %v6900_v21  ;;  %v6949_v21 = vld [vmem:[%s8871_s1 + $0x6b0] sm:$0xff]  }
 0x115   :  { %v5705_v26 = vpop.f32.mrb[8].mxu1 }
 0x116   :  { %v5706_v29 = vpop.f32.mrb[9].mxu1 }
 0x117   :  { %v5707_v32 = vadd.f32 %v5706_v29, %v5705_v26  ;;  %v5708_v33 = vpop.f32.mrb[10].mxu1  ;;  %5980 = vmatpush3.bf16.msra.mxu1 %v6901_v23  ;;  %v6952_v23 = vld [vmem:[%s8871_s1 + $0x6f8] sm:$0xff]   ;;  %v7004_v29 = vld [vmem:[%s8870_s0 + $0x80] ss:$144 sps:$4 sm:$0xff]  }
 0x118   :  { %v5709_v35 = vpop.f32.mrb[11].mxu1  ;;  %5981 = vmatprep.subr.bf16.mxu1 %v6904_v25 }
 0x119   :  { %v8056_v37 = vadd.f32 %v5707_v32, %v7927_v46  ;;  %v5710_v38 = vadd.f32 %v5709_v35, %v5708_v33  ;;  %v6971_v46 = vld [vmem:[%s8871_s1 + $0x808] sm:$0xff]  }
 0x11a   :  { %6112 = vmatpush3.bf16.msra.mxu0 %v6971_v46  ;;  %v7017_v46 = vld [vmem:[%s8870_s0 + $0x1a0] ss:$144 sps:$4 sm:$0xff]  }
 0x11b   :  { %v8062_v40 = vadd.f32 %v5710_v38, %v7935_v51  ;;  %5982 = vmatpush3.bf16.msra.mxu1 %v6905_v27  ;;  %6113 = vmatprep.subr.bf16.mxu0 %v6978_v58  ;;  %v6953_v27 = vld [vmem:[%s8871_s1 + $0x6b8] sm:$0xff]  }
 0x11c   :  { %5983 = vmatprep.subr.bf16.mxu1 %v6908_v30  ;;  %v7006_v30 = vld [vmem:[%s8870_s0 + $0x84] ss:$144 sps:$4 sm:$0xff]   ;;  %v6969_v38 = vld [vmem:[%s8870_s0 + $0x18c] ss:$144 sps:$4 sm:$0xff]  }
 0x11d   :  { %v5711_v44 = vpop.f32.mrb[12].mxu1  ;;  %3592 = vmatprep.mubr.bf16.mxu0 %v7006_v30  ;;  %v7013_v30 = vld [vmem:[%s8871_s1 + $0x8d0] sm:$0xff]  }
 0x11e   :  { %v5712_v47 = vpop.f32.mrb[13].mxu1  ;;  %6114 = vmatpush3.bf16.msra.mxu0 %v6979_v60 }
 0x11f   :  { %v5713_v50 = vadd.f32 %v5712_v47, %v5711_v44  ;;  %v5714_v51 = vpop.f32.mrb[14].mxu1  ;;  %5984 = vmatpush3.bf16.msra.mxu1 %v6909_v39  ;;  %6115 = vmatprep.subr.bf16.mxu0 %v6982_v1  ;;  %v6967_v44 = vld [vmem:[%s8871_s1 + $0x788] sm:$0xff]   ;;  %v6973_v47 = vld [vmem:[%s8871_s1 + $0x7d0] sm:$0xff]  }
 0x120   :  { %v5715_v52 = vpop.f32.mrb[15].mxu1  ;;  %6025 = vmatprep.subr.bf16.mxu1 %v6915_v41 }
 0x121   :  { %v8089_v54 = vadd.f32 %v5713_v50, %v7964_v63  ;;  %v5716_v55 = vadd.f32 %v5715_v52, %v5714_v51  ;;  %v6932_v63 = vld [vmem:[%s8871_s1 + $0x690] sm:$0xff]   ;;  %v7001_v50 = vld [vmem:[%s8870_s0 + $0x7c] ss:$144 sps:$4 sm:$0xff]  }
 0x122   :  { %3348 = vmatmul.mubr.bf16.vlgmr.msra.gmra.mrb[64].mxu1 %v6911_v42  ;;  %6116 = vmatpush3.bf16.msra.mxu0 %v6983_v2  ;;  %v6980_v51 = vld [vmem:[%s8871_s1 + $0x7d8] sm:$0xff]  }
 0x123   :  { %v8101_v59 = vadd.f32 %v5716_v55, %v7969_v3  ;;  %6026 = vmatpush3.bf16.msra.mxu1 %v6919_v45  ;;  %3355 = vmatprep.mubr.bf16.mxu1 %v6925_v49  ;;  %v6936_v3 = vld [vmem:[%s8871_s1 + $0x6d8] sm:$0xff]   ;;  %v6976_v49 = vld [vmem:[%s8871_s1 + $0x790] sm:$0xff]   ;;  %v6988_v55 = vld [vmem:[%s8871_s1 + $0x7e8] sm:$0xff]  }
 0x124   :  { %6027 = vmatprep.subr.bf16.mxu1 %v6922_v48  ;;  %6117 = vmatprep.subr.bf16.mxu0 %v6986_v5  ;;  %v6972_v48 = vld [vmem:[%s8870_s0 + $0x188] ss:$144 sps:$4 sm:$0xff]  }
 0x125   :  { %v6981_v52 = vld [vmem:[%s8871_s1 + $0x798] sm:$0xff]  }
 0x126   :  { %6118 = vmatpush3.bf16.msra.mxu0 %v6987_v6  ;;  %v6997_v5 = vld [vmem:[%s8871_s1 + $0x7b8] sm:$0xff]  }
 0x127   :  { %6028 = vmatpush3.bf16.msra.mxu1 %v6923_v56  ;;  %6119 = vmatprep.subr.bf16.mxu0 %v6990_v9  ;;  %v6989_v56 = vld [vmem:[%s8871_s1 + $0x7a8] sm:$0xff]  }
 0x128   :  { %6029 = vmatprep.subr.bf16.mxu1 %v6929_v62 }
 0x12a   :  { %3356 = vmatmul.mubr.bf16.gmra.mrb[68].mxu1 %v6928_v61  ;;  %6120 = vmatpush3.bf16.msra.mxu0 %v6991_v10  ;;  %v6996_v61 = vld [vmem:[%s8871_s1 + $0x7f8] sm:$0xff]  }
 0x12b   :  { %6030 = vmatpush3.bf16.msra.mxu1 %v6932_v63  ;;  %3445 = vmatprep.mubr.bf16.mxu1 %v6957_v0  ;;  %v5845_v0 = vpop.f32.mrb[0].mxu0 }
 0x12c   :  { %6031 = vmatprep.subr.bf16.mxu1 %v6936_v3  ;;  %6121 = vmatprep.subr.bf16.mxu0 %v6994_v13  ;;  %v5846_v2 = vpop.f32.mrb[1].mxu0 }
 0x12d   :  { %v8265_v6 = vadd.f32 %v5846_v2, %v5845_v0 }
 0x12e   :  { %6122 = vmatpush3.bf16.msra.mxu0 %v6995_v14  ;;  %v7010_v14 = vld [vmem:[%s8870_s0 + $0x19c] ss:$144 sps:$4 sm:$0xff]  }
 0x12f   :  { %6032 = vmatpush3.bf16.msra.mxu1 %v6937_v4  ;;  %6123 = vmatprep.subr.bf16.mxu0 %v6998_v18  ;;  %v7007_v18 = vld [vmem:[%s8871_s1 + $0x880] sm:$0xff]  }
 0x130   :  { %6033 = vmatprep.subr.bf16.mxu1 %v6940_v7  ;;  %v5848_v7 = vpop.f32.mrb[2].mxu0 }
 0x131   :  { %v5849_v9 = vpop.f32.mrb[3].mxu0 }
 0x132   :  { %6124 = vmatpush3.bf16.msra.mxu0 %v7002_v24 }
 0x133   :  { %6034 = vmatpush3.bf16.msra.mxu1 %v6941_v8  ;;  %v7003_v8 = vld [vmem:[%s8871_s1 + $0x8c0] sm:$0xff]  }
 0x134   :  { %6035 = vmatprep.subr.bf16.mxu1 %v6944_v11  ;;  %v8271_v11 = vadd.f32 %v5849_v9, %v5848_v7 }
 0x135   :  { %v5733_v16 = vpop.f32.mrb[16].mxu1  ;;  %3593 = vmatmul.mubr.bf16.vlgmr.msra.gmra.mrb[40].mxu0 %v7004_v29  ;;  %v7012_v29 = vld [vmem:[%s8870_s0 + $0x198] ss:$144 sps:$4 sm:$0xff]  }
 0x136   :  { %v5734_v17 = vpop.f32.mrb[17].mxu1  ;;  %3600 = vmatprep.mubr.bf16.mxu0 %v7014_v43 }
 0x137   :  { %v5735_v19 = vadd.f32 %v5734_v17, %v5733_v16  ;;  %v5736_v20 = vpop.f32.mrb[18].mxu1  ;;  %6036 = vmatpush3.bf16.msra.mxu1 %v6945_v12  ;;  %v6999_v12 = vld [vmem:[%s8870_s0 + $0x78] ss:$144 sps:$4 sm:$0xff]  }
 0x138   :  { %v5737_v22 = vpop.f32.mrb[19].mxu1  ;;  %6037 = vmatprep.subr.bf16.mxu1 %v6948_v15 }
 0x139   :  { %v8176_v25 = vadd.f32 %v5735_v19, %v8056_v37  ;;  %v5738_v26 = vadd.f32 %v5737_v22, %v5736_v20  ;;  %v6963_v37 = vld [vmem:[%s8871_s1 + $0x780] sm:$0xff]   ;;  %v7008_v20 = vld [vmem:[%s8871_s1 + $0x8c8] sm:$0xff]  }
 0x13b   :  { %v8182_v28 = vadd.f32 %v5738_v26, %v8062_v40  ;;  %6038 = vmatpush3.bf16.msra.mxu1 %v6949_v21  ;;  %v6966_v40 = vld [vmem:[%s8871_s1 + $0x7c8] sm:$0xff]  }
 0x13c   :  { %6039 = vmatprep.subr.bf16.mxu1 %v6952_v23  ;;  %v5851_v23 = vpop.f32.mrb[4].mxu0  ;;  %v7009_v26 = vld [vmem:[%s8871_s1 + $0x888] sm:$0xff]  }
 0x13d   :  { %v5739_v32 = vpop.f32.mrb[20].mxu1  ;;  %3601 = vmatmul.mubr.bf16.gmra.mrb[44].mxu0 %v7017_v46  ;;  %v5852_v24 = vpop.f32.mrb[5].mxu0  ;;  %v7025_v46 = vld [vmem:[%s8871_s1 + $0x8b0] sm:$0xff]  }
 0x13e   :  { %v5740_v33 = vpop.f32.mrb[21].mxu1 }
 0x13f   :  { %v5741_v35 = vadd.f32 %v5740_v33, %v5739_v32  ;;  %v5742_v36 = vpop.f32.mrb[22].mxu1  ;;  %6040 = vmatpush3.bf16.msra.mxu1 %v6953_v27  ;;  %v8292_v27 = vadd.f32 %v5852_v24, %v5851_v23  ;;  %v7016_v32 = vld [vmem:[%s8871_s1 + $0x890] sm:$0xff]   ;;  %v7030_v33 = vld [vmem:[%s8870_s0 + $0x8c] ss:$144 sps:$4 sm:$0xff]  }
 0x140   :  { %v5743_v39 = vpop.f32.mrb[23].mxu1  ;;  %6081 = vmatprep.subr.bf16.mxu1 %v6959_v31 }
 0x141   :  { %v8206_v41 = vadd.f32 %v5741_v35, %v8089_v54  ;;  %v5744_v42 = vadd.f32 %v5743_v39, %v5742_v36  ;;  %v6985_v54 = vld [vmem:[%s8871_s1 + $0x7a0] sm:$0xff]   ;;  %v7018_v35 = vld [vmem:[%s8871_s1 + $0x8d8] sm:$0xff]   ;;  %v7022_v39 = vld [vmem:[%s8871_s1 + $0x8e8] sm:$0xff]  }
 0x142   :  { %3446 = vmatmul.mubr.bf16.vlgmr.msra.gmra.mrb[72].mxu1 %v6955_v34  ;;  %v7019_v36 = vld [vmem:[%s8871_s1 + $0x898] sm:$0xff]  }
 0x143   :  { %v8215_v45 = vadd.f32 %v5744_v42, %v8101_v59  ;;  %6082 = vmatpush3.bf16.msra.mxu1 %v6963_v37  ;;  %3453 = vmatprep.mubr.bf16.mxu1 %v6969_v38  ;;  %v6993_v59 = vld [vmem:[%s8871_s1 + $0x7b0] sm:$0xff]   ;;  %v7020_v37 = vld [vmem:[%s8871_s1 + $0x8e0] sm:$0xff]  }
 0x144   :  { %6083 = vmatprep.subr.bf16.mxu1 %v6966_v40  ;;  %v7021_v38 = vld [vmem:[%s8871_s1 + $0x8a0] sm:$0xff]   ;;  %v7023_v40 = vld [vmem:[%s8871_s1 + $0x8a8] sm:$0xff]  }
 0x147   :  { %6084 = vmatpush3.bf16.msra.mxu1 %v6967_v44 }
 0x148   :  { %6085 = vmatprep.subr.bf16.mxu1 %v6973_v47 }
 0x14a   :  { %3454 = vmatmul.mubr.bf16.gmra.mrb[76].mxu1 %v6972_v48  ;;  %v7026_v48 = vld [vmem:[%s8871_s1 + $0x8f8] sm:$0xff]  }
 0x14b   :  { %6086 = vmatpush3.bf16.msra.mxu1 %v6976_v49  ;;  %3543 = vmatprep.mubr.bf16.mxu1 %v7001_v50 }
 0x14c   :  { %6087 = vmatprep.subr.bf16.mxu1 %v6980_v51  ;;  %v7027_v51 = vld [vmem:[%s8871_s1 + $0x8b8] sm:$0xff]  }
 0x14f   :  { %6088 = vmatpush3.bf16.msra.mxu1 %v6981_v52 }
 0x150   :  { %6089 = vmatprep.subr.bf16.mxu1 %v6984_v53  ;;  %v7028_v53 = vld [vmem:[%s8870_s0 + $0x88] ss:$144 sps:$4 sm:$0xff]  }
 0x153   :  { %6090 = vmatpush3.bf16.msra.mxu1 %v6985_v54 }
 0x154   :  { %6091 = vmatprep.subr.bf16.mxu1 %v6988_v55 }
 0x155   :  { %v5761_v58 = vpop.f32.mrb[24].mxu1 }
 0x156   :  { %v5762_v60 = vpop.f32.mrb[25].mxu1 }
 0x157   :  { %v5763_v62 = vadd.f32 %v5762_v60, %v5761_v58  ;;  %v5764_v63 = vpop.f32.mrb[26].mxu1  ;;  %6092 = vmatpush3.bf16.msra.mxu1 %v6989_v56  ;;  %v7031_v56 = vld [vmem:[%s8870_s0 + $0x1ac] ss:$144 sps:$4 sm:$0xff]  }
 0x158   :  { %v5765_v1 = vpop.f32.mrb[27].mxu1  ;;  %6093 = vmatprep.subr.bf16.mxu1 %v6992_v57 }
 0x159   :  { %v8260_v3 = vadd.f32 %v5763_v62, %v8176_v25  ;;  %v5766_v4 = vadd.f32 %v5765_v1, %v5764_v63 }
 0x15b   :  { %v2961_v10 = vadd.f32 %v5766_v4, %v8182_v28  ;;  %6094 = vmatpush3.bf16.msra.mxu1 %v6993_v59  ;;  %v5854_v28 = vpop.f32.mrb[6].mxu0 }
 0x15c   :  { %6095 = vmatprep.subr.bf16.mxu1 %v6996_v61  ;;  %v5855_v31 = vpop.f32.mrb[7].mxu0 }
 0x15d   :  { %v5767_v13 = vpop.f32.mrb[28].mxu1  ;;  %v8306_v34 = vadd.f32 %v5855_v31, %v5854_v28  ;;  %v5901_v54 = vpop.f32.mrb[8].mxu0 }
 0x15e   :  { %v5768_v15 = vpop.f32.mrb[29].mxu1  ;;  %v5902_v57 = vpop.f32.mrb[9].mxu0 }
 0x15f   :  { %v5769_v16 = vadd.f32 %v5768_v15, %v5767_v13  ;;  %v5770_v17 = vpop.f32.mrb[30].mxu1  ;;  %6096 = vmatpush3.bf16.msra.mxu1 %v6997_v5  ;;  %v5903_v59 = vadd.f32 %v5902_v57, %v5901_v54  ;;  %v5904_v60 = vpop.f32.mrb[10].mxu0  ;;  %v7033_v5 = vld [vmem:[%s8870_s0 + $0x1a8] ss:$144 sps:$4 sm:$0xff]  }
 0x160   :  { %v5771_v19 = vpop.f32.mrb[31].mxu1  ;;  %6137 = vmatprep.subr.bf16.mxu1 %v7003_v8  ;;  %v5905_v63 = vpop.f32.mrb[11].mxu0 }
 0x161   :  { %v8286_v21 = vadd.f32 %v5769_v16, %v8206_v41  ;;  %v5772_v22 = vadd.f32 %v5771_v19, %v5770_v17  ;;  %v7024_v41 = vld [vmem:[%s8871_s1 + $0x8f0] sm:$0xff]   ;;  %v5906_v1 = vadd.f32 %v5905_v63, %v5904_v60  ;;  %v5907_v7 = vpop.f32.mrb[12].mxu0 }
 0x162   :  { %3544 = vmatmul.mubr.bf16.vlgmr.msra.gmra.mrb[80].mxu1 %v6999_v12  ;;  %v5908_v8 = vpop.f32.mrb[13].mxu0 }
 0x163   :  { %v2969_v25 = vadd.f32 %v5772_v22, %v8215_v45  ;;  %6138 = vmatpush3.bf16.msra.mxu1 %v7007_v18  ;;  %3551 = vmatprep.mubr.bf16.mxu1 %v7010_v14  ;;  %v5909_v9 = vadd.f32 %v5908_v8, %v5907_v7 }
 0x164   :  { %6139 = vmatprep.subr.bf16.mxu1 %v7008_v20 }
 0x167   :  { %6140 = vmatpush3.bf16.msra.mxu1 %v7009_v26 }
 0x168   :  { %6141 = vmatprep.subr.bf16.mxu1 %v7013_v30 }
 0x16a   :  { %3552 = vmatmul.mubr.bf16.gmra.mrb[84].mxu1 %v7012_v29 }
 0x16b   :  { %6142 = vmatpush3.bf16.msra.mxu1 %v7016_v32  ;;  %3641 = vmatprep.mubr.bf16.mxu1 %v7030_v33 }
 0x16c   :  { %6143 = vmatprep.subr.bf16.mxu1 %v7018_v35 }
 0x16f   :  { %6144 = vmatpush3.bf16.msra.mxu1 %v7019_v36 }
 0x170   :  { %6145 = vmatprep.subr.bf16.mxu1 %v7020_v37 }
 0x173   :  { %6146 = vmatpush3.bf16.msra.mxu1 %v7021_v38 }
 0x174   :  { %6147 = vmatprep.subr.bf16.mxu1 %v7022_v39 }
 0x175   :  { %v5789_v42 = vpop.f32.mrb[32].mxu1 }
 0x176   :  { %v5790_v43 = vpop.f32.mrb[33].mxu1 }
 0x177   :  { %v5791_v44 = vadd.f32 %v5790_v43, %v5789_v42  ;;  %v5792_v45 = vpop.f32.mrb[34].mxu1  ;;  %6148 = vmatpush3.bf16.msra.mxu1 %v7023_v40 }
 0x178   :  { %v5793_v47 = vpop.f32.mrb[35].mxu1  ;;  %6149 = vmatprep.subr.bf16.mxu1 %v7024_v41 }
 0x179   :  { %v3007_v49 = vadd.f32 %v5791_v44, %v8260_v3  ;;  %v5794_v50 = vadd.f32 %v5793_v47, %v5792_v45 }
 0x17b   :  { %v3010_v52 = vadd.f32 %v5794_v50, %v2961_v10  ;;  %6150 = vmatpush3.bf16.msra.mxu1 %v7025_v46  ;;  %v5910_v10 = vpop.f32.mrb[14].mxu0 }
 0x17c   :  { %6151 = vmatprep.subr.bf16.mxu1 %v7026_v48 }
 0x17d   :  { %v5795_v55 = vpop.f32.mrb[36].mxu1 }
 0x17e   :  { %v5796_v58 = vpop.f32.mrb[37].mxu1 }
 0x17f   :  { %v5797_v61 = vadd.f32 %v5796_v58, %v5795_v55  ;;  %v5798_v62 = vpop.f32.mrb[38].mxu1  ;;  %6152 = vmatpush3.bf16.msra.mxu1 %v7027_v51 }
 0x180   :  { %v5799_v0 = vpop.f32.mrb[39].mxu1 }
 0x181   :  { %v3015_v2 = vadd.f32 %v5797_v61, %v8286_v21  ;;  %v5800_v3 = vadd.f32 %v5799_v0, %v5798_v62 }
 0x182   :  { %3642 = vmatmul.mubr.bf16.vlgmr.msra.gmra.mrb[88].mxu1 %v7028_v53 }
 0x183   :  { %v3018_v4 = vadd.f32 %v5800_v3, %v2969_v25  ;;  %3649 = vmatprep.mubr.bf16.mxu1 %v7031_v56 }
 0x184   :  { %18 = vsyncpa [#allocation5], 0  ;;  %v5911_v12 = vpop.f32.mrb[15].mxu0  ;;  %vm7155_vm0 = vmmov 0   ;;  %vm3687_vm1 = vcmask 261120   ;;  %vm5060_vm2 = vcmask 1043456  }
 0x185   :  { %v5912_v13 = vadd.f32 %v5911_v12, %v5910_v10  ;;  %v5957_v32 = vpop.f32.mrb[16].mxu0  ;;  %vm5081_vm3 = vcmask 1040384  }
 0x186   :  { %v5958_v36 = vpop.f32.mrb[17].mxu0 }
 0x187   :  { %v5959_v37 = vadd.f32 %v5958_v36, %v5957_v32  ;;  %v5960_v38 = vpop.f32.mrb[18].mxu0 }
 0x188   :  { %v5961_v40 = vpop.f32.mrb[19].mxu0 }
 0x189   :  { %v5963_v41 = vpop.f32.mrb[20].mxu0 }
 0x18a   :  { %3650 = vmatmul.mubr.bf16.gmra.mrb[92].mxu1 %v7033_v5 }
 0x195   :  { %v5817_v14 = vpop.f32.mrb[40].mxu1 }
 0x196   :  { %v5818_v15 = vpop.f32.mrb[41].mxu1 }
 0x197   :  { %v5819_v16 = vadd.f32 %v5818_v15, %v5817_v14  ;;  %v5820_v17 = vpop.f32.mrb[42].mxu1 }
 0x198   :  { %v5821_v18 = vpop.f32.mrb[43].mxu1 }
 0x199   :  { %v3056_v19 = vadd.f32 %v5819_v16, %v3007_v49  ;;  %v5822_v20 = vadd.f32 %v5821_v18, %v5820_v17 }
 0x19b   :  { %v3059_v21 = vadd.f32 %v5822_v20, %v3010_v52  ;;  %v3105_v22 = vadd.f32 %v8265_v6, %v3056_v19  ;;  %v5962_v6 = vadd.f32 %v5961_v40, %v5960_v38 }
 0x19d   :  { %v3108_v23 = vadd.f32 %v8271_v11, %v3059_v21  ;;  %v5823_v24 = vpop.f32.mrb[44].mxu1  ;;  %v5964_v11 = vpop.f32.mrb[21].mxu0 }
 0x19e   :  { %v5824_v25 = vpop.f32.mrb[45].mxu1  ;;  %v5965_v42 = vadd.f32 %v5964_v11, %v5963_v41  ;;  %v5966_v43 = vpop.f32.mrb[22].mxu0 }
 0x19f   :  { %v5825_v26 = vadd.f32 %v5824_v25, %v5823_v24  ;;  %v5826_v28 = vpop.f32.mrb[46].mxu1  ;;  %v5967_v44 = vpop.f32.mrb[23].mxu0 }
 0x1a0   :  { %v5827_v29 = vpop.f32.mrb[47].mxu1  ;;  %v5968_v45 = vadd.f32 %v5967_v44, %v5966_v43 }
 0x1a1   :  { %v3064_v30 = vadd.f32 %v5825_v26, %v3015_v2  ;;  %v5828_v31 = vadd.f32 %v5827_v29, %v5826_v28  ;;  %v6013_v2 = vpop.f32.mrb[24].mxu0 }
 0x1a2   :  { %v6014_v3 = vpop.f32.mrb[25].mxu0 }
 0x1a3   :  { %v3067_v33 = vadd.f32 %v5828_v31, %v3018_v4  ;;  %v3113_v35 = vadd.f32 %v8292_v27, %v3064_v30  ;;  %v6015_v4 = vadd.f32 %v6014_v3, %v6013_v2  ;;  %v6016_v5 = vpop.f32.mrb[26].mxu0 }
 0x1a4   :  { %v6017_v7 = vpop.f32.mrb[27].mxu0 }
 0x1a5   :  { %v3116_v39 = vadd.f32 %v8306_v34, %v3067_v33  ;;  %v6018_v8 = vadd.f32 %v6017_v7, %v6016_v5  ;;  %v6019_v10 = vpop.f32.mrb[28].mxu0 }
 0x1a6   :  { %v6020_v12 = vpop.f32.mrb[29].mxu0 }
 0x1b5   :  { %v5873_v46 = vpop.f32.mrb[48].mxu1 }
 0x1b6   :  { %v5874_v47 = vpop.f32.mrb[49].mxu1 }
 0x1b7   :  { %v5875_v48 = vadd.f32 %v5874_v47, %v5873_v46  ;;  %v5876_v49 = vpop.f32.mrb[50].mxu1 }
 0x1b8   :  { %v5877_v50 = vpop.f32.mrb[51].mxu1 }
 0x1b9   :  { %v3154_v51 = vadd.f32 %v5875_v48, %v3105_v22  ;;  %v5878_v27 = vadd.f32 %v5877_v50, %v5876_v49 }
 0x1bb   :  { %v3157_v52 = vadd.f32 %v5878_v27, %v3108_v23  ;;  %v3203_v53 = vadd.f32 %v5903_v59, %v3154_v51  ;;  %v6021_v59 = vadd.f32 %v6020_v12, %v6019_v10 }
 0x1bd   :  { %v3206_v54 = vadd.f32 %v5906_v1, %v3157_v52  ;;  %v5879_v55 = vpop.f32.mrb[52].mxu1  ;;  %v6022_v1 = vpop.f32.mrb[30].mxu0 }
 0x1be   :  { %v5880_v34 = vpop.f32.mrb[53].mxu1  ;;  %v6023_v14 = vpop.f32.mrb[31].mxu0 }
 0x1bf   :  { %v5881_v56 = vadd.f32 %v5880_v34, %v5879_v55  ;;  %v5882_v57 = vpop.f32.mrb[54].mxu1  ;;  %v6024_v16 = vadd.f32 %v6023_v14, %v6022_v1 }
 0x1c0   :  { %v5883_v58 = vpop.f32.mrb[55].mxu1 }
 0x1c1   :  { %v3162_v60 = vadd.f32 %v5881_v56, %v3113_v35  ;;  %v5884_v61 = vadd.f32 %v5883_v58, %v5882_v57  ;;  %v7154_v35 = vmov 0.0  }
 0x1c2   :  { %6290 = vmatprep.subr.bf16.mxu1 %v7154_v35  ;;  %6306 = vmatprep.subr.bf16.mxu0 %v7154_v35 }
 0x1c3   :  { %v3165_v62 = vadd.f32 %v5884_v61, %v3116_v39  ;;  %v3211_v63 = vadd.f32 %v5909_v9, %v3162_v60  ;;  %6294 = vmatprep.mubr.msk.bf16.mxu1 %vm7155_vm0, %v7154_v35  ;;  %6322 = vmatprep.mubr.msk.bf16.mxu0 %vm7155_vm0, %v7154_v35 }
 0x1c5   :  { %v3214_v0 = vadd.f32 %v5912_v13, %v3165_v62  ;;  %v6069_v38 = vpop.f32.mrb[32].mxu0 }
 0x1c6   :  { %v6070_v39 = vpop.f32.mrb[33].mxu0 }
 0x1c7   :  { %v6071_v40 = vadd.f32 %v6070_v39, %v6069_v38  ;;  %v7034_v39 = vld [vmem:[%s8875_s5 + $0x40] sm:$0xff]  }
 0x1c8   :  { %6307 = vmatpush3.bf16.msra.mxu0 %v7034_v39  ;;  %v5628_v39 = vld [vmem:[%s8874_s4 + $0x18] sm:$0xf] }
 0x1c9   :  { %6308 = vmatprep.subr.bf16.mxu0 %v7154_v35 }
 0x1d5   :  { %v5929_v15 = vpop.f32.mrb[56].mxu1 }
 0x1d6   :  { %v5930_v17 = vpop.f32.mrb[57].mxu1 }
 0x1d7   :  { %v5931_v18 = vadd.f32 %v5930_v17, %v5929_v15  ;;  %v5932_v19 = vpop.f32.mrb[58].mxu1 }
 0x1d8   :  { %v5933_v20 = vpop.f32.mrb[59].mxu1 }
 0x1d9   :  { %v3252_v21 = vadd.f32 %v5931_v18, %v3203_v53  ;;  %v5934_v9 = vadd.f32 %v5933_v20, %v5932_v19 }
 0x1db   :  { %v3255_v13 = vadd.f32 %v5934_v9, %v3206_v54  ;;  %v3301_v22 = vadd.f32 %v5959_v37, %v3252_v21  ;;  %v6072_v37 = vpop.f32.mrb[34].mxu0 }
 0x1dd   :  { %v3304_v23 = vadd.f32 %v5962_v6, %v3255_v13  ;;  %v5935_v24 = vpop.f32.mrb[60].mxu1  ;;  %v6073_v6 = vpop.f32.mrb[35].mxu0 }
 0x1de   :  { %v5936_v25 = vpop.f32.mrb[61].mxu1  ;;  %v6074_v41 = vadd.f32 %v6073_v6, %v6072_v37  ;;  %v6075_v46 = vpop.f32.mrb[36].mxu0  ;;  %v7036_v37 = vld [vmem:[%s8875_s5 + $0x50] sm:$0xff]   ;;  %v7037_v6 = vld [vmem:[%s8875_s5 + $0x58] sm:$0xff]  }
 0x1df   :  { %v5937_v26 = vadd.f32 %v5936_v25, %v5935_v24  ;;  %v5938_v28 = vpop.f32.mrb[62].mxu1 }
 0x1e0   :  { %v5939_v29 = vpop.f32.mrb[63].mxu1 }
 0x1e1   :  { %v3260_v30 = vadd.f32 %v5937_v26, %v3211_v63  ;;  %v5940_v31 = vadd.f32 %v5939_v29, %v5938_v28 }
 0x1e3   :  { %v3263_v32 = vadd.f32 %v5940_v31, %v3214_v0  ;;  %v3309_v33 = vadd.f32 %v5965_v42, %v3260_v30 }
 0x1e5   :  { %v3312_v36 = vadd.f32 %v5968_v45, %v3263_v32  ;;  %v6076_v45 = vpop.f32.mrb[37].mxu0 }
 0x1e6   :  { %v6077_v50 = vadd.f32 %v6076_v45, %v6075_v46  ;;  %v6078_v51 = vpop.f32.mrb[38].mxu0  ;;  %v7039_v46 = vld [vmem:[%s8875_s5 + $0x68] sm:$0xff]  }
 0x1e7   :  { %v6079_v27 = vpop.f32.mrb[39].mxu0 }
 0x1e8   :  { %v6080_v54 = vadd.f32 %v6079_v27, %v6078_v51 }
 0x1f5   :  { %v5985_v11 = vpop.f32.mrb[64].mxu1 }
 0x1f6   :  { %v5986_v42 = vpop.f32.mrb[65].mxu1 }
 0x1f7   :  { %v5987_v43 = vadd.f32 %v5986_v42, %v5985_v11  ;;  %v5988_v44 = vpop.f32.mrb[66].mxu1 }
 0x1f8   :  { %v5989_v47 = vpop.f32.mrb[67].mxu1 }
 0x1f9   :  { %v3350_v48 = vadd.f32 %v5987_v43, %v3301_v22  ;;  %v5990_v49 = vadd.f32 %v5989_v47, %v5988_v44 }
 0x1fb   :  { %v3353_v52 = vadd.f32 %v5990_v49, %v3304_v23  ;;  %v3399_v53 = vadd.f32 %v6015_v4, %v3350_v48 }
 0x1fd   :  { %v3402_v55 = vadd.f32 %v6018_v8, %v3353_v52  ;;  %v5991_v34 = vpop.f32.mrb[68].mxu1 }
 0x1fe   :  { %v5992_v56 = vpop.f32.mrb[69].mxu1 }
 0x1ff   :  { %v5993_v57 = vadd.f32 %v5992_v56, %v5991_v34  ;;  %v5994_v58 = vpop.f32.mrb[70].mxu1 }
 0x200   :  { %v5995_v60 = vpop.f32.mrb[71].mxu1 }
 0x201   :  { %v3358_v61 = vadd.f32 %v5993_v57, %v3309_v33  ;;  %v5996_v62 = vadd.f32 %v5995_v60, %v5994_v58 }
 0x203   :  { %v3361_v63 = vadd.f32 %v5996_v62, %v3312_v36  ;;  %v3407_v0 = vadd.f32 %v6021_v59, %v3358_v61 }
 0x205   :  { %v3410_v2 = vadd.f32 %v6024_v16, %v3361_v63 }
 0x208   :  { %v6125_v3 = vpop.f32.mrb[40].mxu0 }
 0x209   :  { %v6126_v5 = vpop.f32.mrb[41].mxu0 }
 0x20a   :  { %v6127_v7 = vadd.f32 %v6126_v5, %v6125_v3  ;;  %v6128_v10 = vpop.f32.mrb[42].mxu0 }
 0x20b   :  { %v6129_v12 = vpop.f32.mrb[43].mxu0 }
 0x20c   :  { %v6130_v14 = vadd.f32 %v6129_v12, %v6128_v10  ;;  %v5568_v10 = vld [vmem:[%s8873_s3] ss:$0 sm:$0xff] }
 0x210   :  { %v6131_v20 = vpop.f32.mrb[44].mxu0 }
 0x211   :  { %v6132_v21 = vpop.f32.mrb[45].mxu0 }
 0x212   :  { %v6133_v22 = vadd.f32 %v6132_v21, %v6131_v20  ;;  %v6134_v59 = vpop.f32.mrb[46].mxu0 }
 0x213   :  { %v6135_v16 = vpop.f32.mrb[47].mxu0 }
 0x214   :  { %v6136_v25 = vadd.f32 %v6135_v16, %v6134_v59 }
 0x215   :  { %v6041_v1 = vpop.f32.mrb[72].mxu1 }
 0x216   :  { %v6042_v4 = vpop.f32.mrb[73].mxu1 }
 0x217   :  { %v6043_v15 = vadd.f32 %v6042_v4, %v6041_v1  ;;  %v6044_v8 = vpop.f32.mrb[74].mxu1 }
 0x218   :  { %v6045_v17 = vpop.f32.mrb[75].mxu1 }
 0x219   :  { %v3448_v18 = vadd.f32 %v6043_v15, %v3399_v53  ;;  %v6046_v19 = vadd.f32 %v6045_v17, %v6044_v8 }
 0x21b   :  { %v3451_v9 = vadd.f32 %v6046_v19, %v3402_v55  ;;  %v3497_v13 = vadd.f32 %v6071_v40, %v3448_v18  ;;  %v7035_v40 = vld [vmem:[%s8875_s5 + $0x48] sm:$0xff]  }
 0x21c   :  { %6309 = vmatpush3.bf16.msra.mxu0 %v7035_v40  ;;  %v5638_v40 = vld [vmem:[%s8874_s4 + $0x1c] sm:$0xf] }
 0x21d   :  { %v3500_v23 = vadd.f32 %v6074_v41, %v3451_v9  ;;  %v6047_v24 = vpop.f32.mrb[76].mxu1  ;;  %6310 = vmatprep.subr.bf16.mxu0 %v7154_v35  ;;  %v7038_v41 = vld [vmem:[%s8875_s5 + $0x60] sm:$0xff]  }
 0x21e   :  { %v6048_v26 = vpop.f32.mrb[77].mxu1 }
 0x21f   :  { %v6049_v28 = vadd.f32 %v6048_v26, %v6047_v24  ;;  %v6050_v29 = vpop.f32.mrb[78].mxu1 }
 0x220   :  { %v6051_v30 = vpop.f32.mrb[79].mxu1  ;;  %6311 = vmatpush3.bf16.msra.mxu0 %v7036_v37  ;;  %v7040_v37 = vld [vmem:[%s8875_s5 + $0x70] sm:$0xff]  }
 0x221   :  { %v3456_v31 = vadd.f32 %v6049_v28, %v3407_v0  ;;  %v6052_v32 = vadd.f32 %v6051_v30, %v6050_v29  ;;  %6312 = vmatprep.subr.bf16.mxu0 %v7154_v35 }
 0x223   :  { %v3459_v33 = vadd.f32 %v6052_v32, %v3410_v2  ;;  %v3505_v36 = vadd.f32 %v6077_v50, %v3456_v31  ;;  %v5567_v2 = vld [vmem:[%s8872_s2] ss:$0 sm:$0xff]  ;;  %v5570_v32 = vld [vmem:[%s8874_s4 + $0x4] sm:$0xf] }
 0x224   :  { %6313 = vmatpush3.bf16.msra.mxu0 %v7037_v6  ;;  %v3686_v31 = vld [vmem:[%s8874_s4] sm:$0xf]  ;;  %v7041_v6 = vld [vmem:[%s8875_s5 + $0x78] sm:$0xff]  }
 0x225   :  { %v3508_v38 = vadd.f32 %v6080_v54, %v3459_v33  ;;  %6314 = vmatprep.subr.bf16.mxu0 %v7154_v35  ;;  %v5598_v33 = vld [vmem:[%s8874_s4 + $0xc] sm:$0xf] }
 0x228   :  { %6315 = vmatpush3.bf16.msra.mxu0 %v7038_v41  ;;  %v5648_v41 = vld [vmem:[%s8874_s4 + $0x20] sm:$0xf] }
 0x229   :  { %6316 = vmatprep.subr.bf16.mxu0 %v7154_v35 }
 0x22c   :  { %6317 = vmatpush3.bf16.msra.mxu0 %v7039_v46 }
 0x22d   :  { %6318 = vmatprep.subr.bf16.mxu0 %v7154_v35 }
 0x230   :  { %6319 = vmatpush3.bf16.msra.mxu0 %v7040_v37 }
 0x231   :  { %6320 = vmatprep.subr.bf16.mxu0 %v7154_v35 }
 0x234   :  { %6321 = vmatpush3.bf16.msra.mxu0 %v7041_v6 }
 0x235   :  { %v6097_v11 = vpop.f32.mrb[80].mxu1  ;;  %6326 = vmatprep.subr.bf16.mxu0 %v7154_v35 }
 0x236   :  { %v6098_v42 = vpop.f32.mrb[81].mxu1 }
 0x237   :  { %v6099_v43 = vadd.f32 %v6098_v42, %v6097_v11  ;;  %v6100_v44 = vpop.f32.mrb[82].mxu1 }
 0x238   :  { %v6101_v47 = vpop.f32.mrb[83].mxu1 }
 0x239   :  { %v3546_v45 = vadd.f32 %v6099_v43, %v3497_v13  ;;  %v6102_v48 = vadd.f32 %v6101_v47, %v6100_v44  ;;  %v7042_v47 = vld [vmem:[%s8875_s5] sm:$0xff]  }
 0x23b   :  { %v3549_v49 = vadd.f32 %v6102_v48, %v3500_v23  ;;  %v3595_v50 = vadd.f32 %v6127_v7, %v3546_v45 }
 0x23d   :  { %v3598_v51 = vadd.f32 %v6130_v14, %v3549_v49  ;;  %v6103_v27 = vpop.f32.mrb[84].mxu1 }
 0x23e   :  { %v6104_v52 = vpop.f32.mrb[85].mxu1 }
 0x23f   :  { %v6105_v53 = vadd.f32 %v6104_v52, %v6103_v27  ;;  %v6106_v54 = vpop.f32.mrb[86].mxu1  ;;  %v7044_v27 = vld [vmem:[%s8875_s5 + $0x10] sm:$0xff]   ;;  %v7045_v52 = vld [vmem:[%s8875_s5 + $0x18] sm:$0xff]  }
 0x240   :  { %v6107_v55 = vpop.f32.mrb[87].mxu1 }
 0x241   :  { %v3554_v34 = vadd.f32 %v6105_v53, %v3505_v36  ;;  %v6108_v56 = vadd.f32 %v6107_v55, %v6106_v54  ;;  %v5608_v36 = vld [vmem:[%s8874_s4 + $0x10] sm:$0xf]  ;;  %v7046_v53 = vld [vmem:[%s8875_s5 + $0x20] sm:$0xff]   ;;  %v7047_v54 = vld [vmem:[%s8875_s5 + $0x28] sm:$0xff]  }
 0x242   :  { %v7048_v55 = vld [vmem:[%s8875_s5 + $0x30] sm:$0xff]  }
 0x243   :  { %v3557_v57 = vadd.f32 %v6108_v56, %v3508_v38  ;;  %v3603_v58 = vadd.f32 %v6133_v22, %v3554_v34  ;;  %v5618_v38 = vld [vmem:[%s8874_s4 + $0x14] sm:$0xf]  ;;  %v7049_v34 = vld [vmem:[%s8875_s5 + $0x38] sm:$0xff]  }
 0x245   :  { %v3606_v60 = vadd.f32 %v6136_v25, %v3557_v57  ;;  %v5588_v57 = vld [vmem:[%s8874_s4 + $0x8] sm:$0xf] }
 0x255   :  { %v6153_v61 = vpop.f32.mrb[88].mxu1 }
 0x256   :  { %v6154_v62 = vpop.f32.mrb[89].mxu1 }
 0x257   :  { %v6155_v63 = vadd.f32 %v6154_v62, %v6153_v61  ;;  %v6156_v0 = vpop.f32.mrb[90].mxu1  ;;  %v7052_v61 = vld [vmem:[%s8875_s5 + $0x90] sm:$0xff]   ;;  %v7053_v62 = vld [vmem:[%s8875_s5 + $0x98] sm:$0xff]  }
 0x258   :  { %v6157_v3 = vpop.f32.mrb[91].mxu1 }
 0x259   :  { %v3644_v5 = vadd.f32 %v6155_v63, %v3595_v50  ;;  %v6158_v7 = vadd.f32 %v6157_v3, %v6156_v0  ;;  %v7054_v63 = vld [vmem:[%s8875_s5 + $0xa0] sm:$0xff]   ;;  %v7055_v0 = vld [vmem:[%s8875_s5 + $0xa8] sm:$0xff]   ;;  %v7057_v3 = vld [vmem:[%s8875_s5 + $0xb8] sm:$0xff]  }
 0x25b   :  { %v3665_v12 = vmul.f32 %v5567_v2, %v3644_v5  ;;  %v3647_v1 = vadd.f32 %v6158_v7, %v3598_v51  ;;  %v7043_v51 = vld [vmem:[%s8875_s5 + $0x8] sm:$0xff]  }
 0x25d   :  { %v3676_v14 = vadd.f32 %v5568_v10, %v3665_v12  ;;  %v3666_v4 = vmul.f32 %v5567_v2, %v3647_v1  ;;  %v6159_v15 = vpop.f32.mrb[92].mxu1 }
 0x25e   :  { %v6160_v8 = vpop.f32.mrb[93].mxu1 }
 0x25f   :  { %v3677_v17 = vadd.f32 %v5568_v10, %v3666_v4  ;;  %v6161_v18 = vadd.f32 %v6160_v8, %v6159_v15  ;;  %v6162_v19 = vpop.f32.mrb[94].mxu1  ;;  %v3680_v21 = vmax.f32 %v3676_v14, 0.0 }
 0x260   :  { %v6163_v20 = vpop.f32.mrb[95].mxu1 }
 0x261   :  { %v3681_v9 = vmax.f32 %v3677_v17, 0.0  ;;  %v3652_v13 = vadd.f32 %v6161_v18, %v3603_v58  ;;  %v6164_v22 = vadd.f32 %v6163_v20, %v6162_v19  ;;  %v7050_v58 = vld [vmem:[%s8875_s5 + $0x80] sm:$0xff]  }
 0x263   :  { %v8389_v59 = vpack.c.bf16 %v3681_v9, %v3680_v21  ;;  %v3667_v16 = vmul.f32 %v5567_v2, %v3652_v13  ;;  %v3655_v23 = vadd.f32 %v6164_v22, %v3606_v60  ;;  %v7051_v60 = vld [vmem:[%s8875_s5 + $0x88] sm:$0xff]   ;;  %v7058_v13 = vld [vmem:[%s8875_s5 + $0xc0] sm:$0xff]  }
 0x265   :  { %v3678_v24 = vadd.f32 %v5568_v10, %v3667_v16  ;;  %v3668_v25 = vmul.f32 %v5567_v2, %v3655_v23  ;;  %6291 = vmatpush3.bf16.msra.mxu1 %v8389_v59  ;;  %v7056_v2 = vld [vmem:[%s8875_s5 + $0xb0] sm:$0xff]  }
 0x266   :  { %6292 = vmatprep.subr.bf16.mxu1 %v7154_v35 }
 0x267   :  { %v3679_v26 = vadd.f32 %v5568_v10, %v3668_v25  ;;  %v3682_v28 = vmax.f32 %v3678_v24, 0.0 }
 0x269   :  { %v3683_v29 = vmax.f32 %v3679_v26, 0.0  ;;  %v7059_v26 = vld [vmem:[%s8875_s5 + $0xc8] sm:$0xff]  }
 0x26b   :  { %v8393_v30 = vpack.c.bf16 %v3683_v29, %v3682_v28  ;;  %v7060_v28 = vld [vmem:[%s8875_s5 + $0xd0] sm:$0xff]   ;;  %v7061_v29 = vld [vmem:[%s8875_s5 + $0xd8] sm:$0xff]  }
 0x26d   :  { %6293 = vmatpush3.bf16.msra.mxu1 %v8393_v30 }
 0x26e   :  { %6298 = vmatprep.subr.bf16.mxu1 %v7154_v35 }
 0x270   :  { %6295 = vmatmul.mubr.msk.bf16.vlgmr.msra.gmra.mrb[96].mxu1 %vm3687_vm1, %v3686_v31  ;;  %v7063_v31 = vld [vmem:[%s8875_s5 + $0xe8] sm:$0xff]  }
 0x271   :  { %6299 = vmatpush3.bf16.msra.mxu1 %v8389_v59  ;;  %6302 = vmatprep.mubr.msk.bf16.mxu1 %vm7155_vm0, %v7154_v35 }
 0x272   :  { %6300 = vmatprep.subr.bf16.mxu1 %v7154_v35 }
 0x275   :  { %6301 = vmatpush3.bf16.msra.mxu1 %v8393_v30 }
 0x276   :  { %6374 = vmatprep.subr.bf16.mxu1 %v7154_v35 }
 0x278   :  { %6303 = vmatmul.mubr.msk.bf16.vlgmr.msra.gmra.mrb[100].mxu1 %vm3687_vm1, %v5570_v32  ;;  %v7064_v32 = vld [vmem:[%s8875_s5 + $0xf0] sm:$0xff]  }
 0x279   :  { %6375 = vmatpush3.bf16.msra.mxu1 %v8389_v59  ;;  %6378 = vmatprep.mubr.msk.bf16.mxu1 %vm7155_vm0, %v7154_v35 }
 0x27a   :  { %6376 = vmatprep.subr.bf16.mxu1 %v7154_v35 }
 0x27d   :  { %6377 = vmatpush3.bf16.msra.mxu1 %v8393_v30 }
 0x27e   :  { %6402 = vmatprep.subr.bf16.mxu1 %v7154_v35 }
 0x280   :  { %6379 = vmatmul.mubr.msk.bf16.vlgmr.msra.gmra.mrb[104].mxu1 %vm3687_vm1, %v5598_v33  ;;  %v7065_v33 = vld [vmem:[%s8875_s5 + $0xf8] sm:$0xff]  }
 0x281   :  { %6403 = vmatpush3.bf16.msra.mxu1 %v8389_v59  ;;  %6406 = vmatprep.mubr.msk.bf16.mxu1 %vm7155_vm0, %v7154_v35 }
 0x282   :  { %6404 = vmatprep.subr.bf16.mxu1 %v7154_v35 }
 0x285   :  { %6405 = vmatpush3.bf16.msra.mxu1 %v8393_v30 }
 0x286   :  { %6430 = vmatprep.subr.bf16.mxu1 %v7154_v35 }
 0x288   :  { %6407 = vmatmul.mubr.msk.bf16.vlgmr.msra.gmra.mrb[108].mxu1 %vm3687_vm1, %v5608_v36 }
 0x289   :  { %6431 = vmatpush3.bf16.msra.mxu1 %v8389_v59  ;;  %6434 = vmatprep.mubr.msk.bf16.mxu1 %vm7155_vm0, %v7154_v35 }
 0x28a   :  { %6432 = vmatprep.subr.bf16.mxu1 %v7154_v35 }
 0x28d   :  { %6433 = vmatpush3.bf16.msra.mxu1 %v8393_v30 }
 0x28e   :  { %6458 = vmatprep.subr.bf16.mxu1 %v7154_v35 }
 0x290   :  { %6435 = vmatmul.mubr.msk.bf16.vlgmr.msra.gmra.mrb[112].mxu1 %vm3687_vm1, %v5618_v38 }
 0x291   :  { %6459 = vmatpush3.bf16.msra.mxu1 %v8389_v59  ;;  %6462 = vmatprep.mubr.msk.bf16.mxu1 %vm7155_vm0, %v7154_v35 }
 0x292   :  { %6460 = vmatprep.subr.bf16.mxu1 %v7154_v35 }
 0x295   :  { %6461 = vmatpush3.bf16.msra.mxu1 %v8393_v30 }
 0x296   :  { %6486 = vmatprep.subr.bf16.mxu1 %v7154_v35 }
 0x298   :  { %6463 = vmatmul.mubr.msk.bf16.vlgmr.msra.gmra.mrb[116].mxu1 %vm3687_vm1, %v5628_v39 }
 0x299   :  { %6487 = vmatpush3.bf16.msra.mxu1 %v8389_v59  ;;  %6490 = vmatprep.mubr.msk.bf16.mxu1 %vm7155_vm0, %v7154_v35 }
 0x29a   :  { %6488 = vmatprep.subr.bf16.mxu1 %v7154_v35 }
 0x29d   :  { %6489 = vmatpush3.bf16.msra.mxu1 %v8393_v30 }
 0x29e   :  { %6514 = vmatprep.subr.bf16.mxu1 %v7154_v35 }
 0x2a0   :  { %6491 = vmatmul.mubr.msk.bf16.vlgmr.msra.gmra.mrb[120].mxu1 %vm3687_vm1, %v5638_v40  ;;  %v7066_v40 = vld [vmem:[%s8875_s5 + $0x100] sm:$0xff]  }
 0x2a1   :  { %6515 = vmatpush3.bf16.msra.mxu1 %v8389_v59  ;;  %6518 = vmatprep.mubr.msk.bf16.mxu1 %vm7155_vm0, %v7154_v35 }
 0x2a2   :  { %6516 = vmatprep.subr.bf16.mxu1 %v7154_v35 }
 0x2a5   :  { %6517 = vmatpush3.bf16.msra.mxu1 %v8393_v30 }
 0x2a8   :  { %6519 = vmatmul.mubr.msk.bf16.vlgmr.msra.gmra.mrb[124].mxu1 %vm3687_vm1, %v5648_v41  ;;  %v7067_v41 = vld [vmem:[%s8875_s5 + $0x108] sm:$0xff]  }
 0x2a9   :  { %6574 = vmatprep.mubr.msk.f32.mxu1 %vm7155_vm0, %v7154_v35 }
 0x343   :  { %v3725_v11 = vpop.f32.mrb[96].mxu1 }
 0x344   :  { %v6296_v42 = vpop.f32.mrb[97].mxu1  ;;  %v3731_v56 = vpack.c.bf16 %v3725_v11, %v3725_v11  ;;  %v7068_v11 = vld [vmem:[%s8875_s5 + $0x110] sm:$0xff]  }
 0x345   :  { %v3728_v43 = vpop.f32.mrb[98].mxu1  ;;  %v7069_v42 = vld [vmem:[%s8875_s5 + $0x118] sm:$0xff]  }
 0x346   :  { %v6297_v44 = vpop.f32.mrb[99].mxu1  ;;  %v7070_v43 = vld [vmem:[%s8875_s5 + $0x120] sm:$0xff]  }
 0x347   :  { %v7071_v44 = vld [vmem:[%s8875_s5 + $0x128] sm:$0xff]  }
 0x34b   :  { %v3787_v46 = vpop.f32.mrb[100].mxu1 }
 0x34c   :  { %v3793_v45 = vpack.c.bf16 %v3787_v46, %v3787_v46  ;;  %v6304_v48 = vpop.f32.mrb[101].mxu1  ;;  %v7072_v46 = vld [vmem:[%s8875_s5 + $0x130] sm:$0xff]  }
 0x34d   :  { %v3790_v49 = vpop.f32.mrb[102].mxu1 }
 0x34e   :  { %6323 = vmatmul.mubr.bf16.vlgmr.msra.gmra.mrb[48].mxu0 %v3793_v45  ;;  %v6305_v50 = vpop.f32.mrb[103].mxu1 }
 0x34f   :  { %6327 = vmatpush3.bf16.msra.mxu0 %v7042_v47  ;;  %6342 = vmatprep.mubr.msk.bf16.mxu0 %vm7155_vm0, %v7154_v35  ;;  %v7073_v47 = vld [vmem:[%s8875_s5 + $0x138] sm:$0xff]  }
 0x350   :  { %6328 = vmatprep.subr.bf16.mxu0 %v7154_v35 }
 0x353   :  { %6329 = vmatpush3.bf16.msra.mxu0 %v7043_v51  ;;  %v4176_v5 = vpop.f32.mrb[104].mxu1  ;;  %v7074_v51 = vld [vmem:[%s8875_s5 + $0x140] sm:$0xff]  }
 0x354   :  { %6330 = vmatprep.subr.bf16.mxu0 %v7154_v35  ;;  %v6380_v7 = vpop.f32.mrb[105].mxu1  ;;  %v4182_v38 = vpack.c.bf16 %v4176_v5, %v4176_v5  ;;  %v7082_v5 = vld [vmem:[%s8875_s5 + $0x180] sm:$0xff]  }
 0x355   :  { %v4179_v10 = vpop.f32.mrb[106].mxu1  ;;  %v7083_v7 = vld [vmem:[%s8875_s5 + $0x188] sm:$0xff]  }
 0x356   :  { %v6381_v12 = vpop.f32.mrb[107].mxu1  ;;  %v7084_v10 = vld [vmem:[%s8875_s5 + $0x190] sm:$0xff]  }
 0x357   :  { %6331 = vmatpush3.bf16.msra.mxu0 %v7044_v27  ;;  %v7085_v12 = vld [vmem:[%s8875_s5 + $0x198] sm:$0xff]  }
 0x358   :  { %6332 = vmatprep.subr.bf16.mxu0 %v7154_v35 }
 0x35b   :  { %6333 = vmatpush3.bf16.msra.mxu0 %v7045_v52  ;;  %v8558_v1 = vpop.f32.mrb[108].mxu1  ;;  %v5084_v52 = vld [vmem:[%s8878_s8] sm:$0xff] }
 0x35c   :  { %6334 = vmatprep.subr.bf16.mxu0 %v7154_v35  ;;  %v6408_v14 = vpop.f32.mrb[109].mxu1  ;;  %v4333_v49 = vpack.c.bf16 %v8558_v1, %v8558_v1  ;;  %v7086_v1 = vld [vmem:[%s8875_s5 + $0x1a0] sm:$0xff]  }
 0x35d   :  { %v4330_v4 = vpop.f32.mrb[110].mxu1  ;;  %v7087_v14 = vld [vmem:[%s8875_s5 + $0x1a8] sm:$0xff]  }
 0x35e   :  { %v6409_v15 = vpop.f32.mrb[111].mxu1  ;;  %v7088_v4 = vld [vmem:[%s8875_s5 + $0x1b0] sm:$0xff]  }
 0x35f   :  { %6335 = vmatpush3.bf16.msra.mxu0 %v7046_v53  ;;  %v5085_v53 = vld [vmem:[%s8878_s8 + $0x8] sm:$0xff]  ;;  %v7089_v15 = vld [vmem:[%s8875_s5 + $0x1b8] sm:$0xff]  }
 0x360   :  { %6336 = vmatprep.subr.bf16.mxu0 %v7154_v35 }
 0x363   :  { %6337 = vmatpush3.bf16.msra.mxu0 %v7047_v54  ;;  %v8560_v8 = vpop.f32.mrb[112].mxu1  ;;  %v5086_v54 = vld [vmem:[%s8878_s8 + $0x10] sm:$0xff] }
 0x364   :  { %6338 = vmatprep.subr.bf16.mxu0 %v7154_v35  ;;  %v6436_v17 = vpop.f32.mrb[113].mxu1 }
 0x365   :  { %v4481_v18 = vpop.f32.mrb[114].mxu1  ;;  %v7090_v17 = vld [vmem:[%s8875_s5 + $0x1c0] sm:$0xff]  }
 0x366   :  { %v6437_v19 = vpop.f32.mrb[115].mxu1  ;;  %v7091_v18 = vld [vmem:[%s8875_s5 + $0x1c8] sm:$0xff]  }
 0x367   :  { %6339 = vmatpush3.bf16.msra.mxu0 %v7048_v55  ;;  %v7075_v55 = vld [vmem:[%s8875_s5 + $0x148] sm:$0xff]   ;;  %v7092_v19 = vld [vmem:[%s8875_s5 + $0x1d0] sm:$0xff]  }
 0x368   :  { %6340 = vmatprep.subr.bf16.mxu0 %v7154_v35 }
 0x36b   :  { %6341 = vmatpush3.bf16.msra.mxu0 %v7049_v34  ;;  %v8562_v20 = vpop.f32.mrb[116].mxu1  ;;  %v6578_v34 = vpack.c.bf16 %v5085_v53, %v5084_v52 }
 0x36c   :  { %6346 = vmatprep.subr.bf16.mxu0 %v7154_v35  ;;  %v6464_v21 = vpop.f32.mrb[117].mxu1 }
 0x36d   :  { %v4632_v22 = vpop.f32.mrb[118].mxu1  ;;  %v7094_v21 = vld [vmem:[%s8875_s5 + $0x1e0] sm:$0xff]  }
 0x36e   :  { %6343 = vmatmul.mubr.bf16.vlgmr.msra.gmra.mrb[48].mxu0 %v3731_v56  ;;  %v6465_v23 = vpop.f32.mrb[119].mxu1  ;;  %v5087_v56 = vld [vmem:[%s8878_s8 + $0x18] sm:$0xff] }
 0x36f   :  { %6347 = vmatpush3.bf16.msra.mxu0 %v8389_v59  ;;  %6350 = vmatprep.mubr.msk.bf16.mxu0 %vm7155_vm0, %v7154_v35  ;;  %v7097_v22 = vld [vmem:[%s8875_s5 + $0x1f8] sm:$0xff]   ;;  %v7099_v23 = vld [vmem:[%s8875_s5 + $0x208] sm:$0xff]  }
 0x370   :  { %6348 = vmatprep.subr.bf16.mxu0 %v7154_v35 }
 0x373   :  { %6349 = vmatpush3.bf16.msra.mxu0 %v8393_v30  ;;  %v7062_v30 = vld [vmem:[%s8875_s5 + $0xe0] sm:$0xff]   ;;  %v8597_v36 = vpop.f32.mrb[120].mxu1 }
 0x374   :  { %6354 = vmatprep.subr.bf16.mxu0 %v7154_v35  ;;  %v6492_v39 = vpop.f32.mrb[121].mxu1 }
 0x375   :  { %v4783_v37 = vpop.f32.mrb[122].mxu1 }
 0x376   :  { %6351 = vmatmul.mubr.msk.bf16.vlgmr.msra.gmra.mrb[52].mxu0 %vm3687_vm1, %v5588_v57  ;;  %v6493_v6 = vpop.f32.mrb[123].mxu1  ;;  %v7156_v57 = vmov 0.0|0.0   ;;  %v5093_v37 = vld [vmem:[%s8878_s8 + $0x48] sm:$0xff] }
 0x377   :  { %6355 = vmatpush3.bf16.msra.mxu0 %v7050_v58  ;;  %6370 = vmatprep.mubr.msk.bf16.mxu0 %vm7155_vm0, %v7154_v35  ;;  %v6581_v58 = vpack.c.bf16 %v5087_v56, %v5086_v54 }
 0x378   :  { %6356 = vmatprep.subr.bf16.mxu0 %v7154_v35  ;;  %6577 = vmatprep.subr.bf16.mxu1 %v7156_v57 }
 0x379   :  { %6579 = vmatpush3.bf16.msra.mxu1 %v6578_v34 }
 0x37a   :  { %6580 = vmatprep.subr.bf16.mxu1 %v7156_v57 }
 0x37b   :  { %6357 = vmatpush3.bf16.msra.mxu0 %v7051_v60  ;;  %v8633_v45 = vpop.f32.mrb[124].mxu1  ;;  %v7076_v60 = vld [vmem:[%s8875_s5 + $0x150] sm:$0xff]  }
 0x37c   :  { %6358 = vmatprep.subr.bf16.mxu0 %v7154_v35  ;;  %v6520_v48 = vpop.f32.mrb[125].mxu1 }
 0x37d   :  { %v4934_v50 = vpop.f32.mrb[126].mxu1  ;;  %6582 = vmatpush3.bf16.msra.mxu1 %v6581_v58 }
 0x37e   :  { %v6521_v27 = vpop.f32.mrb[127].mxu1  ;;  %6583 = vmatprep.subr.bf16.mxu1 %v7156_v57 }
 0x37f   :  { %6359 = vmatpush3.bf16.msra.mxu0 %v7052_v61  ;;  %v7077_v61 = vld [vmem:[%s8875_s5 + $0x158] sm:$0xff]  }
 0x380   :  { %6360 = vmatprep.subr.bf16.mxu0 %v7154_v35 }
 0x383   :  { %6361 = vmatpush3.bf16.msra.mxu0 %v7053_v62  ;;  %v7078_v62 = vld [vmem:[%s8875_s5 + $0x160] sm:$0xff]  }
 0x384   :  { %6362 = vmatprep.subr.bf16.mxu0 %v7154_v35 }
 0x387   :  { %6363 = vmatpush3.bf16.msra.mxu0 %v7054_v63  ;;  %v7079_v63 = vld [vmem:[%s8875_s5 + $0x168] sm:$0xff]  }
 0x388   :  { %6364 = vmatprep.subr.bf16.mxu0 %v7154_v35 }
 0x38b   :  { %6365 = vmatpush3.bf16.msra.mxu0 %v7055_v0  ;;  %v7080_v0 = vld [vmem:[%s8875_s5 + $0x170] sm:$0xff]  }
 0x38c   :  { %6366 = vmatprep.subr.bf16.mxu0 %v7154_v35 }
 0x38f   :  { %6367 = vmatpush3.bf16.msra.mxu0 %v7056_v2  ;;  %v7081_v2 = vld [vmem:[%s8875_s5 + $0x178] sm:$0xff]  }
 0x390   :  { %6368 = vmatprep.subr.bf16.mxu0 %v7154_v35 }
 0x393   :  { %6369 = vmatpush3.bf16.msra.mxu0 %v7057_v3  ;;  %v4484_v3 = vpack.c.bf16 %v8560_v8, %v8560_v8  ;;  %v4635_v8 = vpack.c.bf16 %v8562_v20, %v8562_v20  ;;  %v7093_v20 = vld [vmem:[%s8875_s5 + $0x1d8] sm:$0xff]  }
 0x394   :  { %6382 = vmatprep.subr.bf16.mxu0 %v7154_v35 }
 0x449   :  { %v4025_v9 = vpop.f32.mrb[52].mxu0 }
 0x44a   :  { %v4031_v59 = vpack.c.bf16 %v4025_v9, %v4025_v9  ;;  %v6352_v16 = vpop.f32.mrb[53].mxu0  ;;  %v7095_v9 = vld [vmem:[%s8875_s5 + $0x1e8] sm:$0xff]  }
 0x44b   :  { %v4028_v24 = vpop.f32.mrb[54].mxu0  ;;  %v7098_v16 = vld [vmem:[%s8875_s5 + $0x200] sm:$0xff]  }
 0x44c   :  { %6371 = vmatmul.mubr.bf16.vlgmr.msra.gmra.mrb[48].mxu0 %v4031_v59  ;;  %v6353_v25 = vpop.f32.mrb[55].mxu0  ;;  %v4786_v59 = vpack.c.bf16 %v8597_v36, %v8597_v36  ;;  %v7100_v24 = vld [vmem:[%s8875_s5 + $0x210] sm:$0xff]  }
 0x44d   :  { %6383 = vmatpush3.bf16.msra.mxu0 %v7058_v13  ;;  %6398 = vmatprep.mubr.msk.bf16.mxu0 %vm7155_vm0, %v7154_v35  ;;  %v7096_v13 = vld [vmem:[%s8875_s5 + $0x1f0] sm:$0xff]   ;;  %v7101_v25 = vld [vmem:[%s8875_s5 + $0x218] sm:$0xff]  }
 0x44e   :  { %6384 = vmatprep.subr.bf16.mxu0 %v7154_v35 }
 0x451   :  { %6385 = vmatpush3.bf16.msra.mxu0 %v7059_v26  ;;  %v7102_v26 = vld [vmem:[%s8875_s5 + $0x220] sm:$0xff]  }
 0x452   :  { %6386 = vmatprep.subr.bf16.mxu0 %v7154_v35 }
 0x455   :  { %6387 = vmatpush3.bf16.msra.mxu0 %v7060_v28  ;;  %v7103_v28 = vld [vmem:[%s8875_s5 + $0x228] sm:$0xff]  }
 0x456   :  { %6388 = vmatprep.subr.bf16.mxu0 %v7154_v35 }
 0x459   :  { %6389 = vmatpush3.bf16.msra.mxu0 %v7061_v29  ;;  %v7104_v29 = vld [vmem:[%s8875_s5 + $0x230] sm:$0xff]  }
 0x45a   :  { %6390 = vmatprep.subr.bf16.mxu0 %v7154_v35 }
 0x45d   :  { %6391 = vmatpush3.bf16.msra.mxu0 %v7062_v30  ;;  %v7105_v30 = vld [vmem:[%s8875_s5 + $0x238] sm:$0xff]  }
 0x45e   :  { %6392 = vmatprep.subr.bf16.mxu0 %v7154_v35 }
 0x461   :  { %6393 = vmatpush3.bf16.msra.mxu0 %v7063_v31  ;;  %v4937_v31 = vpack.c.bf16 %v8633_v45, %v8633_v45  ;;  %v5099_v45 = vld [vmem:[%s8878_s8 + $0x78] sm:$0xff] }
 0x462   :  { %6394 = vmatprep.subr.bf16.mxu0 %v7154_v35 }
 0x465   :  { %6395 = vmatpush3.bf16.msra.mxu0 %v7064_v32  ;;  %v5088_v32 = vld [vmem:[%s8878_s8 + $0x20] sm:$0xff] }
 0x466   :  { %6396 = vmatprep.subr.bf16.mxu0 %v7154_v35 }
 0x469   :  { %6397 = vmatpush3.bf16.msra.mxu0 %v7065_v33  ;;  %v5089_v33 = vld [vmem:[%s8878_s8 + $0x28] sm:$0xff] }
 0x46a   :  { %6410 = vmatprep.subr.bf16.mxu0 %v7154_v35  ;;  %v6584_v36 = vpack.c.bf16 %v5089_v33, %v5088_v32 }
 0x46c   :  { %6399 = vmatmul.mubr.bf16.vlgmr.msra.gmra.mrb[48].mxu0 %v4182_v38  ;;  %6585 = vmatpush3.bf16.msra.mxu1 %v6584_v36  ;;  %v5091_v38 = vld [vmem:[%s8878_s8 + $0x38] sm:$0xff] }
 0x46d   :  { %6411 = vmatpush3.bf16.msra.mxu0 %v7066_v40  ;;  %6426 = vmatprep.mubr.msk.bf16.mxu0 %vm7155_vm0, %v7154_v35  ;;  %v5092_v40 = vld [vmem:[%s8878_s8 + $0x40] sm:$0xff] }
 0x46e   :  { %6412 = vmatprep.subr.bf16.mxu0 %v7154_v35  ;;  %6586 = vmatprep.subr.bf16.mxu1 %v7156_v57  ;;  %v6590_v6 = vpack.c.bf16 %v5093_v37, %v5092_v40 }
 0x471   :  { %6413 = vmatpush3.bf16.msra.mxu0 %v7067_v41  ;;  %v5094_v41 = vld [vmem:[%s8878_s8 + $0x50] sm:$0xff] }
 0x472   :  { %6414 = vmatprep.subr.bf16.mxu0 %v7154_v35 }
 0x475   :  { %6415 = vmatpush3.bf16.msra.mxu0 %v7068_v11  ;;  %v5095_v11 = vld [vmem:[%s8878_s8 + $0x58] sm:$0xff] }
 0x476   :  { %6416 = vmatprep.subr.bf16.mxu0 %v7154_v35 }
 0x479   :  { %6417 = vmatpush3.bf16.msra.mxu0 %v7069_v42  ;;  %v6593_v42 = vpack.c.bf16 %v5095_v11, %v5094_v41 }
 0x47a   :  { %6418 = vmatprep.subr.bf16.mxu0 %v7154_v35 }
 0x47d   :  { %6419 = vmatpush3.bf16.msra.mxu0 %v7070_v43  ;;  %v5096_v43 = vld [vmem:[%s8878_s8 + $0x60] sm:$0xff] }
 0x47e   :  { %6420 = vmatprep.subr.bf16.mxu0 %v7154_v35 }
 0x481   :  { %6421 = vmatpush3.bf16.msra.mxu0 %v7071_v44  ;;  %v5097_v44 = vld [vmem:[%s8878_s8 + $0x68] sm:$0xff] }
 0x482   :  { %6422 = vmatprep.subr.bf16.mxu0 %v7154_v35 }
 0x485   :  { %6423 = vmatpush3.bf16.msra.mxu0 %v7072_v46  ;;  %v6596_v46 = vpack.c.bf16 %v5097_v44, %v5096_v43 }
 0x486   :  { %6424 = vmatprep.subr.bf16.mxu0 %v7154_v35 }
 0x489   :  { %6425 = vmatpush3.bf16.msra.mxu0 %v7073_v47  ;;  %v5098_v47 = vld [vmem:[%s8878_s8 + $0x70] sm:$0xff] }
 0x48a   :  { %6438 = vmatprep.subr.bf16.mxu0 %v7154_v35  ;;  %v6599_v48 = vpack.c.bf16 %v5099_v45, %v5098_v47 }
 0x48c   :  { %6427 = vmatmul.mubr.bf16.vlgmr.msra.gmra.mrb[48].mxu0 %v4333_v49  ;;  %v5658_v49 = vld [vmem:[%s8876_s6] ss:$0 sm:$0xff]  ;;  %s7157_s6 = smov [#allocation4]  }
 0x48d   :  { %6439 = vmatpush3.bf16.msra.mxu0 %v7074_v51  ;;  %6454 = vmatprep.mubr.msk.bf16.mxu0 %vm7155_vm0, %v7154_v35  ;;  %v5659_v51 = vld [vmem:[%s8877_s7] ss:$0 sm:$0xff]  ;;  %s5195_s7 = sshll.u32 %s7157_s6, 4  ;;  %s5196_s7 = int_to_ptr.vmem [resolvable:$true] %s5195_s7 }
 0x48e   :  { %6440 = vmatprep.subr.bf16.mxu0 %v7154_v35  ;;  %p7111_p1 = scmp.lt.s32.totalorder %s5196_s7, %s5196_s7 }
 0x491   :  { %6441 = vmatpush3.bf16.msra.mxu0 %v7075_v55 }
 0x492   :  { %6442 = vmatprep.subr.bf16.mxu0 %v7154_v35 }
 0x495   :  { %6443 = vmatpush3.bf16.msra.mxu0 %v7076_v60 }
 0x496   :  { %6444 = vmatprep.subr.bf16.mxu0 %v7154_v35 }
 0x499   :  { %6445 = vmatpush3.bf16.msra.mxu0 %v7077_v61 }
 0x49a   :  { %6446 = vmatprep.subr.bf16.mxu0 %v7154_v35 }
 0x49d   :  { %6447 = vmatpush3.bf16.msra.mxu0 %v7078_v62 }
 0x49e   :  { %6448 = vmatprep.subr.bf16.mxu0 %v7154_v35 }
 0x4a1   :  { %6449 = vmatpush3.bf16.msra.mxu0 %v7079_v63 }
 0x4a2   :  { %6450 = vmatprep.subr.bf16.mxu0 %v7154_v35 }
 0x4a5   :  { %6451 = vmatpush3.bf16.msra.mxu0 %v7080_v0 }
 0x4a6   :  { %6452 = vmatprep.subr.bf16.mxu0 %v7154_v35 }
 0x4a9   :  { %6453 = vmatpush3.bf16.msra.mxu0 %v7081_v2 }
 0x4aa   :  { %6466 = vmatprep.subr.bf16.mxu0 %v7154_v35 }
 0x4ac   :  { %6455 = vmatmul.mubr.bf16.vlgmr.msra.gmra.mrb[48].mxu0 %v4484_v3 }
 0x4ad   :  { %6467 = vmatpush3.bf16.msra.mxu0 %v7082_v5  ;;  %6482 = vmatprep.mubr.msk.bf16.mxu0 %vm7155_vm0, %v7154_v35 }
 0x4ae   :  { %6468 = vmatprep.subr.bf16.mxu0 %v7154_v35 }
 0x4b1   :  { %6469 = vmatpush3.bf16.msra.mxu0 %v7083_v7 }
 0x4b2   :  { %6470 = vmatprep.subr.bf16.mxu0 %v7154_v35 }
 0x4b5   :  { %6471 = vmatpush3.bf16.msra.mxu0 %v7084_v10 }
 0x4b6   :  { %6472 = vmatprep.subr.bf16.mxu0 %v7154_v35 }
 0x4b9   :  { %6473 = vmatpush3.bf16.msra.mxu0 %v7085_v12 }
 0x4ba   :  { %6474 = vmatprep.subr.bf16.mxu0 %v7154_v35 }
 0x4bd   :  { %6475 = vmatpush3.bf16.msra.mxu0 %v7086_v1 }
 0x4be   :  { %6476 = vmatprep.subr.bf16.mxu0 %v7154_v35 }
 0x4c1   :  { %6477 = vmatpush3.bf16.msra.mxu0 %v7087_v14 }
 0x4c2   :  { %6478 = vmatprep.subr.bf16.mxu0 %v7154_v35 }
 0x4c5   :  { %6479 = vmatpush3.bf16.msra.mxu0 %v7088_v4 }
 0x4c6   :  { %6480 = vmatprep.subr.bf16.mxu0 %v7154_v35 }
 0x4c9   :  { %6481 = vmatpush3.bf16.msra.mxu0 %v7089_v15 }
 0x4ca   :  { %6494 = vmatprep.subr.bf16.mxu0 %v7154_v35 }
 0x4cc   :  { %6483 = vmatmul.mubr.bf16.vlgmr.msra.gmra.mrb[48].mxu0 %v4635_v8 }
 0x4cd   :  { %6495 = vmatpush3.bf16.msra.mxu0 %v7090_v17  ;;  %6510 = vmatprep.mubr.msk.bf16.mxu0 %vm7155_vm0, %v7154_v35 }
 0x4ce   :  { %6496 = vmatprep.subr.bf16.mxu0 %v7154_v35 }
 0x4d1   :  { %6497 = vmatpush3.bf16.msra.mxu0 %v7091_v18 }
 0x4d2   :  { %6498 = vmatprep.subr.bf16.mxu0 %v7154_v35 }
 0x4d5   :  { %6499 = vmatpush3.bf16.msra.mxu0 %v7092_v19 }
 0x4d6   :  { %6500 = vmatprep.subr.bf16.mxu0 %v7154_v35 }
 0x4d9   :  { %6501 = vmatpush3.bf16.msra.mxu0 %v7093_v20 }
 0x4da   :  { %6502 = vmatprep.subr.bf16.mxu0 %v7154_v35 }
 0x4dd   :  { %6503 = vmatpush3.bf16.msra.mxu0 %v7094_v21 }
 0x4de   :  { %6504 = vmatprep.subr.bf16.mxu0 %v7154_v35 }
 0x4e1   :  { %6505 = vmatpush3.bf16.msra.mxu0 %v7095_v9 }
 0x4e2   :  { %6506 = vmatprep.subr.bf16.mxu0 %v7154_v35 }
 0x4e5   :  { %6507 = vmatpush3.bf16.msra.mxu0 %v7096_v13 }
 0x4e6   :  { %6508 = vmatprep.subr.bf16.mxu0 %v7154_v35 }
 0x4e9   :  { %6509 = vmatpush3.bf16.msra.mxu0 %v7097_v22 }
 0x4ea   :  { %6522 = vmatprep.subr.bf16.mxu0 %v7154_v35 }
 0x4ec   :  { %6511 = vmatmul.mubr.bf16.vlgmr.msra.gmra.mrb[48].mxu0 %v4786_v59 }
 0x4ed   :  { %6523 = vmatpush3.bf16.msra.mxu0 %v7098_v16  ;;  %6538 = vmatprep.mubr.msk.bf16.mxu0 %vm7155_vm0, %v7154_v35 }
 0x4ee   :  { %6524 = vmatprep.subr.bf16.mxu0 %v7154_v35 }
 0x4f1   :  { %6525 = vmatpush3.bf16.msra.mxu0 %v7099_v23 }
 0x4f2   :  { %6526 = vmatprep.subr.bf16.mxu0 %v7154_v35 }
 0x4f5   :  { %6527 = vmatpush3.bf16.msra.mxu0 %v7100_v24 }
 0x4f6   :  { %6528 = vmatprep.subr.bf16.mxu0 %v7154_v35 }
 0x4f9   :  { %6529 = vmatpush3.bf16.msra.mxu0 %v7101_v25 }
 0x4fa   :  { %6530 = vmatprep.subr.bf16.mxu0 %v7154_v35 }
 0x4fd   :  { %6531 = vmatpush3.bf16.msra.mxu0 %v7102_v26 }
 0x4fe   :  { %6532 = vmatprep.subr.bf16.mxu0 %v7154_v35 }
 0x501   :  { %6533 = vmatpush3.bf16.msra.mxu0 %v7103_v28 }
 0x502   :  { %6534 = vmatprep.subr.bf16.mxu0 %v7154_v35 }
 0x505   :  { %6535 = vmatpush3.bf16.msra.mxu0 %v7104_v29 }
 0x506   :  { %6536 = vmatprep.subr.bf16.mxu0 %v7154_v35  ;;  %v5090_v35 = vld [vmem:[%s8878_s8 + $0x30] sm:$0xff]  ;;  %s7106_s8 = scalar_lea.vmem %s5196_s7, 32 }
 0x507   :  { %v6587_v39 = vpack.c.bf16 %v5091_v38, %v5090_v35  ;;  %p7107_p0 = scmp.ne.s32.totalorder %s5196_s7, %s7106_s8  ;;  %p7112_p2 = scmp.lt.s32.totalorder %s7106_s8, %s7106_s8 }
 0x509   :  { %6537 = vmatpush3.bf16.msra.mxu0 %v7105_v30  ;;  %6588 = vmatpush3.bf16.msra.mxu1 %v6587_v39  ;;  %p7113_p3 = por %p7112_p2, %p7111_p1 }
 0x50a   :  { %6589 = vmatprep.subr.bf16.mxu1 %v7156_v57 }
 0x50b   :  { %p7114_p4 = pnand %p7113_p3, %p7107_p0 }
 0x50c   :  { %6539 = vmatmul.mubr.bf16.vlgmr.msra.gmra.mrb[48].mxu0 %v4937_v31 }
 0x50d   :  { %6591 = vmatpush3.bf16.msra.mxu1 %v6590_v6 }
 0x50e   :  { %6592 = vmatprep.subr.bf16.mxu1 %v7156_v57 }
 0x511   :  { %6594 = vmatpush3.bf16.msra.mxu1 %v6593_v42 }
 0x512   :  { %6595 = vmatprep.subr.bf16.mxu1 %v7156_v57 }
 0x515   :  { %6597 = vmatpush3.bf16.msra.mxu1 %v6596_v46 }
 0x516   :  { %6598 = vmatprep.subr.bf16.mxu1 %v7156_v57 }
 0x519   :  { %6600 = vmatpush3.bf16.msra.mxu1 %v6599_v48 }
 0x5df   :  { %v5036_v50 = vpop.f32.mrb[48].mxu0 }
 0x5e0   :  { %v5050_v27 = vmul.f32 %v5658_v49, %v5036_v50  ;;  %v6540_v52 = vpop.f32.mrb[49].mxu0 }
 0x5e1   :  { %v5039_v53 = vpop.f32.mrb[50].mxu0 }
 0x5e2   :  { %v5058_v54 = vadd.f32 %v5659_v51, %v5050_v27  ;;  %v6541_v55 = vpop.f32.mrb[51].mxu0 }
 0x5e4   :  { %v5059_v34 = vmax.f32 %v5058_v54, 0.0 }
 0x5e6   :  { %v5061_v56 = vsel %vm5060_vm2, %v5059_v34, 0.0  ;;  %v5071_v58 = vrot.slane %v5059_v34, 4 }
 0x5e7   :  { %v5062_v57 = vrot.slane %v5061_v56, 4 }
 0x5e8   :  { %v5073_v60 = vsel %vm5060_vm2, %v5071_v58, 0.0 }
 0x5e9   :  { %v5063_v61 = vadd.f32 %v5062_v57, %v5061_v56  ;;  %v5074_v62 = vrot.slane %v5073_v60, 4 }
 0x5eb   :  { %v5064_v63 = vrot.slane %v5063_v61, 2  ;;  %v5075_v0 = vadd.f32 %v5074_v62, %v5073_v60 }
 0x5ed   :  { %v5065_v2 = vadd.f32 %v5064_v63, %v5063_v61  ;;  %v5076_v3 = vrot.slane %v5075_v0, 2 }
 0x5ef   :  { %v5066_v5 = vrot.slane %v5065_v2, 1  ;;  %v5077_v7 = vadd.f32 %v5076_v3, %v5075_v0 }
 0x5f1   :  { %v5067_v10 = vadd.f32 %v5066_v5, %v5065_v2  ;;  %v5078_v12 = vrot.slane %v5077_v7, 1 }
 0x5f3   :  { %v5079_v1 = vadd.f32 %v5078_v12, %v5077_v7  ;;  %v5069_v14 = vmul.f32 0.25, %v5067_v10 }
 0x5f5   :  { %v5080_v4 = vmul.f32 0.25, %v5079_v1 }
 0x5f7   :  { %v5082_v15 = vsel %vm5081_vm3, %v5069_v14, %v5080_v4 }
 0x5f8   :  { %6575 = vmatmul.mubr.f32.vlgmr.msra.gmra.mrb[128].mxu1 %v5082_v15  ;;  %5083 = vst [vmem:[#allocation4] sm:$0x3] %v5082_v15 }
 0x5f9   :  { %7117 = shalt.err (!%p7114_p4)
}
 0x5fa   :  { %s7118_s4 = scalar_lea.hbm %s8881_s11, 32 }
 0x5fb   :  { %p7119_p5 = scmp.ne.s32.totalorder %s8881_s11, %s7118_s4  ;;  %p7122_p6 = scmp.lt.u32.totalorder %s7118_s4, %s8881_s11 }
 0x5fd   :  { %p7124_p7 = pnand %p7122_p6, %p7119_p5 }
 0x5ff   :  { %7127 = shalt.err (!%p7124_p7)
}
 0x600   :  { %5198 = dma.vmem_to_hbm [thread:$0]  %s5196_s7, 32, %s8881_s11, [#allocation5]   ;;  %v5660_v8 = vld [vmem:[%s8879_s9] ss:$0 sm:$0xff]  ;;  %vm5177_vm4 = vcmask 9216  }
 0x601   :  { %s7158_s12 = smov [#allocation2]  }
 0x602   :  { %s5185_s1 = sshll.u32 %s7158_s12, 4  ;;  %s5186_s1 = int_to_ptr.vmem [resolvable:$true] %s5185_s1 }
 0x603   :  { %s7128_s13 = scalar_lea.vmem %s5186_s1, 32  ;;  %p7133_p9 = scmp.lt.s32.totalorder %s5186_s1, %s5186_s1 }
 0x604   :  { %p7129_p8 = scmp.ne.s32.totalorder %s5186_s1, %s7128_s13  ;;  %p7134_p10 = scmp.lt.s32.totalorder %s7128_s13, %s7128_s13 }
 0x606   :  { %p7135_p11 = por %p7134_p10, %p7133_p9 }
 0x608   :  { %p7136_p12 = pnand %p7135_p11, %p7129_p8 }
 0x6cb   :  { %v5173_v17 = vpop.f32.mrb[128].mxu1 }
 0x6cc   :  { %v5174_v18 = vadd.f32 %v5660_v8, %v5173_v17  ;;  %v6576_v19 = vpop.f32.mrb[129].mxu1 }
 0x6ce   :  { %5178 = vst.msk [vmem:[#allocation2] sm:$0x3] %vm5177_vm4, %v5174_v18 }
 0x6cf   :  { %7139 = shalt.err (!%p7136_p12)
}
 0x6d0   :  { %s7140_s14 = scalar_lea.hbm %s8880_s10, 32 }
 0x6d1   :  { %p7141_p13 = scmp.ne.s32.totalorder %s8880_s10, %s7140_s14  ;;  %p7144_p0 = scmp.lt.u32.totalorder %s7140_s14, %s8880_s10 }
 0x6d3   :  { %p7146_p1 = pnand %p7144_p0, %p7141_p13 }
 0x6d5   :  { %7149 = shalt.err (!%p7146_p1)
}
 0x6d6   :  { %5188 = dma.vmem_to_hbm [thread:$0]  %s5186_s1, 32, %s8880_s10, [#allocation3]  }
 0x6d7   :  { %7150 = dma.done.wait [#allocation3], 32  }
 0x6d8   :  { %7151 = vsyncadd [#allocation3], 4294967264 }
 0x6d9   :  { %7152 = dma.done.wait [#allocation5], 32  }
 0x6da   :  { %7153 = vsyncadd [#allocation5], 4294967264 }
 0x6db   :  { %5205 = vsyncpa [#allocation3], 1 }
 0x6dc   :  { %5206 = vsyncpa [#allocation5], 1 }

</bundles_post_ra>
